<compile_context>
chip_gen: v7x
topology: tpu7x:2x2x1
jax: 0.10.0
libtpu: 0.0.40
codegen_flags: <defaults>
</compile_context>

<pallas_src>
import jax
import jax.numpy as jnp
from jax.experimental import pallas as pl
from jax.experimental.pallas import tpu as pltpu


# ----------------------------------------------------------------------------
# Fused forward kernel (whole model, VMEM-resident, grid=(1,))
# ----------------------------------------------------------------------------
def _ucitr_fused_kernel(
    # data
    x_ref, td_ref, mk_ref,
    # packed interval+mask encoders (feature layout [interval | mask])
    wd_enc_i_ref, wd_enc_m_ref, bd_enc_ref,
    wx_enc_i_ref, wx_enc_m_ref, b_enc_ref, wh_enc_ref,
    # interval decoder
    wd_dec_ref, bd_dec_ref, wx_dec_ref, wh_dec_ref, b_dec_ref,
    # linear_h / linear_c / linear_encoder
    w_lh_ref, b_lh_ref, w_lc_ref, b_lc_ref, w_lenc_ref, b_lenc_ref,
    # folded conv_encode{1,2,3} + embedding_linear
    g_emb_ref, b_emb_ref,
    # Wk heads and linear_decoder
    wk_ref, bk_ref, w_do_ref, b_do_ref,
    # outputs
    th_ref, out_ref, pred_ref, hback_ref,
    # scratch (VMEM)
    henc_seq, hdec_seq,
):
    B, L, D = x_ref.shape
    H = w_lh_ref.shape[1]
    P = wk_ref.shape[0]
    C = L - P
    D2 = 2 * D
    f32 = jnp.float32

    def mm(a, b):
        return jnp.dot(a, b, preferred_element_type=f32)

    x = x_ref[...]
    mk = mk_ref[...]
    x2 = x.reshape(B * L, D)
    xm2 = (x * mk).reshape(B * L, D)
    mk2 = mk.reshape(B * L, D)
    td2 = td_ref[...].reshape(B * L, D)

    # ---- hoisted (non-recurrent) projections for both encoders, packed -----
    gamma_enc = jnp.exp(-jnp.maximum(
        mm(td2, wd_enc_i_ref[...]) + mm(mk2, wd_enc_m_ref[...]) + bd_enc_ref[...],
        0.0)).reshape(B, L, D2)                                   # [gamma_i | gamma_m]
    xg_enc = (mm(x2, wx_enc_i_ref[...]) + mm(xm2, wx_enc_m_ref[...])
              + b_enc_ref[...]).reshape(B, L, 8 * D)              # packed gates

    # ---- hoisted projections for the decoder --------------------------------
    gamma_dec = jnp.exp(-jnp.maximum(
        mm(td2, wd_dec_ref[...]) + bd_dec_ref[...], 0.0)).reshape(B, L, H)
    xg_dec = mm(x2, wx_dec_ref[...]).reshape(B, L, 4 * H)         # bias added per step

    # ---- interval + mask encoder LSTMs: one packed chain, unrolled over L ---
    wh_enc = wh_enc_ref[...]
    h = jnp.zeros((B, D2), f32)
    c = jnp.zeros((B, D2), f32)
    for t in range(L):
        xg_t = xg_enc[:, t, :]
        gates = xg_t if t == 0 else xg_t + mm(h, wh_enc)          # h0 == 0: skip dot
        i_g = jax.nn.sigmoid(gates[:, 0 * D2:1 * D2])
        f_g = jax.nn.sigmoid(gates[:, 1 * D2:2 * D2])
        g_g = jnp.tanh(gates[:, 2 * D2:3 * D2])
        o_g = jax.nn.sigmoid(gates[:, 3 * D2:4 * D2])
        c = f_g * (c * gamma_enc[:, t, :]) + i_g * g_g
        h = o_g * jnp.tanh(c)
        henc_seq[:, t:t + 1, :] = h.reshape(B, 1, D2)

    # h == [ihT | mhT], c == [icT | mcT]  (already the torch.cat of the module)
    hd = jnp.tanh(mm(h, w_lh_ref[...]) + b_lh_ref[...])           # decoder h0
    cd = jnp.tanh(mm(c, w_lc_ref[...]) + b_lc_ref[...])           # decoder c0

    # hidden = linear_encoder(cat(hid_interval, hid_mask))
    hidden = (mm(henc_seq[...].reshape(B * L, D2), w_lenc_ref[...])
              + b_lenc_ref[...]).reshape(B, L, 256)
    hback_ref[...] = hidden[:, C:, :]

    # ConvTranspose1d x3 + cat + embedding_linear, folded into C tiny matmuls
    # against the precomputed (C, 256, H) map g_emb (conv biases folded in b_emb).
    th = b_emb_ref[...] + mm(hidden[:, 0, :], g_emb_ref[0])
    for ci in range(1, C):
        th = th + mm(hidden[:, ci, :], g_emb_ref[ci])
    th_ref[...] = th                                              # total_hidden

    # pred[:, i] = Wk[i](total_hidden)
    for i in range(P):
        pred_ref[:, i:i + 1, :] = (mm(th, wk_ref[i]) + bk_ref[i]).reshape(B, 1, 256)

    # ---- decoder LSTM on [0, flip(inputs[:, 1:])], unrolled ------------------
    wh_dec = wh_dec_ref[...]
    b_dec = b_dec_ref[...]
    for t in range(L):
        rec = mm(hd, wh_dec) + b_dec
        gates = rec if t == 0 else rec + xg_dec[:, L - t, :]      # flipped input
        i_g = jax.nn.sigmoid(gates[:, 0 * H:1 * H])
        f_g = jax.nn.sigmoid(gates[:, 1 * H:2 * H])
        g_g = jnp.tanh(gates[:, 2 * H:3 * H])
        o_g = jax.nn.sigmoid(gates[:, 3 * H:4 * H])
        cd = f_g * (cd * gamma_dec[:, t, :]) + i_g * g_g
        hd = o_g * jnp.tanh(cd)
        hdec_seq[:, L - 1 - t:L - t, :] = hd.reshape(B, 1, H)     # stored time-flipped

    out = mm(hdec_seq[...].reshape(B * L, H), w_do_ref[...]) + b_do_ref[...]
    out_ref[...] = out.reshape(B, L, D)


def _full_spec(shape):
    nd = len(shape)
    return pl.BlockSpec(shape, lambda i, _nd=nd: (0,) * _nd)


def ucitr_forward(pp, inputs, time_delat, missing_mask):
    """Single fused pallas_call for the whole UCITR forward."""
    B, L, D = inputs.shape
    H = pp["w_lh"].shape[1]
    P = pp["wk"].shape[0]

    ops = (inputs, time_delat, missing_mask,
           pp["wd_enc_i"], pp["wd_enc_m"], pp["bd_enc"],
           pp["wx_enc_i"], pp["wx_enc_m"], pp["b_enc"], pp["wh_enc"],
           pp["wd_dec"], pp["bd_dec"], pp["wx_dec"], pp["wh_dec"], pp["b_dec"],
           pp["w_lh"], pp["b_lh"], pp["w_lc"], pp["b_lc"],
           pp["w_lenc"], pp["b_lenc"],
           pp["g_emb"], pp["b_emb"],
           pp["wk"], pp["bk"],
           pp["w_do"], pp["b_do"])

    out_shape = (jax.ShapeDtypeStruct((B, H), jnp.float32),        # total_hidden
                 jax.ShapeDtypeStruct((B, L, D), jnp.float32),     # output
                 jax.ShapeDtypeStruct((B, P, 256), jnp.float32),   # pred
                 jax.ShapeDtypeStruct((B, P, 256), jnp.float32))   # hidden_back

    return pl.pallas_call(
        _ucitr_fused_kernel,
        out_shape=out_shape,
        grid=(1,),
        in_specs=[_full_spec(o.shape) for o in ops],
        out_specs=tuple(_full_spec(s.shape) for s in out_shape),
        scratch_shapes=[pltpu.VMEM((B, L, 2 * D), jnp.float32),    # packed encoder hidden seq
                        pltpu.VMEM((B, L, H), jnp.float32)],       # flipped decoder hidden seq
        compiler_params=pltpu.CompilerParams(dimension_semantics=("arbitrary",)),
    )(*ops)


# ----------------------------------------------------------------------------
# One-time host-side parameter packing (run eagerly, outside jit)
# ----------------------------------------------------------------------------
def pack_params(p):
    D = p["Wd_i"].shape[0]
    H = p["W_lh"].shape[1]
    P = p["W_k"].shape[0]
    C = p["w_conv1"].shape[0]          # = length - predict_timestep
    D2 = 2 * D
    I = 256
    f32 = jnp.float32

    zDD = jnp.zeros((D, D), f32)
    wd_enc_i = jnp.concatenate([p["Wd_i"], zDD], axis=1)           # (D, 2D)  [Wd_i | 0]
    wd_enc_m = jnp.concatenate([zDD, p["Wd_m"]], axis=1)           # (D, 2D)  [0 | Wd_m]
    bd_enc = jnp.concatenate([p["bd_i"], p["bd_m"]]).reshape(1, D2)

    # Packed gate column layout: [i_i|i_m | f_i|f_m | g_i|g_m | o_i|o_m], D each.
    def pack_cols(W, mask_side):
        n = W.shape[0]
        out = jnp.zeros((n, 8 * D), f32)
        for g in range(4):
            col = (2 * g + (1 if mask_side else 0)) * D
            out = out.at[:, col:col + D].set(W[:, g * D:(g + 1) * D])
        return out

    wx_enc_i = pack_cols(p["Wx_i"], False)                         # (D, 8D) acts on x
    wx_enc_m = pack_cols(p["Wx_m"], True)                          # (D, 8D) acts on x*mask
    wh_enc = jnp.concatenate([pack_cols(p["Wh_i"], False),         # rows for h_i
                              pack_cols(p["Wh_m"], True)], axis=0)  # rows for h_m -> (2D, 8D)
    b_parts = []
    for g in range(4):
        b_parts.append(p["b_i"][g * D:(g + 1) * D])
        b_parts.append(p["b_m"][g * D:(g + 1) * D])
    b_enc = jnp.concatenate(b_parts).reshape(1, 8 * D)

    # Fold ConvTranspose1d(x3) + cat + embedding_linear into one (C, 256, H) map:
    # total_hidden[b,h] = b_tot[h] + sum_{c,i} hidden_front[b,c,i] * G[c,i,h].
    G = jnp.zeros((C, I, H), f32)
    b_emb_tot = p["b_emb"]
    off = 0
    for w, bc in ((p["w_conv1"], p["b_conv1"]),
                  (p["w_conv2"], p["b_conv2"]),
                  (p["w_conv3"], p["b_conv3"])):
        K = w.shape[1]
        Wb = p["W_emb"][off:off + I + K - 1]                       # (I+K-1, H)
        idx = jnp.arange(I)[:, None] + jnp.arange(K)[None, :]      # (I, K)
        Wsl = Wb[idx]                                              # (I, K, H)
        G = G + jnp.einsum("ck,ikh->cih", w, Wsl,
                           precision=jax.lax.Precision.HIGHEST)
        b_emb_tot = b_emb_tot + bc * jnp.sum(Wb, axis=0)
        off += I + K - 1
    assert off == p["W_emb"].shape[0]

    return dict(
        wd_enc_i=wd_enc_i, wd_enc_m=wd_enc_m, bd_enc=bd_enc,
        wx_enc_i=wx_enc_i, wx_enc_m=wx_enc_m, b_enc=b_enc, wh_enc=wh_enc,
        wd_dec=p["Wd_dec"], bd_dec=p["bd_dec"].reshape(1, H),
        wx_dec=p["Wx_dec"], wh_dec=p["Wh_dec"], b_dec=p["b_dec"].reshape(1, 4 * H),
        w_lh=p["W_lh"], b_lh=p["b_lh"].reshape(1, H),
        w_lc=p["W_lc"], b_lc=p["b_lc"].reshape(1, H),
        w_lenc=p["W_lenc"], b_lenc=p["b_lenc"].reshape(1, 256),
        g_emb=G, b_emb=b_emb_tot.reshape(1, H),
        wk=p["W_k"], bk=p["b_k"].reshape(P, 1, 256),
        w_do=p["W_dec_out"], b_do=p["b_dec_out"].reshape(1, p["W_dec_out"].shape[1]),
    )


# ----------------------------------------------------------------------------
# Raw (unpacked) parameters + pure-JAX reference of the un-fused module math
# ----------------------------------------------------------------------------
def make_params(key, L, D, H, P):
    def init(k, shape, scale=0.1):
        return scale * jax.random.normal(k, shape, jnp.float32)

    ks = iter(jax.random.split(key, 64))
    p = {}
    p["Wx_i"] = init(next(ks), (D, 4 * D)); p["Wh_i"] = init(next(ks), (D, 4 * D))
    p["b_i"] = init(next(ks), (4 * D,))
    p["Wd_i"] = init(next(ks), (D, D)); p["bd_i"] = init(next(ks), (D,))
    p["Wx_m"] = init(next(ks), (D, 4 * D)); p["Wh_m"] = init(next(ks), (D, 4 * D))
    p["b_m"] = init(next(ks), (4 * D,))
    p["Wd_m"] = init(next(ks), (D, D)); p["bd_m"] = init(next(ks), (D,))
    p["Wx_dec"] = init(next(ks), (D, 4 * H)); p["Wh_dec"] = init(next(ks), (H, 4 * H))
    p["b_dec"] = init(next(ks), (4 * H,))
    p["Wd_dec"] = init(next(ks), (D, H)); p["bd_dec"] = init(next(ks), (H,))
    p["W_lh"] = init(next(ks), (2 * D, H)); p["b_lh"] = init(next(ks), (H,))
    p["W_lc"] = init(next(ks), (2 * D, H)); p["b_lc"] = init(next(ks), (H,))
    p["W_lenc"] = init(next(ks), (2 * D, 256)); p["b_lenc"] = init(next(ks), (256,))
    p["W_emb"] = init(next(ks), (804, H)); p["b_emb"] = init(next(ks), (H,))
    p["w_conv1"] = init(next(ks), (L - P, 5));  p["b_conv1"] = init(next(ks), ())
    p["w_conv2"] = init(next(ks), (L - P, 11)); p["b_conv2"] = init(next(ks), ())
    p["w_conv3"] = init(next(ks), (L - P, 23)); p["b_conv3"] = init(next(ks), ())
    p["W_k"] = init(next(ks), (P, H, 256)); p["b_k"] = init(next(ks), (P, 256))
    p["W_dec_out"] = init(next(ks), (H, D)); p["b_dec_out"] = init(next(ks), (D,))
    return p


def _ref_lstm(x_seq, gamma_seq, wx, wh, b, h0, c0):
    B, L, _ = x_seq.shape
    Hc = h0.shape[1]
    h, c = h0, c0
    hs = []
    for t in range(L):
        gates = x_seq[:, t] @ wx + b + h @ wh
        i_g = jax.nn.sigmoid(gates[:, :Hc])
        f_g = jax.nn.sigmoid(gates[:, Hc:2 * Hc])
        g_g = jnp.tanh(gates[:, 2 * Hc:3 * Hc])
        o_g = jax.nn.sigmoid(gates[:, 3 * Hc:])
        c = f_g * (c * gamma_seq[:, t]) + i_g * g_g
        h = o_g * jnp.tanh(c)
        hs.append(h)
    return jnp.stack(hs, axis=1), h, c


def ref_forward(p, inputs, td, mm_):
    B, L, D = inputs.shape
    P = p["W_k"].shape[0]
    zD = jnp.zeros((B, D), jnp.float32)
    gam_i = jnp.exp(-jnp.maximum(td @ p["Wd_i"] + p["bd_i"], 0.0))
    hid_i, ihT, icT = _ref_lstm(inputs, gam_i, p["Wx_i"], p["Wh_i"], p["b_i"], zD, zD)
    gam_m = jnp.exp(-jnp.maximum(mm_ @ p["Wd_m"] + p["bd_m"], 0.0))
    hid_m, mhT, mcT = _ref_lstm(inputs * mm_, gam_m, p["Wx_m"], p["Wh_m"], p["b_m"], zD, zD)
    lin_h = jnp.tanh(jnp.concatenate([ihT, mhT], 1) @ p["W_lh"] + p["b_lh"])
    lin_c = jnp.tanh(jnp.concatenate([icT, mcT], 1) @ p["W_lc"] + p["b_lc"])
    hidden = jnp.concatenate([hid_i, hid_m], 2) @ p["W_lenc"] + p["b_lenc"]
    hf = hidden[:, :L - P, :]

    def convT(xx, w, b):
        Bc, _, I = xx.shape
        K = w.shape[1]
        U = jnp.einsum("bci,ck->bik", xx, w)
        out = jnp.zeros((Bc, I + K - 1), jnp.float32)
        for k in range(K):
            out = out.at[:, k:k + I].add(U[:, :, k])
        return out + b

    cat = jnp.concatenate([convT(hf, p["w_conv1"], p["b_conv1"]),
                           convT(hf, p["w_conv2"], p["b_conv2"]),
                           convT(hf, p["w_conv3"], p["b_conv3"])], axis=1)
    th = cat @ p["W_emb"] + p["b_emb"]
    dec_in = jnp.concatenate([jnp.zeros((B, 1, D), jnp.float32),
                              jnp.flip(inputs[:, 1:], axis=1)], axis=1)
    gam_d = jnp.exp(-jnp.maximum(td @ p["Wd_dec"] + p["bd_dec"], 0.0))
    dec_hid, _, _ = _ref_lstm(dec_in, gam_d, p["Wx_dec"], p["Wh_dec"], p["b_dec"],
                              lin_h, lin_c)
    output = jnp.flip(dec_hid, axis=1) @ p["W_dec_out"] + p["b_dec_out"]
    pred = jnp.einsum("bh,phn->bpn", th, p["W_k"]) + p["b_k"]
    return th, output, pred, hidden[:, L - P:, :]


if __name__ == "__main__":
    B, L, D, H, P = 2, 8, 8, 32, 2   # batch, length, input_dim, hidden_dim, predict_timestep

    key = jax.random.PRNGKey(0)
    k_in, k_dt, k_mask, k_par = jax.random.split(key, 4)
    inputs = jax.random.normal(k_in, (B, L, D), jnp.float32)
    time_delat = jnp.abs(jax.random.normal(k_dt, (B, L, D), jnp.float32))
    missing_mask = (jax.random.uniform(k_mask, (B, L, D)) > 0.3).astype(jnp.float32)

    params = make_params(k_par, L, D, H, P)
    packed = pack_params(params)     # eager, one-time host-side repack

    fwd = jax.jit(ucitr_forward)
    total_hidden, output, pred, hidden_back = fwd(packed, inputs, time_delat, missing_mask)
    jax.block_until_ready((total_hidden, output, pred, hidden_back))

    assert total_hidden.shape == (B, H)
    assert output.shape == (B, L, D)
    assert pred.shape == (B, P, 256)
    assert hidden_back.shape == (B, P, 256)

    # Numeric check against the un-fused plain-JAX reference (loose tolerance:
    # MXU default matmul precision + algebraic refactoring of the conv fold).
    refs = jax.jit(ref_forward)(params, inputs, time_delat, missing_mask)
    jax.block_until_ready(refs)
    for name, got, want in zip(("total_hidden", "output", "pred", "hidden_back"),
                               (total_hidden, output, pred, hidden_back), refs):
        assert jnp.allclose(got, want, rtol=5e-2, atol=5e-2), (
            name, float(jnp.max(jnp.abs(got - want))))

    print("KERNEL_OK")
</pallas_src>

<mosaic_0001>
module attributes {stable_mosaic.version = 11 : i64} {
  func.func @_ucitr_fused_kernel(%arg0: i32, %arg1: memref<2x8x8xf32, #tpu.memory_space<vmem>>, %arg2: memref<2x8x8xf32, #tpu.memory_space<vmem>>, %arg3: memref<2x8x8xf32, #tpu.memory_space<vmem>>, %arg4: memref<8x16xf32, #tpu.memory_space<vmem>>, %arg5: memref<8x16xf32, #tpu.memory_space<vmem>>, %arg6: memref<1x16xf32, #tpu.memory_space<vmem>>, %arg7: memref<8x64xf32, #tpu.memory_space<vmem>>, %arg8: memref<8x64xf32, #tpu.memory_space<vmem>>, %arg9: memref<1x64xf32, #tpu.memory_space<vmem>>, %arg10: memref<16x64xf32, #tpu.memory_space<vmem>>, %arg11: memref<8x32xf32, #tpu.memory_space<vmem>>, %arg12: memref<1x32xf32, #tpu.memory_space<vmem>>, %arg13: memref<8x128xf32, #tpu.memory_space<vmem>>, %arg14: memref<32x128xf32, #tpu.memory_space<vmem>>, %arg15: memref<1x128xf32, #tpu.memory_space<vmem>>, %arg16: memref<16x32xf32, #tpu.memory_space<vmem>>, %arg17: memref<1x32xf32, #tpu.memory_space<vmem>>, %arg18: memref<16x32xf32, #tpu.memory_space<vmem>>, %arg19: memref<1x32xf32, #tpu.memory_space<vmem>>, %arg20: memref<16x256xf32, #tpu.memory_space<vmem>>, %arg21: memref<1x256xf32, #tpu.memory_space<vmem>>, %arg22: memref<6x256x32xf32, #tpu.memory_space<vmem>>, %arg23: memref<1x32xf32, #tpu.memory_space<vmem>>, %arg24: memref<2x32x256xf32, #tpu.memory_space<vmem>>, %arg25: memref<2x1x256xf32, #tpu.memory_space<vmem>>, %arg26: memref<32x8xf32, #tpu.memory_space<vmem>>, %arg27: memref<1x8xf32, #tpu.memory_space<vmem>>, %arg28: memref<2x32xf32, #tpu.memory_space<vmem>>, %arg29: memref<2x8x8xf32, #tpu.memory_space<vmem>>, %arg30: memref<2x2x256xf32, #tpu.memory_space<vmem>>, %arg31: memref<2x2x256xf32, #tpu.memory_space<vmem>>, %arg32: memref<2x8x16xf32, #tpu.memory_space<vmem>>, %arg33: memref<2x8x32xf32, #tpu.memory_space<vmem>>) attributes {dimension_semantics = [#tpu.dimension_semantics<arbitrary>], iteration_bounds = array<i64: 1>, scalar_prefetch = 0 : i64, scratch_operands = 2 : i64, tpu.core_type = #tpu.core_type<tc>, window_params = [{pipeline_mode = #tpu.pipeline_mode<synchronous>, transform_indices = @transform_0, window_bounds = array<i64: 2, 8, 8>}, {pipeline_mode = #tpu.pipeline_mode<synchronous>, transform_indices = @transform_1, window_bounds = array<i64: 2, 8, 8>}, {pipeline_mode = #tpu.pipeline_mode<synchronous>, transform_indices = @transform_2, window_bounds = array<i64: 2, 8, 8>}, {pipeline_mode = #tpu.pipeline_mode<synchronous>, transform_indices = @transform_3, window_bounds = array<i64: 8, 16>}, {pipeline_mode = #tpu.pipeline_mode<synchronous>, transform_indices = @transform_4, window_bounds = array<i64: 8, 16>}, {pipeline_mode = #tpu.pipeline_mode<synchronous>, transform_indices = @transform_5, window_bounds = array<i64: 1, 16>}, {pipeline_mode = #tpu.pipeline_mode<synchronous>, transform_indices = @transform_6, window_bounds = array<i64: 8, 64>}, {pipeline_mode = #tpu.pipeline_mode<synchronous>, transform_indices = @transform_7, window_bounds = array<i64: 8, 64>}, {pipeline_mode = #tpu.pipeline_mode<synchronous>, transform_indices = @transform_8, window_bounds = array<i64: 1, 64>}, {pipeline_mode = #tpu.pipeline_mode<synchronous>, transform_indices = @transform_9, window_bounds = array<i64: 16, 64>}, {pipeline_mode = #tpu.pipeline_mode<synchronous>, transform_indices = @transform_10, window_bounds = array<i64: 8, 32>}, {pipeline_mode = #tpu.pipeline_mode<synchronous>, transform_indices = @transform_11, window_bounds = array<i64: 1, 32>}, {pipeline_mode = #tpu.pipeline_mode<synchronous>, transform_indices = @transform_12, window_bounds = array<i64: 8, 128>}, {pipeline_mode = #tpu.pipeline_mode<synchronous>, transform_indices = @transform_13, window_bounds = array<i64: 32, 128>}, {pipeline_mode = #tpu.pipeline_mode<synchronous>, transform_indices = @transform_14, window_bounds = array<i64: 1, 128>}, {pipeline_mode = #tpu.pipeline_mode<synchronous>, transform_indices = @transform_15, window_bounds = array<i64: 16, 32>}, {pipeline_mode = #tpu.pipeline_mode<synchronous>, transform_indices = @transform_16, window_bounds = array<i64: 1, 32>}, {pipeline_mode = #tpu.pipeline_mode<synchronous>, transform_indices = @transform_17, window_bounds = array<i64: 16, 32>}, {pipeline_mode = #tpu.pipeline_mode<synchronous>, transform_indices = @transform_18, window_bounds = array<i64: 1, 32>}, {pipeline_mode = #tpu.pipeline_mode<synchronous>, transform_indices = @transform_19, window_bounds = array<i64: 16, 256>}, {pipeline_mode = #tpu.pipeline_mode<synchronous>, transform_indices = @transform_20, window_bounds = array<i64: 1, 256>}, {pipeline_mode = #tpu.pipeline_mode<synchronous>, transform_indices = @transform_21, window_bounds = array<i64: 6, 256, 32>}, {pipeline_mode = #tpu.pipeline_mode<synchronous>, transform_indices = @transform_22, window_bounds = array<i64: 1, 32>}, {pipeline_mode = #tpu.pipeline_mode<synchronous>, transform_indices = @transform_23, window_bounds = array<i64: 2, 32, 256>}, {pipeline_mode = #tpu.pipeline_mode<synchronous>, transform_indices = @transform_24, window_bounds = array<i64: 2, 1, 256>}, {pipeline_mode = #tpu.pipeline_mode<synchronous>, transform_indices = @transform_25, window_bounds = array<i64: 32, 8>}, {pipeline_mode = #tpu.pipeline_mode<synchronous>, transform_indices = @transform_26, window_bounds = array<i64: 1, 8>}, {pipeline_mode = #tpu.pipeline_mode<synchronous>, transform_indices = @transform_27, window_bounds = array<i64: 2, 32>}, {pipeline_mode = #tpu.pipeline_mode<synchronous>, transform_indices = @transform_28, window_bounds = array<i64: 2, 8, 8>}, {pipeline_mode = #tpu.pipeline_mode<synchronous>, transform_indices = @transform_29, window_bounds = array<i64: 2, 2, 256>}, {pipeline_mode = #tpu.pipeline_mode<synchronous>, transform_indices = @transform_30, window_bounds = array<i64: 2, 2, 256>}]} {
    %c0 = arith.constant 0 : index
    %c0_0 = arith.constant 0 : index
    %c0_1 = arith.constant 0 : index
    %0 = vector.load %arg1[%c0, %c0_0, %c0_1] : memref<2x8x8xf32, #tpu.memory_space<vmem>>, vector<2x8x8xf32>
    %c0_2 = arith.constant 0 : index
    %c0_3 = arith.constant 0 : index
    %c0_4 = arith.constant 0 : index
    %1 = vector.load %arg3[%c0_2, %c0_3, %c0_4] : memref<2x8x8xf32, #tpu.memory_space<vmem>>, vector<2x8x8xf32>
    %2 = vector.shape_cast %0 : vector<2x8x8xf32> to vector<16x8xf32>
    %3 = arith.mulf %0, %1 : vector<2x8x8xf32>
    %4 = vector.shape_cast %3 : vector<2x8x8xf32> to vector<16x8xf32>
    %5 = vector.shape_cast %1 : vector<2x8x8xf32> to vector<16x8xf32>
    %c0_5 = arith.constant 0 : index
    %c0_6 = arith.constant 0 : index
    %c0_7 = arith.constant 0 : index
    %6 = vector.load %arg2[%c0_5, %c0_6, %c0_7] : memref<2x8x8xf32, #tpu.memory_space<vmem>>, vector<2x8x8xf32>
    %7 = vector.shape_cast %6 : vector<2x8x8xf32> to vector<16x8xf32>
    %c0_8 = arith.constant 0 : index
    %c0_9 = arith.constant 0 : index
    %8 = vector.load %arg4[%c0_8, %c0_9] : memref<8x16xf32, #tpu.memory_space<vmem>>, vector<8x16xf32>
    %cst = arith.constant dense<0.000000e+00> : vector<16x16xf32>
    %9 = tpu.matmul %7, %8, %cst {dimension_numbers = #tpu.dot_dimension_numbers<[1], [0], [0], [1], [0, 0, 1, 1], [], []>} : vector<16x8xf32>, vector<8x16xf32>, vector<16x16xf32> -> vector<16x16xf32>
    %c0_10 = arith.constant 0 : index
    %c0_11 = arith.constant 0 : index
    %10 = vector.load %arg5[%c0_10, %c0_11] : memref<8x16xf32, #tpu.memory_space<vmem>>, vector<8x16xf32>
    %cst_12 = arith.constant dense<0.000000e+00> : vector<16x16xf32>
    %11 = tpu.matmul %5, %10, %cst_12 {dimension_numbers = #tpu.dot_dimension_numbers<[1], [0], [0], [1], [0, 0, 1, 1], [], []>} : vector<16x8xf32>, vector<8x16xf32>, vector<16x16xf32> -> vector<16x16xf32>
    %12 = arith.addf %9, %11 : vector<16x16xf32>
    %c0_13 = arith.constant 0 : index
    %c0_14 = arith.constant 0 : index
    %13 = vector.load %arg6[%c0_13, %c0_14] : memref<1x16xf32, #tpu.memory_space<vmem>>, vector<1x16xf32>
    %14 = vector.broadcast %13 : vector<1x16xf32> to vector<16x16xf32>
    %15 = arith.addf %12, %14 : vector<16x16xf32>
    %cst_15 = arith.constant 0.000000e+00 : f32
    %16 = vector.broadcast %cst_15 : f32 to vector<16x16xf32>
    %17 = arith.maximumf %15, %16 : vector<16x16xf32>
    %cst_16 = arith.constant 0.000000e+00 : f32
    %18 = vector.broadcast %cst_16 : f32 to vector<16x16xf32>
    %19 = arith.subf %18, %17 : vector<16x16xf32>
    %20 = math.exp %19 : vector<16x16xf32>
    %21 = vector.shape_cast %20 : vector<16x16xf32> to vector<2x8x16xf32>
    %c0_17 = arith.constant 0 : index
    %c0_18 = arith.constant 0 : index
    %22 = vector.load %arg7[%c0_17, %c0_18] : memref<8x64xf32, #tpu.memory_space<vmem>>, vector<8x64xf32>
    %cst_19 = arith.constant dense<0.000000e+00> : vector<16x64xf32>
    %23 = tpu.matmul %2, %22, %cst_19 {dimension_numbers = #tpu.dot_dimension_numbers<[1], [0], [0], [1], [0, 0, 1, 1], [], []>} : vector<16x8xf32>, vector<8x64xf32>, vector<16x64xf32> -> vector<16x64xf32>
    %c0_20 = arith.constant 0 : index
    %c0_21 = arith.constant 0 : index
    %24 = vector.load %arg8[%c0_20, %c0_21] : memref<8x64xf32, #tpu.memory_space<vmem>>, vector<8x64xf32>
    %cst_22 = arith.constant dense<0.000000e+00> : vector<16x64xf32>
    %25 = tpu.matmul %4, %24, %cst_22 {dimension_numbers = #tpu.dot_dimension_numbers<[1], [0], [0], [1], [0, 0, 1, 1], [], []>} : vector<16x8xf32>, vector<8x64xf32>, vector<16x64xf32> -> vector<16x64xf32>
    %26 = arith.addf %23, %25 : vector<16x64xf32>
    %c0_23 = arith.constant 0 : index
    %c0_24 = arith.constant 0 : index
    %27 = vector.load %arg9[%c0_23, %c0_24] : memref<1x64xf32, #tpu.memory_space<vmem>>, vector<1x64xf32>
    %28 = vector.broadcast %27 : vector<1x64xf32> to vector<16x64xf32>
    %29 = arith.addf %26, %28 : vector<16x64xf32>
    %30 = vector.shape_cast %29 : vector<16x64xf32> to vector<2x8x64xf32>
    %c0_25 = arith.constant 0 : index
    %c0_26 = arith.constant 0 : index
    %31 = vector.load %arg11[%c0_25, %c0_26] : memref<8x32xf32, #tpu.memory_space<vmem>>, vector<8x32xf32>
    %cst_27 = arith.constant dense<0.000000e+00> : vector<16x32xf32>
    %32 = tpu.matmul %7, %31, %cst_27 {dimension_numbers = #tpu.dot_dimension_numbers<[1], [0], [0], [1], [0, 0, 1, 1], [], []>} : vector<16x8xf32>, vector<8x32xf32>, vector<16x32xf32> -> vector<16x32xf32>
    %c0_28 = arith.constant 0 : index
    %c0_29 = arith.constant 0 : index
    %33 = vector.load %arg12[%c0_28, %c0_29] : memref<1x32xf32, #tpu.memory_space<vmem>>, vector<1x32xf32>
    %34 = vector.broadcast %33 : vector<1x32xf32> to vector<16x32xf32>
    %35 = arith.addf %32, %34 : vector<16x32xf32>
    %cst_30 = arith.constant 0.000000e+00 : f32
    %36 = vector.broadcast %cst_30 : f32 to vector<16x32xf32>
    %37 = arith.maximumf %35, %36 : vector<16x32xf32>
    %cst_31 = arith.constant 0.000000e+00 : f32
    %38 = vector.broadcast %cst_31 : f32 to vector<16x32xf32>
    %39 = arith.subf %38, %37 : vector<16x32xf32>
    %40 = math.exp %39 : vector<16x32xf32>
    %41 = vector.shape_cast %40 : vector<16x32xf32> to vector<2x8x32xf32>
    %c0_32 = arith.constant 0 : index
    %c0_33 = arith.constant 0 : index
    %42 = vector.load %arg13[%c0_32, %c0_33] : memref<8x128xf32, #tpu.memory_space<vmem>>, vector<8x128xf32>
    %cst_34 = arith.constant dense<0.000000e+00> : vector<16x128xf32>
    %43 = tpu.matmul %2, %42, %cst_34 {dimension_numbers = #tpu.dot_dimension_numbers<[1], [0], [0], [1], [0, 0, 1, 1], [], []>} : vector<16x8xf32>, vector<8x128xf32>, vector<16x128xf32> -> vector<16x128xf32>
    %44 = vector.shape_cast %43 : vector<16x128xf32> to vector<2x8x128xf32>
    %c0_35 = arith.constant 0 : index
    %c0_36 = arith.constant 0 : index
    %45 = vector.load %arg10[%c0_35, %c0_36] : memref<16x64xf32, #tpu.memory_space<vmem>>, vector<16x64xf32>
    %cst_37 = arith.constant 0.000000e+00 : f32
    %46 = vector.broadcast %cst_37 : f32 to vector<2x16xf32>
    %47 = vector.extract_strided_slice %30 {offsets = [0, 0, 0], sizes = [2, 1, 64], strides = [1, 1, 1]} : vector<2x8x64xf32> to vector<2x1x64xf32>
    %48 = vector.shape_cast %47 : vector<2x1x64xf32> to vector<2x64xf32>
    %49 = vector.extract_strided_slice %48 {offsets = [0, 0], sizes = [2, 16], strides = [1, 1]} : vector<2x64xf32> to vector<2x16xf32>
    %50 = arith.negf %49 : vector<2x16xf32>
    %51 = math.exp %50 : vector<2x16xf32>
    %cst_38 = arith.constant 1.000000e+00 : f32
    %52 = vector.broadcast %cst_38 : f32 to vector<2x16xf32>
    %53 = arith.addf %52, %51 : vector<2x16xf32>
    %54 = arith.divf %52, %53 : vector<2x16xf32>
    %55 = vector.extract_strided_slice %48 {offsets = [0, 16], sizes = [2, 16], strides = [1, 1]} : vector<2x64xf32> to vector<2x16xf32>
    %56 = arith.negf %55 : vector<2x16xf32>
    %57 = math.exp %56 : vector<2x16xf32>
    %cst_39 = arith.constant 1.000000e+00 : f32
    %58 = vector.broadcast %cst_39 : f32 to vector<2x16xf32>
    %59 = arith.addf %58, %57 : vector<2x16xf32>
    %60 = arith.divf %58, %59 : vector<2x16xf32>
    %61 = vector.extract_strided_slice %48 {offsets = [0, 32], sizes = [2, 16], strides = [1, 1]} : vector<2x64xf32> to vector<2x16xf32>
    %62 = math.tanh %61 : vector<2x16xf32>
    %63 = vector.extract_strided_slice %48 {offsets = [0, 48], sizes = [2, 16], strides = [1, 1]} : vector<2x64xf32> to vector<2x16xf32>
    %64 = arith.negf %63 : vector<2x16xf32>
    %65 = math.exp %64 : vector<2x16xf32>
    %cst_40 = arith.constant 1.000000e+00 : f32
    %66 = vector.broadcast %cst_40 : f32 to vector<2x16xf32>
    %67 = arith.addf %66, %65 : vector<2x16xf32>
    %68 = arith.divf %66, %67 : vector<2x16xf32>
    %69 = vector.extract_strided_slice %21 {offsets = [0, 0, 0], sizes = [2, 1, 16], strides = [1, 1, 1]} : vector<2x8x16xf32> to vector<2x1x16xf32>
    %70 = vector.shape_cast %69 : vector<2x1x16xf32> to vector<2x16xf32>
    %71 = arith.mulf %46, %70 : vector<2x16xf32>
    %72 = arith.mulf %60, %71 : vector<2x16xf32>
    %73 = arith.mulf %54, %62 : vector<2x16xf32>
    %74 = arith.addf %72, %73 : vector<2x16xf32>
    %75 = math.tanh %74 : vector<2x16xf32>
    %76 = arith.mulf %68, %75 : vector<2x16xf32>
    %77 = vector.shape_cast %76 : vector<2x16xf32> to vector<2x1x16xf32>
    %c0_41 = arith.constant 0 : index
    %c0_42 = arith.constant 0 : index
    %c0_43 = arith.constant 0 : index
    %78 = vector.load %arg32[%c0_41, %c0_42, %c0_43] : memref<2x8x16xf32, #tpu.memory_space<vmem>>, vector<2x1x16xf32>
    tpu.vector_store %arg32[%c0_41, %c0_42, %c0_43], %77 {strides = array<i32>} : memref<2x8x16xf32, #tpu.memory_space<vmem>>, vector<2x1x16xf32>,
    %79 = vector.extract_strided_slice %30 {offsets = [0, 1, 0], sizes = [2, 1, 64], strides = [1, 1, 1]} : vector<2x8x64xf32> to vector<2x1x64xf32>
    %80 = vector.shape_cast %79 : vector<2x1x64xf32> to vector<2x64xf32>
    %cst_44 = arith.constant dense<0.000000e+00> : vector<2x64xf32>
    %81 = tpu.matmul %76, %45, %cst_44 {dimension_numbers = #tpu.dot_dimension_numbers<[1], [0], [0], [1], [0, 0, 1, 1], [], []>} : vector<2x16xf32>, vector<16x64xf32>, vector<2x64xf32> -> vector<2x64xf32>
    %82 = arith.addf %80, %81 : vector<2x64xf32>
    %83 = vector.extract_strided_slice %82 {offsets = [0, 0], sizes = [2, 16], strides = [1, 1]} : vector<2x64xf32> to vector<2x16xf32>
    %84 = arith.negf %83 : vector<2x16xf32>
    %85 = math.exp %84 : vector<2x16xf32>
    %cst_45 = arith.constant 1.000000e+00 : f32
    %86 = vector.broadcast %cst_45 : f32 to vector<2x16xf32>
    %87 = arith.addf %86, %85 : vector<2x16xf32>
    %88 = arith.divf %86, %87 : vector<2x16xf32>
    %89 = vector.extract_strided_slice %82 {offsets = [0, 16], sizes = [2, 16], strides = [1, 1]} : vector<2x64xf32> to vector<2x16xf32>
    %90 = arith.negf %89 : vector<2x16xf32>
    %91 = math.exp %90 : vector<2x16xf32>
    %cst_46 = arith.constant 1.000000e+00 : f32
    %92 = vector.broadcast %cst_46 : f32 to vector<2x16xf32>
    %93 = arith.addf %92, %91 : vector<2x16xf32>
    %94 = arith.divf %92, %93 : vector<2x16xf32>
    %95 = vector.extract_strided_slice %82 {offsets = [0, 32], sizes = [2, 16], strides = [1, 1]} : vector<2x64xf32> to vector<2x16xf32>
    %96 = math.tanh %95 : vector<2x16xf32>
    %97 = vector.extract_strided_slice %82 {offsets = [0, 48], sizes = [2, 16], strides = [1, 1]} : vector<2x64xf32> to vector<2x16xf32>
    %98 = arith.negf %97 : vector<2x16xf32>
    %99 = math.exp %98 : vector<2x16xf32>
    %cst_47 = arith.constant 1.000000e+00 : f32
    %100 = vector.broadcast %cst_47 : f32 to vector<2x16xf32>
    %101 = arith.addf %100, %99 : vector<2x16xf32>
    %102 = arith.divf %100, %101 : vector<2x16xf32>
    %103 = vector.extract_strided_slice %21 {offsets = [0, 1, 0], sizes = [2, 1, 16], strides = [1, 1, 1]} : vector<2x8x16xf32> to vector<2x1x16xf32>
    %104 = vector.shape_cast %103 : vector<2x1x16xf32> to vector<2x16xf32>
    %105 = arith.mulf %74, %104 : vector<2x16xf32>
    %106 = arith.mulf %94, %105 : vector<2x16xf32>
    %107 = arith.mulf %88, %96 : vector<2x16xf32>
    %108 = arith.addf %106, %107 : vector<2x16xf32>
    %109 = math.tanh %108 : vector<2x16xf32>
    %110 = arith.mulf %102, %109 : vector<2x16xf32>
    %111 = vector.shape_cast %110 : vector<2x16xf32> to vector<2x1x16xf32>
    %c0_48 = arith.constant 0 : index
    %c1 = arith.constant 1 : index
    %c0_49 = arith.constant 0 : index
    %112 = vector.load %arg32[%c0_48, %c1, %c0_49] : memref<2x8x16xf32, #tpu.memory_space<vmem>>, vector<2x1x16xf32>
    tpu.vector_store %arg32[%c0_48, %c1, %c0_49], %111 {strides = array<i32>} : memref<2x8x16xf32, #tpu.memory_space<vmem>>, vector<2x1x16xf32>,
    %113 = vector.extract_strided_slice %30 {offsets = [0, 2, 0], sizes = [2, 1, 64], strides = [1, 1, 1]} : vector<2x8x64xf32> to vector<2x1x64xf32>
    %114 = vector.shape_cast %113 : vector<2x1x64xf32> to vector<2x64xf32>
    %cst_50 = arith.constant dense<0.000000e+00> : vector<2x64xf32>
    %115 = tpu.matmul %110, %45, %cst_50 {dimension_numbers = #tpu.dot_dimension_numbers<[1], [0], [0], [1], [0, 0, 1, 1], [], []>} : vector<2x16xf32>, vector<16x64xf32>, vector<2x64xf32> -> vector<2x64xf32>
    %116 = arith.addf %114, %115 : vector<2x64xf32>
    %117 = vector.extract_strided_slice %116 {offsets = [0, 0], sizes = [2, 16], strides = [1, 1]} : vector<2x64xf32> to vector<2x16xf32>
    %118 = arith.negf %117 : vector<2x16xf32>
    %119 = math.exp %118 : vector<2x16xf32>
    %cst_51 = arith.constant 1.000000e+00 : f32
    %120 = vector.broadcast %cst_51 : f32 to vector<2x16xf32>
    %121 = arith.addf %120, %119 : vector<2x16xf32>
    %122 = arith.divf %120, %121 : vector<2x16xf32>
    %123 = vector.extract_strided_slice %116 {offsets = [0, 16], sizes = [2, 16], strides = [1, 1]} : vector<2x64xf32> to vector<2x16xf32>
    %124 = arith.negf %123 : vector<2x16xf32>
    %125 = math.exp %124 : vector<2x16xf32>
    %cst_52 = arith.constant 1.000000e+00 : f32
    %126 = vector.broadcast %cst_52 : f32 to vector<2x16xf32>
    %127 = arith.addf %126, %125 : vector<2x16xf32>
    %128 = arith.divf %126, %127 : vector<2x16xf32>
    %129 = vector.extract_strided_slice %116 {offsets = [0, 32], sizes = [2, 16], strides = [1, 1]} : vector<2x64xf32> to vector<2x16xf32>
    %130 = math.tanh %129 : vector<2x16xf32>
    %131 = vector.extract_strided_slice %116 {offsets = [0, 48], sizes = [2, 16], strides = [1, 1]} : vector<2x64xf32> to vector<2x16xf32>
    %132 = arith.negf %131 : vector<2x16xf32>
    %133 = math.exp %132 : vector<2x16xf32>
    %cst_53 = arith.constant 1.000000e+00 : f32
    %134 = vector.broadcast %cst_53 : f32 to vector<2x16xf32>
    %135 = arith.addf %134, %133 : vector<2x16xf32>
    %136 = arith.divf %134, %135 : vector<2x16xf32>
    %137 = vector.extract_strided_slice %21 {offsets = [0, 2, 0], sizes = [2, 1, 16], strides = [1, 1, 1]} : vector<2x8x16xf32> to vector<2x1x16xf32>
    %138 = vector.shape_cast %137 : vector<2x1x16xf32> to vector<2x16xf32>
    %139 = arith.mulf %108, %138 : vector<2x16xf32>
    %140 = arith.mulf %128, %139 : vector<2x16xf32>
    %141 = arith.mulf %122, %130 : vector<2x16xf32>
    %142 = arith.addf %140, %141 : vector<2x16xf32>
    %143 = math.tanh %142 : vector<2x16xf32>
    %144 = arith.mulf %136, %143 : vector<2x16xf32>
    %145 = vector.shape_cast %144 : vector<2x16xf32> to vector<2x1x16xf32>
    %c0_54 = arith.constant 0 : index
    %c2 = arith.constant 2 : index
    %c0_55 = arith.constant 0 : index
    %146 = vector.load %arg32[%c0_54, %c2, %c0_55] : memref<2x8x16xf32, #tpu.memory_space<vmem>>, vector<2x1x16xf32>
    tpu.vector_store %arg32[%c0_54, %c2, %c0_55], %145 {strides = array<i32>} : memref<2x8x16xf32, #tpu.memory_space<vmem>>, vector<2x1x16xf32>,
    %147 = vector.extract_strided_slice %30 {offsets = [0, 3, 0], sizes = [2, 1, 64], strides = [1, 1, 1]} : vector<2x8x64xf32> to vector<2x1x64xf32>
    %148 = vector.shape_cast %147 : vector<2x1x64xf32> to vector<2x64xf32>
    %cst_56 = arith.constant dense<0.000000e+00> : vector<2x64xf32>
    %149 = tpu.matmul %144, %45, %cst_56 {dimension_numbers = #tpu.dot_dimension_numbers<[1], [0], [0], [1], [0, 0, 1, 1], [], []>} : vector<2x16xf32>, vector<16x64xf32>, vector<2x64xf32> -> vector<2x64xf32>
    %150 = arith.addf %148, %149 : vector<2x64xf32>
    %151 = vector.extract_strided_slice %150 {offsets = [0, 0], sizes = [2, 16], strides = [1, 1]} : vector<2x64xf32> to vector<2x16xf32>
    %152 = arith.negf %151 : vector<2x16xf32>
    %153 = math.exp %152 : vector<2x16xf32>
    %cst_57 = arith.constant 1.000000e+00 : f32
    %154 = vector.broadcast %cst_57 : f32 to vector<2x16xf32>
    %155 = arith.addf %154, %153 : vector<2x16xf32>
    %156 = arith.divf %154, %155 : vector<2x16xf32>
    %157 = vector.extract_strided_slice %150 {offsets = [0, 16], sizes = [2, 16], strides = [1, 1]} : vector<2x64xf32> to vector<2x16xf32>
    %158 = arith.negf %157 : vector<2x16xf32>
    %159 = math.exp %158 : vector<2x16xf32>
    %cst_58 = arith.constant 1.000000e+00 : f32
    %160 = vector.broadcast %cst_58 : f32 to vector<2x16xf32>
    %161 = arith.addf %160, %159 : vector<2x16xf32>
    %162 = arith.divf %160, %161 : vector<2x16xf32>
    %163 = vector.extract_strided_slice %150 {offsets = [0, 32], sizes = [2, 16], strides = [1, 1]} : vector<2x64xf32> to vector<2x16xf32>
    %164 = math.tanh %163 : vector<2x16xf32>
    %165 = vector.extract_strided_slice %150 {offsets = [0, 48], sizes = [2, 16], strides = [1, 1]} : vector<2x64xf32> to vector<2x16xf32>
    %166 = arith.negf %165 : vector<2x16xf32>
    %167 = math.exp %166 : vector<2x16xf32>
    %cst_59 = arith.constant 1.000000e+00 : f32
    %168 = vector.broadcast %cst_59 : f32 to vector<2x16xf32>
    %169 = arith.addf %168, %167 : vector<2x16xf32>
    %170 = arith.divf %168, %169 : vector<2x16xf32>
    %171 = vector.extract_strided_slice %21 {offsets = [0, 3, 0], sizes = [2, 1, 16], strides = [1, 1, 1]} : vector<2x8x16xf32> to vector<2x1x16xf32>
    %172 = vector.shape_cast %171 : vector<2x1x16xf32> to vector<2x16xf32>
    %173 = arith.mulf %142, %172 : vector<2x16xf32>
    %174 = arith.mulf %162, %173 : vector<2x16xf32>
    %175 = arith.mulf %156, %164 : vector<2x16xf32>
    %176 = arith.addf %174, %175 : vector<2x16xf32>
    %177 = math.tanh %176 : vector<2x16xf32>
    %178 = arith.mulf %170, %177 : vector<2x16xf32>
    %179 = vector.shape_cast %178 : vector<2x16xf32> to vector<2x1x16xf32>
    %c0_60 = arith.constant 0 : index
    %c3 = arith.constant 3 : index
    %c0_61 = arith.constant 0 : index
    %180 = vector.load %arg32[%c0_60, %c3, %c0_61] : memref<2x8x16xf32, #tpu.memory_space<vmem>>, vector<2x1x16xf32>
    tpu.vector_store %arg32[%c0_60, %c3, %c0_61], %179 {strides = array<i32>} : memref<2x8x16xf32, #tpu.memory_space<vmem>>, vector<2x1x16xf32>,
    %181 = vector.extract_strided_slice %30 {offsets = [0, 4, 0], sizes = [2, 1, 64], strides = [1, 1, 1]} : vector<2x8x64xf32> to vector<2x1x64xf32>
    %182 = vector.shape_cast %181 : vector<2x1x64xf32> to vector<2x64xf32>
    %cst_62 = arith.constant dense<0.000000e+00> : vector<2x64xf32>
    %183 = tpu.matmul %178, %45, %cst_62 {dimension_numbers = #tpu.dot_dimension_numbers<[1], [0], [0], [1], [0, 0, 1, 1], [], []>} : vector<2x16xf32>, vector<16x64xf32>, vector<2x64xf32> -> vector<2x64xf32>
    %184 = arith.addf %182, %183 : vector<2x64xf32>
    %185 = vector.extract_strided_slice %184 {offsets = [0, 0], sizes = [2, 16], strides = [1, 1]} : vector<2x64xf32> to vector<2x16xf32>
    %186 = arith.negf %185 : vector<2x16xf32>
    %187 = math.exp %186 : vector<2x16xf32>
    %cst_63 = arith.constant 1.000000e+00 : f32
    %188 = vector.broadcast %cst_63 : f32 to vector<2x16xf32>
    %189 = arith.addf %188, %187 : vector<2x16xf32>
    %190 = arith.divf %188, %189 : vector<2x16xf32>
    %191 = vector.extract_strided_slice %184 {offsets = [0, 16], sizes = [2, 16], strides = [1, 1]} : vector<2x64xf32> to vector<2x16xf32>
    %192 = arith.negf %191 : vector<2x16xf32>
    %193 = math.exp %192 : vector<2x16xf32>
    %cst_64 = arith.constant 1.000000e+00 : f32
    %194 = vector.broadcast %cst_64 : f32 to vector<2x16xf32>
    %195 = arith.addf %194, %193 : vector<2x16xf32>
    %196 = arith.divf %194, %195 : vector<2x16xf32>
    %197 = vector.extract_strided_slice %184 {offsets = [0, 32], sizes = [2, 16], strides = [1, 1]} : vector<2x64xf32> to vector<2x16xf32>
    %198 = math.tanh %197 : vector<2x16xf32>
    %199 = vector.extract_strided_slice %184 {offsets = [0, 48], sizes = [2, 16], strides = [1, 1]} : vector<2x64xf32> to vector<2x16xf32>
    %200 = arith.negf %199 : vector<2x16xf32>
    %201 = math.exp %200 : vector<2x16xf32>
    %cst_65 = arith.constant 1.000000e+00 : f32
    %202 = vector.broadcast %cst_65 : f32 to vector<2x16xf32>
    %203 = arith.addf %202, %201 : vector<2x16xf32>
    %204 = arith.divf %202, %203 : vector<2x16xf32>
    %205 = vector.extract_strided_slice %21 {offsets = [0, 4, 0], sizes = [2, 1, 16], strides = [1, 1, 1]} : vector<2x8x16xf32> to vector<2x1x16xf32>
    %206 = vector.shape_cast %205 : vector<2x1x16xf32> to vector<2x16xf32>
    %207 = arith.mulf %176, %206 : vector<2x16xf32>
    %208 = arith.mulf %196, %207 : vector<2x16xf32>
    %209 = arith.mulf %190, %198 : vector<2x16xf32>
    %210 = arith.addf %208, %209 : vector<2x16xf32>
    %211 = math.tanh %210 : vector<2x16xf32>
    %212 = arith.mulf %204, %211 : vector<2x16xf32>
    %213 = vector.shape_cast %212 : vector<2x16xf32> to vector<2x1x16xf32>
    %c0_66 = arith.constant 0 : index
    %c4 = arith.constant 4 : index
    %c0_67 = arith.constant 0 : index
    %214 = vector.load %arg32[%c0_66, %c4, %c0_67] : memref<2x8x16xf32, #tpu.memory_space<vmem>>, vector<2x1x16xf32>
    tpu.vector_store %arg32[%c0_66, %c4, %c0_67], %213 {strides = array<i32>} : memref<2x8x16xf32, #tpu.memory_space<vmem>>, vector<2x1x16xf32>,
    %215 = vector.extract_strided_slice %30 {offsets = [0, 5, 0], sizes = [2, 1, 64], strides = [1, 1, 1]} : vector<2x8x64xf32> to vector<2x1x64xf32>
    %216 = vector.shape_cast %215 : vector<2x1x64xf32> to vector<2x64xf32>
    %cst_68 = arith.constant dense<0.000000e+00> : vector<2x64xf32>
    %217 = tpu.matmul %212, %45, %cst_68 {dimension_numbers = #tpu.dot_dimension_numbers<[1], [0], [0], [1], [0, 0, 1, 1], [], []>} : vector<2x16xf32>, vector<16x64xf32>, vector<2x64xf32> -> vector<2x64xf32>
    %218 = arith.addf %216, %217 : vector<2x64xf32>
    %219 = vector.extract_strided_slice %218 {offsets = [0, 0], sizes = [2, 16], strides = [1, 1]} : vector<2x64xf32> to vector<2x16xf32>
    %220 = arith.negf %219 : vector<2x16xf32>
    %221 = math.exp %220 : vector<2x16xf32>
    %cst_69 = arith.constant 1.000000e+00 : f32
    %222 = vector.broadcast %cst_69 : f32 to vector<2x16xf32>
    %223 = arith.addf %222, %221 : vector<2x16xf32>
    %224 = arith.divf %222, %223 : vector<2x16xf32>
    %225 = vector.extract_strided_slice %218 {offsets = [0, 16], sizes = [2, 16], strides = [1, 1]} : vector<2x64xf32> to vector<2x16xf32>
    %226 = arith.negf %225 : vector<2x16xf32>
    %227 = math.exp %226 : vector<2x16xf32>
    %cst_70 = arith.constant 1.000000e+00 : f32
    %228 = vector.broadcast %cst_70 : f32 to vector<2x16xf32>
    %229 = arith.addf %228, %227 : vector<2x16xf32>
    %230 = arith.divf %228, %229 : vector<2x16xf32>
    %231 = vector.extract_strided_slice %218 {offsets = [0, 32], sizes = [2, 16], strides = [1, 1]} : vector<2x64xf32> to vector<2x16xf32>
    %232 = math.tanh %231 : vector<2x16xf32>
    %233 = vector.extract_strided_slice %218 {offsets = [0, 48], sizes = [2, 16], strides = [1, 1]} : vector<2x64xf32> to vector<2x16xf32>
    %234 = arith.negf %233 : vector<2x16xf32>
    %235 = math.exp %234 : vector<2x16xf32>
    %cst_71 = arith.constant 1.000000e+00 : f32
    %236 = vector.broadcast %cst_71 : f32 to vector<2x16xf32>
    %237 = arith.addf %236, %235 : vector<2x16xf32>
    %238 = arith.divf %236, %237 : vector<2x16xf32>
    %239 = vector.extract_strided_slice %21 {offsets = [0, 5, 0], sizes = [2, 1, 16], strides = [1, 1, 1]} : vector<2x8x16xf32> to vector<2x1x16xf32>
    %240 = vector.shape_cast %239 : vector<2x1x16xf32> to vector<2x16xf32>
    %241 = arith.mulf %210, %240 : vector<2x16xf32>
    %242 = arith.mulf %230, %241 : vector<2x16xf32>
    %243 = arith.mulf %224, %232 : vector<2x16xf32>
    %244 = arith.addf %242, %243 : vector<2x16xf32>
    %245 = math.tanh %244 : vector<2x16xf32>
    %246 = arith.mulf %238, %245 : vector<2x16xf32>
    %247 = vector.shape_cast %246 : vector<2x16xf32> to vector<2x1x16xf32>
    %c0_72 = arith.constant 0 : index
    %c5 = arith.constant 5 : index
    %c0_73 = arith.constant 0 : index
    %248 = vector.load %arg32[%c0_72, %c5, %c0_73] : memref<2x8x16xf32, #tpu.memory_space<vmem>>, vector<2x1x16xf32>
    tpu.vector_store %arg32[%c0_72, %c5, %c0_73], %247 {strides = array<i32>} : memref<2x8x16xf32, #tpu.memory_space<vmem>>, vector<2x1x16xf32>,
    %249 = vector.extract_strided_slice %30 {offsets = [0, 6, 0], sizes = [2, 1, 64], strides = [1, 1, 1]} : vector<2x8x64xf32> to vector<2x1x64xf32>
    %250 = vector.shape_cast %249 : vector<2x1x64xf32> to vector<2x64xf32>
    %cst_74 = arith.constant dense<0.000000e+00> : vector<2x64xf32>
    %251 = tpu.matmul %246, %45, %cst_74 {dimension_numbers = #tpu.dot_dimension_numbers<[1], [0], [0], [1], [0, 0, 1, 1], [], []>} : vector<2x16xf32>, vector<16x64xf32>, vector<2x64xf32> -> vector<2x64xf32>
    %252 = arith.addf %250, %251 : vector<2x64xf32>
    %253 = vector.extract_strided_slice %252 {offsets = [0, 0], sizes = [2, 16], strides = [1, 1]} : vector<2x64xf32> to vector<2x16xf32>
    %254 = arith.negf %253 : vector<2x16xf32>
    %255 = math.exp %254 : vector<2x16xf32>
    %cst_75 = arith.constant 1.000000e+00 : f32
    %256 = vector.broadcast %cst_75 : f32 to vector<2x16xf32>
    %257 = arith.addf %256, %255 : vector<2x16xf32>
    %258 = arith.divf %256, %257 : vector<2x16xf32>
    %259 = vector.extract_strided_slice %252 {offsets = [0, 16], sizes = [2, 16], strides = [1, 1]} : vector<2x64xf32> to vector<2x16xf32>
    %260 = arith.negf %259 : vector<2x16xf32>
    %261 = math.exp %260 : vector<2x16xf32>
    %cst_76 = arith.constant 1.000000e+00 : f32
    %262 = vector.broadcast %cst_76 : f32 to vector<2x16xf32>
    %263 = arith.addf %262, %261 : vector<2x16xf32>
    %264 = arith.divf %262, %263 : vector<2x16xf32>
    %265 = vector.extract_strided_slice %252 {offsets = [0, 32], sizes = [2, 16], strides = [1, 1]} : vector<2x64xf32> to vector<2x16xf32>
    %266 = math.tanh %265 : vector<2x16xf32>
    %267 = vector.extract_strided_slice %252 {offsets = [0, 48], sizes = [2, 16], strides = [1, 1]} : vector<2x64xf32> to vector<2x16xf32>
    %268 = arith.negf %267 : vector<2x16xf32>
    %269 = math.exp %268 : vector<2x16xf32>
    %cst_77 = arith.constant 1.000000e+00 : f32
    %270 = vector.broadcast %cst_77 : f32 to vector<2x16xf32>
    %271 = arith.addf %270, %269 : vector<2x16xf32>
    %272 = arith.divf %270, %271 : vector<2x16xf32>
    %273 = vector.extract_strided_slice %21 {offsets = [0, 6, 0], sizes = [2, 1, 16], strides = [1, 1, 1]} : vector<2x8x16xf32> to vector<2x1x16xf32>
    %274 = vector.shape_cast %273 : vector<2x1x16xf32> to vector<2x16xf32>
    %275 = arith.mulf %244, %274 : vector<2x16xf32>
    %276 = arith.mulf %264, %275 : vector<2x16xf32>
    %277 = arith.mulf %258, %266 : vector<2x16xf32>
    %278 = arith.addf %276, %277 : vector<2x16xf32>
    %279 = math.tanh %278 : vector<2x16xf32>
    %280 = arith.mulf %272, %279 : vector<2x16xf32>
    %281 = vector.shape_cast %280 : vector<2x16xf32> to vector<2x1x16xf32>
    %c0_78 = arith.constant 0 : index
    %c6 = arith.constant 6 : index
    %c0_79 = arith.constant 0 : index
    %282 = vector.load %arg32[%c0_78, %c6, %c0_79] : memref<2x8x16xf32, #tpu.memory_space<vmem>>, vector<2x1x16xf32>
    tpu.vector_store %arg32[%c0_78, %c6, %c0_79], %281 {strides = array<i32>} : memref<2x8x16xf32, #tpu.memory_space<vmem>>, vector<2x1x16xf32>,
    %283 = vector.extract_strided_slice %30 {offsets = [0, 7, 0], sizes = [2, 1, 64], strides = [1, 1, 1]} : vector<2x8x64xf32> to vector<2x1x64xf32>
    %284 = vector.shape_cast %283 : vector<2x1x64xf32> to vector<2x64xf32>
    %cst_80 = arith.constant dense<0.000000e+00> : vector<2x64xf32>
    %285 = tpu.matmul %280, %45, %cst_80 {dimension_numbers = #tpu.dot_dimension_numbers<[1], [0], [0], [1], [0, 0, 1, 1], [], []>} : vector<2x16xf32>, vector<16x64xf32>, vector<2x64xf32> -> vector<2x64xf32>
    %286 = arith.addf %284, %285 : vector<2x64xf32>
    %287 = vector.extract_strided_slice %286 {offsets = [0, 0], sizes = [2, 16], strides = [1, 1]} : vector<2x64xf32> to vector<2x16xf32>
    %288 = arith.negf %287 : vector<2x16xf32>
    %289 = math.exp %288 : vector<2x16xf32>
    %cst_81 = arith.constant 1.000000e+00 : f32
    %290 = vector.broadcast %cst_81 : f32 to vector<2x16xf32>
    %291 = arith.addf %290, %289 : vector<2x16xf32>
    %292 = arith.divf %290, %291 : vector<2x16xf32>
    %293 = vector.extract_strided_slice %286 {offsets = [0, 16], sizes = [2, 16], strides = [1, 1]} : vector<2x64xf32> to vector<2x16xf32>
    %294 = arith.negf %293 : vector<2x16xf32>
    %295 = math.exp %294 : vector<2x16xf32>
    %cst_82 = arith.constant 1.000000e+00 : f32
    %296 = vector.broadcast %cst_82 : f32 to vector<2x16xf32>
    %297 = arith.addf %296, %295 : vector<2x16xf32>
    %298 = arith.divf %296, %297 : vector<2x16xf32>
    %299 = vector.extract_strided_slice %286 {offsets = [0, 32], sizes = [2, 16], strides = [1, 1]} : vector<2x64xf32> to vector<2x16xf32>
    %300 = math.tanh %299 : vector<2x16xf32>
    %301 = vector.extract_strided_slice %286 {offsets = [0, 48], sizes = [2, 16], strides = [1, 1]} : vector<2x64xf32> to vector<2x16xf32>
    %302 = arith.negf %301 : vector<2x16xf32>
    %303 = math.exp %302 : vector<2x16xf32>
    %cst_83 = arith.constant 1.000000e+00 : f32
    %304 = vector.broadcast %cst_83 : f32 to vector<2x16xf32>
    %305 = arith.addf %304, %303 : vector<2x16xf32>
    %306 = arith.divf %304, %305 : vector<2x16xf32>
    %307 = vector.extract_strided_slice %21 {offsets = [0, 7, 0], sizes = [2, 1, 16], strides = [1, 1, 1]} : vector<2x8x16xf32> to vector<2x1x16xf32>
    %308 = vector.shape_cast %307 : vector<2x1x16xf32> to vector<2x16xf32>
    %309 = arith.mulf %278, %308 : vector<2x16xf32>
    %310 = arith.mulf %298, %309 : vector<2x16xf32>
    %311 = arith.mulf %292, %300 : vector<2x16xf32>
    %312 = arith.addf %310, %311 : vector<2x16xf32>
    %313 = math.tanh %312 : vector<2x16xf32>
    %314 = arith.mulf %306, %313 : vector<2x16xf32>
    %315 = vector.shape_cast %314 : vector<2x16xf32> to vector<2x1x16xf32>
    %c0_84 = arith.constant 0 : index
    %c7 = arith.constant 7 : index
    %c0_85 = arith.constant 0 : index
    %316 = vector.load %arg32[%c0_84, %c7, %c0_85] : memref<2x8x16xf32, #tpu.memory_space<vmem>>, vector<2x1x16xf32>
    tpu.vector_store %arg32[%c0_84, %c7, %c0_85], %315 {strides = array<i32>} : memref<2x8x16xf32, #tpu.memory_space<vmem>>, vector<2x1x16xf32>,
    %c0_86 = arith.constant 0 : index
    %c0_87 = arith.constant 0 : index
    %317 = vector.load %arg16[%c0_86, %c0_87] : memref<16x32xf32, #tpu.memory_space<vmem>>, vector<16x32xf32>
    %cst_88 = arith.constant dense<0.000000e+00> : vector<2x32xf32>
    %318 = tpu.matmul %314, %317, %cst_88 {dimension_numbers = #tpu.dot_dimension_numbers<[1], [0], [0], [1], [0, 0, 1, 1], [], []>} : vector<2x16xf32>, vector<16x32xf32>, vector<2x32xf32> -> vector<2x32xf32>
    %c0_89 = arith.constant 0 : index
    %c0_90 = arith.constant 0 : index
    %319 = vector.load %arg17[%c0_89, %c0_90] : memref<1x32xf32, #tpu.memory_space<vmem>>, vector<1x32xf32>
    %320 = vector.broadcast %319 : vector<1x32xf32> to vector<2x32xf32>
    %321 = arith.addf %318, %320 : vector<2x32xf32>
    %322 = math.tanh %321 : vector<2x32xf32>
    %c0_91 = arith.constant 0 : index
    %c0_92 = arith.constant 0 : index
    %323 = vector.load %arg18[%c0_91, %c0_92] : memref<16x32xf32, #tpu.memory_space<vmem>>, vector<16x32xf32>
    %cst_93 = arith.constant dense<0.000000e+00> : vector<2x32xf32>
    %324 = tpu.matmul %312, %323, %cst_93 {dimension_numbers = #tpu.dot_dimension_numbers<[1], [0], [0], [1], [0, 0, 1, 1], [], []>} : vector<2x16xf32>, vector<16x32xf32>, vector<2x32xf32> -> vector<2x32xf32>
    %c0_94 = arith.constant 0 : index
    %c0_95 = arith.constant 0 : index
    %325 = vector.load %arg19[%c0_94, %c0_95] : memref<1x32xf32, #tpu.memory_space<vmem>>, vector<1x32xf32>
    %326 = vector.broadcast %325 : vector<1x32xf32> to vector<2x32xf32>
    %327 = arith.addf %324, %326 : vector<2x32xf32>
    %328 = math.tanh %327 : vector<2x32xf32>
    %c0_96 = arith.constant 0 : index
    %c0_97 = arith.constant 0 : index
    %c0_98 = arith.constant 0 : index
    %329 = vector.load %arg32[%c0_96, %c0_97, %c0_98] : memref<2x8x16xf32, #tpu.memory_space<vmem>>, vector<2x8x16xf32>
    %330 = vector.shape_cast %329 : vector<2x8x16xf32> to vector<16x16xf32>
    %c0_99 = arith.constant 0 : index
    %c0_100 = arith.constant 0 : index
    %331 = vector.load %arg20[%c0_99, %c0_100] : memref<16x256xf32, #tpu.memory_space<vmem>>, vector<16x256xf32>
    %cst_101 = arith.constant dense<0.000000e+00> : vector<16x256xf32>
    %332 = tpu.matmul %330, %331, %cst_101 {dimension_numbers = #tpu.dot_dimension_numbers<[1], [0], [0], [1], [0, 0, 1, 1], [], []>} : vector<16x16xf32>, vector<16x256xf32>, vector<16x256xf32> -> vector<16x256xf32>
    %c0_102 = arith.constant 0 : index
    %c0_103 = arith.constant 0 : index
    %333 = vector.load %arg21[%c0_102, %c0_103] : memref<1x256xf32, #tpu.memory_space<vmem>>, vector<1x256xf32>
    %334 = vector.broadcast %333 : vector<1x256xf32> to vector<16x256xf32>
    %335 = arith.addf %332, %334 : vector<16x256xf32>
    %336 = vector.shape_cast %335 : vector<16x256xf32> to vector<2x8x256xf32>
    %337 = vector.extract_strided_slice %336 {offsets = [0, 6, 0], sizes = [2, 2, 256], strides = [1, 1, 1]} : vector<2x8x256xf32> to vector<2x2x256xf32>
    %c0_104 = arith.constant 0 : index
    %c0_105 = arith.constant 0 : index
    %c0_106 = arith.constant 0 : index
    %338 = vector.load %arg31[%c0_104, %c0_105, %c0_106] : memref<2x2x256xf32, #tpu.memory_space<vmem>>, vector<2x2x256xf32>
    tpu.vector_store %arg31[%c0_104, %c0_105, %c0_106], %337 {strides = array<i32>} : memref<2x2x256xf32, #tpu.memory_space<vmem>>, vector<2x2x256xf32>,
    %c0_107 = arith.constant 0 : index
    %c0_108 = arith.constant 0 : index
    %339 = vector.load %arg23[%c0_107, %c0_108] : memref<1x32xf32, #tpu.memory_space<vmem>>, vector<1x32xf32>
    %340 = vector.extract_strided_slice %336 {offsets = [0, 0, 0], sizes = [2, 1, 256], strides = [1, 1, 1]} : vector<2x8x256xf32> to vector<2x1x256xf32>
    %341 = vector.shape_cast %340 : vector<2x1x256xf32> to vector<2x256xf32>
    %c0_109 = arith.constant 0 : index
    %c0_110 = arith.constant 0 : index
    %c0_111 = arith.constant 0 : index
    %342 = vector.load %arg22[%c0_109, %c0_110, %c0_111] : memref<6x256x32xf32, #tpu.memory_space<vmem>>, vector<1x256x32xf32>
    %343 = vector.shape_cast %342 : vector<1x256x32xf32> to vector<256x32xf32>
    %cst_112 = arith.constant dense<0.000000e+00> : vector<2x32xf32>
    %344 = tpu.matmul %341, %343, %cst_112 {dimension_numbers = #tpu.dot_dimension_numbers<[1], [0], [0], [1], [0, 0, 1, 1], [], []>} : vector<2x256xf32>, vector<256x32xf32>, vector<2x32xf32> -> vector<2x32xf32>
    %345 = vector.broadcast %339 : vector<1x32xf32> to vector<2x32xf32>
    %346 = arith.addf %345, %344 : vector<2x32xf32>
    %347 = vector.extract_strided_slice %336 {offsets = [0, 1, 0], sizes = [2, 1, 256], strides = [1, 1, 1]} : vector<2x8x256xf32> to vector<2x1x256xf32>
    %348 = vector.shape_cast %347 : vector<2x1x256xf32> to vector<2x256xf32>
    %c1_113 = arith.constant 1 : index
    %c0_114 = arith.constant 0 : index
    %c0_115 = arith.constant 0 : index
    %349 = vector.load %arg22[%c1_113, %c0_114, %c0_115] : memref<6x256x32xf32, #tpu.memory_space<vmem>>, vector<1x256x32xf32>
    %350 = vector.shape_cast %349 : vector<1x256x32xf32> to vector<256x32xf32>
    %cst_116 = arith.constant dense<0.000000e+00> : vector<2x32xf32>
    %351 = tpu.matmul %348, %350, %cst_116 {dimension_numbers = #tpu.dot_dimension_numbers<[1], [0], [0], [1], [0, 0, 1, 1], [], []>} : vector<2x256xf32>, vector<256x32xf32>, vector<2x32xf32> -> vector<2x32xf32>
    %352 = arith.addf %346, %351 : vector<2x32xf32>
    %353 = vector.extract_strided_slice %336 {offsets = [0, 2, 0], sizes = [2, 1, 256], strides = [1, 1, 1]} : vector<2x8x256xf32> to vector<2x1x256xf32>
    %354 = vector.shape_cast %353 : vector<2x1x256xf32> to vector<2x256xf32>
    %c2_117 = arith.constant 2 : index
    %c0_118 = arith.constant 0 : index
    %c0_119 = arith.constant 0 : index
    %355 = vector.load %arg22[%c2_117, %c0_118, %c0_119] : memref<6x256x32xf32, #tpu.memory_space<vmem>>, vector<1x256x32xf32>
    %356 = vector.shape_cast %355 : vector<1x256x32xf32> to vector<256x32xf32>
    %cst_120 = arith.constant dense<0.000000e+00> : vector<2x32xf32>
    %357 = tpu.matmul %354, %356, %cst_120 {dimension_numbers = #tpu.dot_dimension_numbers<[1], [0], [0], [1], [0, 0, 1, 1], [], []>} : vector<2x256xf32>, vector<256x32xf32>, vector<2x32xf32> -> vector<2x32xf32>
    %358 = arith.addf %352, %357 : vector<2x32xf32>
    %359 = vector.extract_strided_slice %336 {offsets = [0, 3, 0], sizes = [2, 1, 256], strides = [1, 1, 1]} : vector<2x8x256xf32> to vector<2x1x256xf32>
    %360 = vector.shape_cast %359 : vector<2x1x256xf32> to vector<2x256xf32>
    %c3_121 = arith.constant 3 : index
    %c0_122 = arith.constant 0 : index
    %c0_123 = arith.constant 0 : index
    %361 = vector.load %arg22[%c3_121, %c0_122, %c0_123] : memref<6x256x32xf32, #tpu.memory_space<vmem>>, vector<1x256x32xf32>
    %362 = vector.shape_cast %361 : vector<1x256x32xf32> to vector<256x32xf32>
    %cst_124 = arith.constant dense<0.000000e+00> : vector<2x32xf32>
    %363 = tpu.matmul %360, %362, %cst_124 {dimension_numbers = #tpu.dot_dimension_numbers<[1], [0], [0], [1], [0, 0, 1, 1], [], []>} : vector<2x256xf32>, vector<256x32xf32>, vector<2x32xf32> -> vector<2x32xf32>
    %364 = arith.addf %358, %363 : vector<2x32xf32>
    %365 = vector.extract_strided_slice %336 {offsets = [0, 4, 0], sizes = [2, 1, 256], strides = [1, 1, 1]} : vector<2x8x256xf32> to vector<2x1x256xf32>
    %366 = vector.shape_cast %365 : vector<2x1x256xf32> to vector<2x256xf32>
    %c4_125 = arith.constant 4 : index
    %c0_126 = arith.constant 0 : index
    %c0_127 = arith.constant 0 : index
    %367 = vector.load %arg22[%c4_125, %c0_126, %c0_127] : memref<6x256x32xf32, #tpu.memory_space<vmem>>, vector<1x256x32xf32>
    %368 = vector.shape_cast %367 : vector<1x256x32xf32> to vector<256x32xf32>
    %cst_128 = arith.constant dense<0.000000e+00> : vector<2x32xf32>
    %369 = tpu.matmul %366, %368, %cst_128 {dimension_numbers = #tpu.dot_dimension_numbers<[1], [0], [0], [1], [0, 0, 1, 1], [], []>} : vector<2x256xf32>, vector<256x32xf32>, vector<2x32xf32> -> vector<2x32xf32>
    %370 = arith.addf %364, %369 : vector<2x32xf32>
    %371 = vector.extract_strided_slice %336 {offsets = [0, 5, 0], sizes = [2, 1, 256], strides = [1, 1, 1]} : vector<2x8x256xf32> to vector<2x1x256xf32>
    %372 = vector.shape_cast %371 : vector<2x1x256xf32> to vector<2x256xf32>
    %c5_129 = arith.constant 5 : index
    %c0_130 = arith.constant 0 : index
    %c0_131 = arith.constant 0 : index
    %373 = vector.load %arg22[%c5_129, %c0_130, %c0_131] : memref<6x256x32xf32, #tpu.memory_space<vmem>>, vector<1x256x32xf32>
    %374 = vector.shape_cast %373 : vector<1x256x32xf32> to vector<256x32xf32>
    %cst_132 = arith.constant dense<0.000000e+00> : vector<2x32xf32>
    %375 = tpu.matmul %372, %374, %cst_132 {dimension_numbers = #tpu.dot_dimension_numbers<[1], [0], [0], [1], [0, 0, 1, 1], [], []>} : vector<2x256xf32>, vector<256x32xf32>, vector<2x32xf32> -> vector<2x32xf32>
    %376 = arith.addf %370, %375 : vector<2x32xf32>
    %c0_133 = arith.constant 0 : index
    %c0_134 = arith.constant 0 : index
    %377 = vector.load %arg28[%c0_133, %c0_134] : memref<2x32xf32, #tpu.memory_space<vmem>>, vector<2x32xf32>
    tpu.vector_store %arg28[%c0_133, %c0_134], %376 {strides = array<i32>} : memref<2x32xf32, #tpu.memory_space<vmem>>, vector<2x32xf32>,
    %c0_135 = arith.constant 0 : index
    %c0_136 = arith.constant 0 : index
    %c0_137 = arith.constant 0 : index
    %378 = vector.load %arg24[%c0_135, %c0_136, %c0_137] : memref<2x32x256xf32, #tpu.memory_space<vmem>>, vector<1x32x256xf32>
    %379 = vector.shape_cast %378 : vector<1x32x256xf32> to vector<32x256xf32>
    %cst_138 = arith.constant dense<0.000000e+00> : vector<2x256xf32>
    %380 = tpu.matmul %376, %379, %cst_138 {dimension_numbers = #tpu.dot_dimension_numbers<[1], [0], [0], [1], [0, 0, 1, 1], [], []>} : vector<2x32xf32>, vector<32x256xf32>, vector<2x256xf32> -> vector<2x256xf32>
    %c0_139 = arith.constant 0 : index
    %c0_140 = arith.constant 0 : index
    %c0_141 = arith.constant 0 : index
    %381 = vector.load %arg25[%c0_139, %c0_140, %c0_141] : memref<2x1x256xf32, #tpu.memory_space<vmem>>, vector<1x1x256xf32>
    %382 = vector.shape_cast %381 : vector<1x1x256xf32> to vector<1x256xf32>
    %383 = vector.broadcast %382 : vector<1x256xf32> to vector<2x256xf32>
    %384 = arith.addf %380, %383 : vector<2x256xf32>
    %385 = vector.shape_cast %384 : vector<2x256xf32> to vector<2x1x256xf32>
    %c0_142 = arith.constant 0 : index
    %c0_143 = arith.constant 0 : index
    %c0_144 = arith.constant 0 : index
    %386 = vector.load %arg30[%c0_142, %c0_143, %c0_144] : memref<2x2x256xf32, #tpu.memory_space<vmem>>, vector<2x1x256xf32>
    tpu.vector_store %arg30[%c0_142, %c0_143, %c0_144], %385 {strides = array<i32>} : memref<2x2x256xf32, #tpu.memory_space<vmem>>, vector<2x1x256xf32>,
    %c1_145 = arith.constant 1 : index
    %c0_146 = arith.constant 0 : index
    %c0_147 = arith.constant 0 : index
    %387 = vector.load %arg24[%c1_145, %c0_146, %c0_147] : memref<2x32x256xf32, #tpu.memory_space<vmem>>, vector<1x32x256xf32>
    %388 = vector.shape_cast %387 : vector<1x32x256xf32> to vector<32x256xf32>
    %cst_148 = arith.constant dense<0.000000e+00> : vector<2x256xf32>
    %389 = tpu.matmul %376, %388, %cst_148 {dimension_numbers = #tpu.dot_dimension_numbers<[1], [0], [0], [1], [0, 0, 1, 1], [], []>} : vector<2x32xf32>, vector<32x256xf32>, vector<2x256xf32> -> vector<2x256xf32>
    %c1_149 = arith.constant 1 : index
    %c0_150 = arith.constant 0 : index
    %c0_151 = arith.constant 0 : index
    %390 = vector.load %arg25[%c1_149, %c0_150, %c0_151] : memref<2x1x256xf32, #tpu.memory_space<vmem>>, vector<1x1x256xf32>
    %391 = vector.shape_cast %390 : vector<1x1x256xf32> to vector<1x256xf32>
    %392 = vector.broadcast %391 : vector<1x256xf32> to vector<2x256xf32>
    %393 = arith.addf %389, %392 : vector<2x256xf32>
    %394 = vector.shape_cast %393 : vector<2x256xf32> to vector<2x1x256xf32>
    %c0_152 = arith.constant 0 : index
    %c1_153 = arith.constant 1 : index
    %c0_154 = arith.constant 0 : index
    %395 = vector.load %arg30[%c0_152, %c1_153, %c0_154] : memref<2x2x256xf32, #tpu.memory_space<vmem>>, vector<2x1x256xf32>
    tpu.vector_store %arg30[%c0_152, %c1_153, %c0_154], %394 {strides = array<i32>} : memref<2x2x256xf32, #tpu.memory_space<vmem>>, vector<2x1x256xf32>,
    %c0_155 = arith.constant 0 : index
    %c0_156 = arith.constant 0 : index
    %396 = vector.load %arg14[%c0_155, %c0_156] : memref<32x128xf32, #tpu.memory_space<vmem>>, vector<32x128xf32>
    %c0_157 = arith.constant 0 : index
    %c0_158 = arith.constant 0 : index
    %397 = vector.load %arg15[%c0_157, %c0_158] : memref<1x128xf32, #tpu.memory_space<vmem>>, vector<1x128xf32>
    %cst_159 = arith.constant dense<0.000000e+00> : vector<2x128xf32>
    %398 = tpu.matmul %322, %396, %cst_159 {dimension_numbers = #tpu.dot_dimension_numbers<[1], [0], [0], [1], [0, 0, 1, 1], [], []>} : vector<2x32xf32>, vector<32x128xf32>, vector<2x128xf32> -> vector<2x128xf32>
    %399 = vector.broadcast %397 : vector<1x128xf32> to vector<2x128xf32>
    %400 = arith.addf %398, %399 : vector<2x128xf32>
    %401 = vector.extract_strided_slice %400 {offsets = [0, 0], sizes = [2, 32], strides = [1, 1]} : vector<2x128xf32> to vector<2x32xf32>
    %402 = arith.negf %401 : vector<2x32xf32>
    %403 = math.exp %402 : vector<2x32xf32>
    %cst_160 = arith.constant 1.000000e+00 : f32
    %404 = vector.broadcast %cst_160 : f32 to vector<2x32xf32>
    %405 = arith.addf %404, %403 : vector<2x32xf32>
    %406 = arith.divf %404, %405 : vector<2x32xf32>
    %407 = vector.extract_strided_slice %400 {offsets = [0, 32], sizes = [2, 32], strides = [1, 1]} : vector<2x128xf32> to vector<2x32xf32>
    %408 = arith.negf %407 : vector<2x32xf32>
    %409 = math.exp %408 : vector<2x32xf32>
    %cst_161 = arith.constant 1.000000e+00 : f32
    %410 = vector.broadcast %cst_161 : f32 to vector<2x32xf32>
    %411 = arith.addf %410, %409 : vector<2x32xf32>
    %412 = arith.divf %410, %411 : vector<2x32xf32>
    %413 = vector.extract_strided_slice %400 {offsets = [0, 64], sizes = [2, 32], strides = [1, 1]} : vector<2x128xf32> to vector<2x32xf32>
    %414 = math.tanh %413 : vector<2x32xf32>
    %415 = vector.extract_strided_slice %400 {offsets = [0, 96], sizes = [2, 32], strides = [1, 1]} : vector<2x128xf32> to vector<2x32xf32>
    %416 = arith.negf %415 : vector<2x32xf32>
    %417 = math.exp %416 : vector<2x32xf32>
    %cst_162 = arith.constant 1.000000e+00 : f32
    %418 = vector.broadcast %cst_162 : f32 to vector<2x32xf32>
    %419 = arith.addf %418, %417 : vector<2x32xf32>
    %420 = arith.divf %418, %419 : vector<2x32xf32>
    %421 = vector.extract_strided_slice %41 {offsets = [0, 0, 0], sizes = [2, 1, 32], strides = [1, 1, 1]} : vector<2x8x32xf32> to vector<2x1x32xf32>
    %422 = vector.shape_cast %421 : vector<2x1x32xf32> to vector<2x32xf32>
    %423 = arith.mulf %328, %422 : vector<2x32xf32>
    %424 = arith.mulf %412, %423 : vector<2x32xf32>
    %425 = arith.mulf %406, %414 : vector<2x32xf32>
    %426 = arith.addf %424, %425 : vector<2x32xf32>
    %427 = math.tanh %426 : vector<2x32xf32>
    %428 = arith.mulf %420, %427 : vector<2x32xf32>
    %429 = vector.shape_cast %428 : vector<2x32xf32> to vector<2x1x32xf32>
    %c0_163 = arith.constant 0 : index
    %c7_164 = arith.constant 7 : index
    %c0_165 = arith.constant 0 : index
    %430 = vector.load %arg33[%c0_163, %c7_164, %c0_165] : memref<2x8x32xf32, #tpu.memory_space<vmem>>, vector<2x1x32xf32>
    tpu.vector_store %arg33[%c0_163, %c7_164, %c0_165], %429 {strides = array<i32>} : memref<2x8x32xf32, #tpu.memory_space<vmem>>, vector<2x1x32xf32>,
    %cst_166 = arith.constant dense<0.000000e+00> : vector<2x128xf32>
    %431 = tpu.matmul %428, %396, %cst_166 {dimension_numbers = #tpu.dot_dimension_numbers<[1], [0], [0], [1], [0, 0, 1, 1], [], []>} : vector<2x32xf32>, vector<32x128xf32>, vector<2x128xf32> -> vector<2x128xf32>
    %432 = vector.broadcast %397 : vector<1x128xf32> to vector<2x128xf32>
    %433 = arith.addf %431, %432 : vector<2x128xf32>
    %434 = vector.extract_strided_slice %44 {offsets = [0, 7, 0], sizes = [2, 1, 128], strides = [1, 1, 1]} : vector<2x8x128xf32> to vector<2x1x128xf32>
    %435 = vector.shape_cast %434 : vector<2x1x128xf32> to vector<2x128xf32>
    %436 = arith.addf %433, %435 : vector<2x128xf32>
    %437 = vector.extract_strided_slice %436 {offsets = [0, 0], sizes = [2, 32], strides = [1, 1]} : vector<2x128xf32> to vector<2x32xf32>
    %438 = arith.negf %437 : vector<2x32xf32>
    %439 = math.exp %438 : vector<2x32xf32>
    %cst_167 = arith.constant 1.000000e+00 : f32
    %440 = vector.broadcast %cst_167 : f32 to vector<2x32xf32>
    %441 = arith.addf %440, %439 : vector<2x32xf32>
    %442 = arith.divf %440, %441 : vector<2x32xf32>
    %443 = vector.extract_strided_slice %436 {offsets = [0, 32], sizes = [2, 32], strides = [1, 1]} : vector<2x128xf32> to vector<2x32xf32>
    %444 = arith.negf %443 : vector<2x32xf32>
    %445 = math.exp %444 : vector<2x32xf32>
    %cst_168 = arith.constant 1.000000e+00 : f32
    %446 = vector.broadcast %cst_168 : f32 to vector<2x32xf32>
    %447 = arith.addf %446, %445 : vector<2x32xf32>
    %448 = arith.divf %446, %447 : vector<2x32xf32>
    %449 = vector.extract_strided_slice %436 {offsets = [0, 64], sizes = [2, 32], strides = [1, 1]} : vector<2x128xf32> to vector<2x32xf32>
    %450 = math.tanh %449 : vector<2x32xf32>
    %451 = vector.extract_strided_slice %436 {offsets = [0, 96], sizes = [2, 32], strides = [1, 1]} : vector<2x128xf32> to vector<2x32xf32>
    %452 = arith.negf %451 : vector<2x32xf32>
    %453 = math.exp %452 : vector<2x32xf32>
    %cst_169 = arith.constant 1.000000e+00 : f32
    %454 = vector.broadcast %cst_169 : f32 to vector<2x32xf32>
    %455 = arith.addf %454, %453 : vector<2x32xf32>
    %456 = arith.divf %454, %455 : vector<2x32xf32>
    %457 = vector.extract_strided_slice %41 {offsets = [0, 1, 0], sizes = [2, 1, 32], strides = [1, 1, 1]} : vector<2x8x32xf32> to vector<2x1x32xf32>
    %458 = vector.shape_cast %457 : vector<2x1x32xf32> to vector<2x32xf32>
    %459 = arith.mulf %426, %458 : vector<2x32xf32>
    %460 = arith.mulf %448, %459 : vector<2x32xf32>
    %461 = arith.mulf %442, %450 : vector<2x32xf32>
    %462 = arith.addf %460, %461 : vector<2x32xf32>
    %463 = math.tanh %462 : vector<2x32xf32>
    %464 = arith.mulf %456, %463 : vector<2x32xf32>
    %465 = vector.shape_cast %464 : vector<2x32xf32> to vector<2x1x32xf32>
    %c0_170 = arith.constant 0 : index
    %c6_171 = arith.constant 6 : index
    %c0_172 = arith.constant 0 : index
    %466 = vector.load %arg33[%c0_170, %c6_171, %c0_172] : memref<2x8x32xf32, #tpu.memory_space<vmem>>, vector<2x1x32xf32>
    tpu.vector_store %arg33[%c0_170, %c6_171, %c0_172], %465 {strides = array<i32>} : memref<2x8x32xf32, #tpu.memory_space<vmem>>, vector<2x1x32xf32>,
    %cst_173 = arith.constant dense<0.000000e+00> : vector<2x128xf32>
    %467 = tpu.matmul %464, %396, %cst_173 {dimension_numbers = #tpu.dot_dimension_numbers<[1], [0], [0], [1], [0, 0, 1, 1], [], []>} : vector<2x32xf32>, vector<32x128xf32>, vector<2x128xf32> -> vector<2x128xf32>
    %468 = vector.broadcast %397 : vector<1x128xf32> to vector<2x128xf32>
    %469 = arith.addf %467, %468 : vector<2x128xf32>
    %470 = vector.extract_strided_slice %44 {offsets = [0, 6, 0], sizes = [2, 1, 128], strides = [1, 1, 1]} : vector<2x8x128xf32> to vector<2x1x128xf32>
    %471 = vector.shape_cast %470 : vector<2x1x128xf32> to vector<2x128xf32>
    %472 = arith.addf %469, %471 : vector<2x128xf32>
    %473 = vector.extract_strided_slice %472 {offsets = [0, 0], sizes = [2, 32], strides = [1, 1]} : vector<2x128xf32> to vector<2x32xf32>
    %474 = arith.negf %473 : vector<2x32xf32>
    %475 = math.exp %474 : vector<2x32xf32>
    %cst_174 = arith.constant 1.000000e+00 : f32
    %476 = vector.broadcast %cst_174 : f32 to vector<2x32xf32>
    %477 = arith.addf %476, %475 : vector<2x32xf32>
    %478 = arith.divf %476, %477 : vector<2x32xf32>
    %479 = vector.extract_strided_slice %472 {offsets = [0, 32], sizes = [2, 32], strides = [1, 1]} : vector<2x128xf32> to vector<2x32xf32>
    %480 = arith.negf %479 : vector<2x32xf32>
    %481 = math.exp %480 : vector<2x32xf32>
    %cst_175 = arith.constant 1.000000e+00 : f32
    %482 = vector.broadcast %cst_175 : f32 to vector<2x32xf32>
    %483 = arith.addf %482, %481 : vector<2x32xf32>
    %484 = arith.divf %482, %483 : vector<2x32xf32>
    %485 = vector.extract_strided_slice %472 {offsets = [0, 64], sizes = [2, 32], strides = [1, 1]} : vector<2x128xf32> to vector<2x32xf32>
    %486 = math.tanh %485 : vector<2x32xf32>
    %487 = vector.extract_strided_slice %472 {offsets = [0, 96], sizes = [2, 32], strides = [1, 1]} : vector<2x128xf32> to vector<2x32xf32>
    %488 = arith.negf %487 : vector<2x32xf32>
    %489 = math.exp %488 : vector<2x32xf32>
    %cst_176 = arith.constant 1.000000e+00 : f32
    %490 = vector.broadcast %cst_176 : f32 to vector<2x32xf32>
    %491 = arith.addf %490, %489 : vector<2x32xf32>
    %492 = arith.divf %490, %491 : vector<2x32xf32>
    %493 = vector.extract_strided_slice %41 {offsets = [0, 2, 0], sizes = [2, 1, 32], strides = [1, 1, 1]} : vector<2x8x32xf32> to vector<2x1x32xf32>
    %494 = vector.shape_cast %493 : vector<2x1x32xf32> to vector<2x32xf32>
    %495 = arith.mulf %462, %494 : vector<2x32xf32>
    %496 = arith.mulf %484, %495 : vector<2x32xf32>
    %497 = arith.mulf %478, %486 : vector<2x32xf32>
    %498 = arith.addf %496, %497 : vector<2x32xf32>
    %499 = math.tanh %498 : vector<2x32xf32>
    %500 = arith.mulf %492, %499 : vector<2x32xf32>
    %501 = vector.shape_cast %500 : vector<2x32xf32> to vector<2x1x32xf32>
    %c0_177 = arith.constant 0 : index
    %c5_178 = arith.constant 5 : index
    %c0_179 = arith.constant 0 : index
    %502 = vector.load %arg33[%c0_177, %c5_178, %c0_179] : memref<2x8x32xf32, #tpu.memory_space<vmem>>, vector<2x1x32xf32>
    tpu.vector_store %arg33[%c0_177, %c5_178, %c0_179], %501 {strides = array<i32>} : memref<2x8x32xf32, #tpu.memory_space<vmem>>, vector<2x1x32xf32>,
    %cst_180 = arith.constant dense<0.000000e+00> : vector<2x128xf32>
    %503 = tpu.matmul %500, %396, %cst_180 {dimension_numbers = #tpu.dot_dimension_numbers<[1], [0], [0], [1], [0, 0, 1, 1], [], []>} : vector<2x32xf32>, vector<32x128xf32>, vector<2x128xf32> -> vector<2x128xf32>
    %504 = vector.broadcast %397 : vector<1x128xf32> to vector<2x128xf32>
    %505 = arith.addf %503, %504 : vector<2x128xf32>
    %506 = vector.extract_strided_slice %44 {offsets = [0, 5, 0], sizes = [2, 1, 128], strides = [1, 1, 1]} : vector<2x8x128xf32> to vector<2x1x128xf32>
    %507 = vector.shape_cast %506 : vector<2x1x128xf32> to vector<2x128xf32>
    %508 = arith.addf %505, %507 : vector<2x128xf32>
    %509 = vector.extract_strided_slice %508 {offsets = [0, 0], sizes = [2, 32], strides = [1, 1]} : vector<2x128xf32> to vector<2x32xf32>
    %510 = arith.negf %509 : vector<2x32xf32>
    %511 = math.exp %510 : vector<2x32xf32>
    %cst_181 = arith.constant 1.000000e+00 : f32
    %512 = vector.broadcast %cst_181 : f32 to vector<2x32xf32>
    %513 = arith.addf %512, %511 : vector<2x32xf32>
    %514 = arith.divf %512, %513 : vector<2x32xf32>
    %515 = vector.extract_strided_slice %508 {offsets = [0, 32], sizes = [2, 32], strides = [1, 1]} : vector<2x128xf32> to vector<2x32xf32>
    %516 = arith.negf %515 : vector<2x32xf32>
    %517 = math.exp %516 : vector<2x32xf32>
    %cst_182 = arith.constant 1.000000e+00 : f32
    %518 = vector.broadcast %cst_182 : f32 to vector<2x32xf32>
    %519 = arith.addf %518, %517 : vector<2x32xf32>
    %520 = arith.divf %518, %519 : vector<2x32xf32>
    %521 = vector.extract_strided_slice %508 {offsets = [0, 64], sizes = [2, 32], strides = [1, 1]} : vector<2x128xf32> to vector<2x32xf32>
    %522 = math.tanh %521 : vector<2x32xf32>
    %523 = vector.extract_strided_slice %508 {offsets = [0, 96], sizes = [2, 32], strides = [1, 1]} : vector<2x128xf32> to vector<2x32xf32>
    %524 = arith.negf %523 : vector<2x32xf32>
    %525 = math.exp %524 : vector<2x32xf32>
    %cst_183 = arith.constant 1.000000e+00 : f32
    %526 = vector.broadcast %cst_183 : f32 to vector<2x32xf32>
    %527 = arith.addf %526, %525 : vector<2x32xf32>
    %528 = arith.divf %526, %527 : vector<2x32xf32>
    %529 = vector.extract_strided_slice %41 {offsets = [0, 3, 0], sizes = [2, 1, 32], strides = [1, 1, 1]} : vector<2x8x32xf32> to vector<2x1x32xf32>
    %530 = vector.shape_cast %529 : vector<2x1x32xf32> to vector<2x32xf32>
    %531 = arith.mulf %498, %530 : vector<2x32xf32>
    %532 = arith.mulf %520, %531 : vector<2x32xf32>
    %533 = arith.mulf %514, %522 : vector<2x32xf32>
    %534 = arith.addf %532, %533 : vector<2x32xf32>
    %535 = math.tanh %534 : vector<2x32xf32>
    %536 = arith.mulf %528, %535 : vector<2x32xf32>
    %537 = vector.shape_cast %536 : vector<2x32xf32> to vector<2x1x32xf32>
    %c0_184 = arith.constant 0 : index
    %c4_185 = arith.constant 4 : index
    %c0_186 = arith.constant 0 : index
    %538 = vector.load %arg33[%c0_184, %c4_185, %c0_186] : memref<2x8x32xf32, #tpu.memory_space<vmem>>, vector<2x1x32xf32>
    tpu.vector_store %arg33[%c0_184, %c4_185, %c0_186], %537 {strides = array<i32>} : memref<2x8x32xf32, #tpu.memory_space<vmem>>, vector<2x1x32xf32>,
    %cst_187 = arith.constant dense<0.000000e+00> : vector<2x128xf32>
    %539 = tpu.matmul %536, %396, %cst_187 {dimension_numbers = #tpu.dot_dimension_numbers<[1], [0], [0], [1], [0, 0, 1, 1], [], []>} : vector<2x32xf32>, vector<32x128xf32>, vector<2x128xf32> -> vector<2x128xf32>
    %540 = vector.broadcast %397 : vector<1x128xf32> to vector<2x128xf32>
    %541 = arith.addf %539, %540 : vector<2x128xf32>
    %542 = vector.extract_strided_slice %44 {offsets = [0, 4, 0], sizes = [2, 1, 128], strides = [1, 1, 1]} : vector<2x8x128xf32> to vector<2x1x128xf32>
    %543 = vector.shape_cast %542 : vector<2x1x128xf32> to vector<2x128xf32>
    %544 = arith.addf %541, %543 : vector<2x128xf32>
    %545 = vector.extract_strided_slice %544 {offsets = [0, 0], sizes = [2, 32], strides = [1, 1]} : vector<2x128xf32> to vector<2x32xf32>
    %546 = arith.negf %545 : vector<2x32xf32>
    %547 = math.exp %546 : vector<2x32xf32>
    %cst_188 = arith.constant 1.000000e+00 : f32
    %548 = vector.broadcast %cst_188 : f32 to vector<2x32xf32>
    %549 = arith.addf %548, %547 : vector<2x32xf32>
    %550 = arith.divf %548, %549 : vector<2x32xf32>
    %551 = vector.extract_strided_slice %544 {offsets = [0, 32], sizes = [2, 32], strides = [1, 1]} : vector<2x128xf32> to vector<2x32xf32>
    %552 = arith.negf %551 : vector<2x32xf32>
    %553 = math.exp %552 : vector<2x32xf32>
    %cst_189 = arith.constant 1.000000e+00 : f32
    %554 = vector.broadcast %cst_189 : f32 to vector<2x32xf32>
    %555 = arith.addf %554, %553 : vector<2x32xf32>
    %556 = arith.divf %554, %555 : vector<2x32xf32>
    %557 = vector.extract_strided_slice %544 {offsets = [0, 64], sizes = [2, 32], strides = [1, 1]} : vector<2x128xf32> to vector<2x32xf32>
    %558 = math.tanh %557 : vector<2x32xf32>
    %559 = vector.extract_strided_slice %544 {offsets = [0, 96], sizes = [2, 32], strides = [1, 1]} : vector<2x128xf32> to vector<2x32xf32>
    %560 = arith.negf %559 : vector<2x32xf32>
    %561 = math.exp %560 : vector<2x32xf32>
    %cst_190 = arith.constant 1.000000e+00 : f32
    %562 = vector.broadcast %cst_190 : f32 to vector<2x32xf32>
    %563 = arith.addf %562, %561 : vector<2x32xf32>
    %564 = arith.divf %562, %563 : vector<2x32xf32>
    %565 = vector.extract_strided_slice %41 {offsets = [0, 4, 0], sizes = [2, 1, 32], strides = [1, 1, 1]} : vector<2x8x32xf32> to vector<2x1x32xf32>
    %566 = vector.shape_cast %565 : vector<2x1x32xf32> to vector<2x32xf32>
    %567 = arith.mulf %534, %566 : vector<2x32xf32>
    %568 = arith.mulf %556, %567 : vector<2x32xf32>
    %569 = arith.mulf %550, %558 : vector<2x32xf32>
    %570 = arith.addf %568, %569 : vector<2x32xf32>
    %571 = math.tanh %570 : vector<2x32xf32>
    %572 = arith.mulf %564, %571 : vector<2x32xf32>
    %573 = vector.shape_cast %572 : vector<2x32xf32> to vector<2x1x32xf32>
    %c0_191 = arith.constant 0 : index
    %c3_192 = arith.constant 3 : index
    %c0_193 = arith.constant 0 : index
    %574 = vector.load %arg33[%c0_191, %c3_192, %c0_193] : memref<2x8x32xf32, #tpu.memory_space<vmem>>, vector<2x1x32xf32>
    tpu.vector_store %arg33[%c0_191, %c3_192, %c0_193], %573 {strides = array<i32>} : memref<2x8x32xf32, #tpu.memory_space<vmem>>, vector<2x1x32xf32>,
    %cst_194 = arith.constant dense<0.000000e+00> : vector<2x128xf32>
    %575 = tpu.matmul %572, %396, %cst_194 {dimension_numbers = #tpu.dot_dimension_numbers<[1], [0], [0], [1], [0, 0, 1, 1], [], []>} : vector<2x32xf32>, vector<32x128xf32>, vector<2x128xf32> -> vector<2x128xf32>
    %576 = vector.broadcast %397 : vector<1x128xf32> to vector<2x128xf32>
    %577 = arith.addf %575, %576 : vector<2x128xf32>
    %578 = vector.extract_strided_slice %44 {offsets = [0, 3, 0], sizes = [2, 1, 128], strides = [1, 1, 1]} : vector<2x8x128xf32> to vector<2x1x128xf32>
    %579 = vector.shape_cast %578 : vector<2x1x128xf32> to vector<2x128xf32>
    %580 = arith.addf %577, %579 : vector<2x128xf32>
    %581 = vector.extract_strided_slice %580 {offsets = [0, 0], sizes = [2, 32], strides = [1, 1]} : vector<2x128xf32> to vector<2x32xf32>
    %582 = arith.negf %581 : vector<2x32xf32>
    %583 = math.exp %582 : vector<2x32xf32>
    %cst_195 = arith.constant 1.000000e+00 : f32
    %584 = vector.broadcast %cst_195 : f32 to vector<2x32xf32>
    %585 = arith.addf %584, %583 : vector<2x32xf32>
    %586 = arith.divf %584, %585 : vector<2x32xf32>
    %587 = vector.extract_strided_slice %580 {offsets = [0, 32], sizes = [2, 32], strides = [1, 1]} : vector<2x128xf32> to vector<2x32xf32>
    %588 = arith.negf %587 : vector<2x32xf32>
    %589 = math.exp %588 : vector<2x32xf32>
    %cst_196 = arith.constant 1.000000e+00 : f32
    %590 = vector.broadcast %cst_196 : f32 to vector<2x32xf32>
    %591 = arith.addf %590, %589 : vector<2x32xf32>
    %592 = arith.divf %590, %591 : vector<2x32xf32>
    %593 = vector.extract_strided_slice %580 {offsets = [0, 64], sizes = [2, 32], strides = [1, 1]} : vector<2x128xf32> to vector<2x32xf32>
    %594 = math.tanh %593 : vector<2x32xf32>
    %595 = vector.extract_strided_slice %580 {offsets = [0, 96], sizes = [2, 32], strides = [1, 1]} : vector<2x128xf32> to vector<2x32xf32>
    %596 = arith.negf %595 : vector<2x32xf32>
    %597 = math.exp %596 : vector<2x32xf32>
    %cst_197 = arith.constant 1.000000e+00 : f32
    %598 = vector.broadcast %cst_197 : f32 to vector<2x32xf32>
    %599 = arith.addf %598, %597 : vector<2x32xf32>
    %600 = arith.divf %598, %599 : vector<2x32xf32>
    %601 = vector.extract_strided_slice %41 {offsets = [0, 5, 0], sizes = [2, 1, 32], strides = [1, 1, 1]} : vector<2x8x32xf32> to vector<2x1x32xf32>
    %602 = vector.shape_cast %601 : vector<2x1x32xf32> to vector<2x32xf32>
    %603 = arith.mulf %570, %602 : vector<2x32xf32>
    %604 = arith.mulf %592, %603 : vector<2x32xf32>
    %605 = arith.mulf %586, %594 : vector<2x32xf32>
    %606 = arith.addf %604, %605 : vector<2x32xf32>
    %607 = math.tanh %606 : vector<2x32xf32>
    %608 = arith.mulf %600, %607 : vector<2x32xf32>
    %609 = vector.shape_cast %608 : vector<2x32xf32> to vector<2x1x32xf32>
    %c0_198 = arith.constant 0 : index
    %c2_199 = arith.constant 2 : index
    %c0_200 = arith.constant 0 : index
    %610 = vector.load %arg33[%c0_198, %c2_199, %c0_200] : memref<2x8x32xf32, #tpu.memory_space<vmem>>, vector<2x1x32xf32>
    tpu.vector_store %arg33[%c0_198, %c2_199, %c0_200], %609 {strides = array<i32>} : memref<2x8x32xf32, #tpu.memory_space<vmem>>, vector<2x1x32xf32>,
    %cst_201 = arith.constant dense<0.000000e+00> : vector<2x128xf32>
    %611 = tpu.matmul %608, %396, %cst_201 {dimension_numbers = #tpu.dot_dimension_numbers<[1], [0], [0], [1], [0, 0, 1, 1], [], []>} : vector<2x32xf32>, vector<32x128xf32>, vector<2x128xf32> -> vector<2x128xf32>
    %612 = vector.broadcast %397 : vector<1x128xf32> to vector<2x128xf32>
    %613 = arith.addf %611, %612 : vector<2x128xf32>
    %614 = vector.extract_strided_slice %44 {offsets = [0, 2, 0], sizes = [2, 1, 128], strides = [1, 1, 1]} : vector<2x8x128xf32> to vector<2x1x128xf32>
    %615 = vector.shape_cast %614 : vector<2x1x128xf32> to vector<2x128xf32>
    %616 = arith.addf %613, %615 : vector<2x128xf32>
    %617 = vector.extract_strided_slice %616 {offsets = [0, 0], sizes = [2, 32], strides = [1, 1]} : vector<2x128xf32> to vector<2x32xf32>
    %618 = arith.negf %617 : vector<2x32xf32>
    %619 = math.exp %618 : vector<2x32xf32>
    %cst_202 = arith.constant 1.000000e+00 : f32
    %620 = vector.broadcast %cst_202 : f32 to vector<2x32xf32>
    %621 = arith.addf %620, %619 : vector<2x32xf32>
    %622 = arith.divf %620, %621 : vector<2x32xf32>
    %623 = vector.extract_strided_slice %616 {offsets = [0, 32], sizes = [2, 32], strides = [1, 1]} : vector<2x128xf32> to vector<2x32xf32>
    %624 = arith.negf %623 : vector<2x32xf32>
    %625 = math.exp %624 : vector<2x32xf32>
    %cst_203 = arith.constant 1.000000e+00 : f32
    %626 = vector.broadcast %cst_203 : f32 to vector<2x32xf32>
    %627 = arith.addf %626, %625 : vector<2x32xf32>
    %628 = arith.divf %626, %627 : vector<2x32xf32>
    %629 = vector.extract_strided_slice %616 {offsets = [0, 64], sizes = [2, 32], strides = [1, 1]} : vector<2x128xf32> to vector<2x32xf32>
    %630 = math.tanh %629 : vector<2x32xf32>
    %631 = vector.extract_strided_slice %616 {offsets = [0, 96], sizes = [2, 32], strides = [1, 1]} : vector<2x128xf32> to vector<2x32xf32>
    %632 = arith.negf %631 : vector<2x32xf32>
    %633 = math.exp %632 : vector<2x32xf32>
    %cst_204 = arith.constant 1.000000e+00 : f32
    %634 = vector.broadcast %cst_204 : f32 to vector<2x32xf32>
    %635 = arith.addf %634, %633 : vector<2x32xf32>
    %636 = arith.divf %634, %635 : vector<2x32xf32>
    %637 = vector.extract_strided_slice %41 {offsets = [0, 6, 0], sizes = [2, 1, 32], strides = [1, 1, 1]} : vector<2x8x32xf32> to vector<2x1x32xf32>
    %638 = vector.shape_cast %637 : vector<2x1x32xf32> to vector<2x32xf32>
    %639 = arith.mulf %606, %638 : vector<2x32xf32>
    %640 = arith.mulf %628, %639 : vector<2x32xf32>
    %641 = arith.mulf %622, %630 : vector<2x32xf32>
    %642 = arith.addf %640, %641 : vector<2x32xf32>
    %643 = math.tanh %642 : vector<2x32xf32>
    %644 = arith.mulf %636, %643 : vector<2x32xf32>
    %645 = vector.shape_cast %644 : vector<2x32xf32> to vector<2x1x32xf32>
    %c0_205 = arith.constant 0 : index
    %c1_206 = arith.constant 1 : index
    %c0_207 = arith.constant 0 : index
    %646 = vector.load %arg33[%c0_205, %c1_206, %c0_207] : memref<2x8x32xf32, #tpu.memory_space<vmem>>, vector<2x1x32xf32>
    tpu.vector_store %arg33[%c0_205, %c1_206, %c0_207], %645 {strides = array<i32>} : memref<2x8x32xf32, #tpu.memory_space<vmem>>, vector<2x1x32xf32>,
    %cst_208 = arith.constant dense<0.000000e+00> : vector<2x128xf32>
    %647 = tpu.matmul %644, %396, %cst_208 {dimension_numbers = #tpu.dot_dimension_numbers<[1], [0], [0], [1], [0, 0, 1, 1], [], []>} : vector<2x32xf32>, vector<32x128xf32>, vector<2x128xf32> -> vector<2x128xf32>
    %648 = vector.broadcast %397 : vector<1x128xf32> to vector<2x128xf32>
    %649 = arith.addf %647, %648 : vector<2x128xf32>
    %650 = vector.extract_strided_slice %44 {offsets = [0, 1, 0], sizes = [2, 1, 128], strides = [1, 1, 1]} : vector<2x8x128xf32> to vector<2x1x128xf32>
    %651 = vector.shape_cast %650 : vector<2x1x128xf32> to vector<2x128xf32>
    %652 = arith.addf %649, %651 : vector<2x128xf32>
    %653 = vector.extract_strided_slice %652 {offsets = [0, 0], sizes = [2, 32], strides = [1, 1]} : vector<2x128xf32> to vector<2x32xf32>
    %654 = arith.negf %653 : vector<2x32xf32>
    %655 = math.exp %654 : vector<2x32xf32>
    %cst_209 = arith.constant 1.000000e+00 : f32
    %656 = vector.broadcast %cst_209 : f32 to vector<2x32xf32>
    %657 = arith.addf %656, %655 : vector<2x32xf32>
    %658 = arith.divf %656, %657 : vector<2x32xf32>
    %659 = vector.extract_strided_slice %652 {offsets = [0, 32], sizes = [2, 32], strides = [1, 1]} : vector<2x128xf32> to vector<2x32xf32>
    %660 = arith.negf %659 : vector<2x32xf32>
    %661 = math.exp %660 : vector<2x32xf32>
    %cst_210 = arith.constant 1.000000e+00 : f32
    %662 = vector.broadcast %cst_210 : f32 to vector<2x32xf32>
    %663 = arith.addf %662, %661 : vector<2x32xf32>
    %664 = arith.divf %662, %663 : vector<2x32xf32>
    %665 = vector.extract_strided_slice %652 {offsets = [0, 64], sizes = [2, 32], strides = [1, 1]} : vector<2x128xf32> to vector<2x32xf32>
    %666 = math.tanh %665 : vector<2x32xf32>
    %667 = vector.extract_strided_slice %652 {offsets = [0, 96], sizes = [2, 32], strides = [1, 1]} : vector<2x128xf32> to vector<2x32xf32>
    %668 = arith.negf %667 : vector<2x32xf32>
    %669 = math.exp %668 : vector<2x32xf32>
    %cst_211 = arith.constant 1.000000e+00 : f32
    %670 = vector.broadcast %cst_211 : f32 to vector<2x32xf32>
    %671 = arith.addf %670, %669 : vector<2x32xf32>
    %672 = arith.divf %670, %671 : vector<2x32xf32>
    %673 = vector.extract_strided_slice %41 {offsets = [0, 7, 0], sizes = [2, 1, 32], strides = [1, 1, 1]} : vector<2x8x32xf32> to vector<2x1x32xf32>
    %674 = vector.shape_cast %673 : vector<2x1x32xf32> to vector<2x32xf32>
    %675 = arith.mulf %642, %674 : vector<2x32xf32>
    %676 = arith.mulf %664, %675 : vector<2x32xf32>
    %677 = arith.mulf %658, %666 : vector<2x32xf32>
    %678 = arith.addf %676, %677 : vector<2x32xf32>
    %679 = math.tanh %678 : vector<2x32xf32>
    %680 = arith.mulf %672, %679 : vector<2x32xf32>
    %681 = vector.shape_cast %680 : vector<2x32xf32> to vector<2x1x32xf32>
    %c0_212 = arith.constant 0 : index
    %c0_213 = arith.constant 0 : index
    %c0_214 = arith.constant 0 : index
    %682 = vector.load %arg33[%c0_212, %c0_213, %c0_214] : memref<2x8x32xf32, #tpu.memory_space<vmem>>, vector<2x1x32xf32>
    tpu.vector_store %arg33[%c0_212, %c0_213, %c0_214], %681 {strides = array<i32>} : memref<2x8x32xf32, #tpu.memory_space<vmem>>, vector<2x1x32xf32>,
    %c0_215 = arith.constant 0 : index
    %c0_216 = arith.constant 0 : index
    %c0_217 = arith.constant 0 : index
    %683 = vector.load %arg33[%c0_215, %c0_216, %c0_217] : memref<2x8x32xf32, #tpu.memory_space<vmem>>, vector<2x8x32xf32>
    %684 = vector.shape_cast %683 : vector<2x8x32xf32> to vector<16x32xf32>
    %c0_218 = arith.constant 0 : index
    %c0_219 = arith.constant 0 : index
    %685 = vector.load %arg26[%c0_218, %c0_219] : memref<32x8xf32, #tpu.memory_space<vmem>>, vector<32x8xf32>
    %cst_220 = arith.constant dense<0.000000e+00> : vector<16x8xf32>
    %686 = tpu.matmul %684, %685, %cst_220 {dimension_numbers = #tpu.dot_dimension_numbers<[1], [0], [0], [1], [0, 0, 1, 1], [], []>} : vector<16x32xf32>, vector<32x8xf32>, vector<16x8xf32> -> vector<16x8xf32>
    %c0_221 = arith.constant 0 : index
    %c0_222 = arith.constant 0 : index
    %687 = vector.load %arg27[%c0_221, %c0_222] : memref<1x8xf32, #tpu.memory_space<vmem>>, vector<1x8xf32>
    %688 = vector.broadcast %687 : vector<1x8xf32> to vector<16x8xf32>
    %689 = arith.addf %686, %688 : vector<16x8xf32>
    %690 = vector.shape_cast %689 : vector<16x8xf32> to vector<2x8x8xf32>
    %c0_223 = arith.constant 0 : index
    %c0_224 = arith.constant 0 : index
    %c0_225 = arith.constant 0 : index
    %691 = vector.load %arg29[%c0_223, %c0_224, %c0_225] : memref<2x8x8xf32, #tpu.memory_space<vmem>>, vector<2x8x8xf32>
    tpu.vector_store %arg29[%c0_223, %c0_224, %c0_225], %690 {strides = array<i32>} : memref<2x8x8xf32, #tpu.memory_space<vmem>>, vector<2x8x8xf32>,
    return
  }
  func.func @transform_0(%arg0: i32) -> (i32, i32, i32) {
    %c0_i32 = arith.constant 0 : i32
    %c0_i32_0 = arith.constant 0 : i32
    %c0_i32_1 = arith.constant 0 : i32
    %c0_i32_2 = arith.constant 0 : i32
    return %c0_i32, %c0_i32_0, %c0_i32_1 : i32, i32, i32
  }
  func.func @transform_1(%arg0: i32) -> (i32, i32, i32) {
    %c0_i32 = arith.constant 0 : i32
    %c0_i32_0 = arith.constant 0 : i32
    %c0_i32_1 = arith.constant 0 : i32
    %c0_i32_2 = arith.constant 0 : i32
    return %c0_i32, %c0_i32_0, %c0_i32_1 : i32, i32, i32
  }
  func.func @transform_2(%arg0: i32) -> (i32, i32, i32) {
    %c0_i32 = arith.constant 0 : i32
    %c0_i32_0 = arith.constant 0 : i32
    %c0_i32_1 = arith.constant 0 : i32
    %c0_i32_2 = arith.constant 0 : i32
    return %c0_i32, %c0_i32_0, %c0_i32_1 : i32, i32, i32
  }
  func.func @transform_3(%arg0: i32) -> (i32, i32) {
    %c0_i32 = arith.constant 0 : i32
    %c0_i32_0 = arith.constant 0 : i32
    %c0_i32_1 = arith.constant 0 : i32
    return %c0_i32, %c0_i32_0 : i32, i32
  }
  func.func @transform_4(%arg0: i32) -> (i32, i32) {
    %c0_i32 = arith.constant 0 : i32
    %c0_i32_0 = arith.constant 0 : i32
    %c0_i32_1 = arith.constant 0 : i32
    return %c0_i32, %c0_i32_0 : i32, i32
  }
  func.func @transform_5(%arg0: i32) -> (i32, i32) {
    %c0_i32 = arith.constant 0 : i32
    %c0_i32_0 = arith.constant 0 : i32
    %c0_i32_1 = arith.constant 0 : i32
    return %c0_i32, %c0_i32_0 : i32, i32
  }
  func.func @transform_6(%arg0: i32) -> (i32, i32) {
    %c0_i32 = arith.constant 0 : i32
    %c0_i32_0 = arith.constant 0 : i32
    %c0_i32_1 = arith.constant 0 : i32
    return %c0_i32, %c0_i32_0 : i32, i32
  }
  func.func @transform_7(%arg0: i32) -> (i32, i32) {
    %c0_i32 = arith.constant 0 : i32
    %c0_i32_0 = arith.constant 0 : i32
    %c0_i32_1 = arith.constant 0 : i32
    return %c0_i32, %c0_i32_0 : i32, i32
  }
  func.func @transform_8(%arg0: i32) -> (i32, i32) {
    %c0_i32 = arith.constant 0 : i32
    %c0_i32_0 = arith.constant 0 : i32
    %c0_i32_1 = arith.constant 0 : i32
    return %c0_i32, %c0_i32_0 : i32, i32
  }
  func.func @transform_9(%arg0: i32) -> (i32, i32) {
    %c0_i32 = arith.constant 0 : i32
    %c0_i32_0 = arith.constant 0 : i32
    %c0_i32_1 = arith.constant 0 : i32
    return %c0_i32, %c0_i32_0 : i32, i32
  }
  func.func @transform_10(%arg0: i32) -> (i32, i32) {
    %c0_i32 = arith.constant 0 : i32
    %c0_i32_0 = arith.constant 0 : i32
    %c0_i32_1 = arith.constant 0 : i32
    return %c0_i32, %c0_i32_0 : i32, i32
  }
  func.func @transform_11(%arg0: i32) -> (i32, i32) {
    %c0_i32 = arith.constant 0 : i32
    %c0_i32_0 = arith.constant 0 : i32
    %c0_i32_1 = arith.constant 0 : i32
    return %c0_i32, %c0_i32_0 : i32, i32
  }
  func.func @transform_12(%arg0: i32) -> (i32, i32) {
    %c0_i32 = arith.constant 0 : i32
    %c0_i32_0 = arith.constant 0 : i32
    %c0_i32_1 = arith.constant 0 : i32
    return %c0_i32, %c0_i32_0 : i32, i32
  }
  func.func @transform_13(%arg0: i32) -> (i32, i32) {
    %c0_i32 = arith.constant 0 : i32
    %c0_i32_0 = arith.constant 0 : i32
    %c0_i32_1 = arith.constant 0 : i32
    return %c0_i32, %c0_i32_0 : i32, i32
  }
  func.func @transform_14(%arg0: i32) -> (i32, i32) {
    %c0_i32 = arith.constant 0 : i32
    %c0_i32_0 = arith.constant 0 : i32
    %c0_i32_1 = arith.constant 0 : i32
    return %c0_i32, %c0_i32_0 : i32, i32
  }
  func.func @transform_15(%arg0: i32) -> (i32, i32) {
    %c0_i32 = arith.constant 0 : i32
    %c0_i32_0 = arith.constant 0 : i32
    %c0_i32_1 = arith.constant 0 : i32
    return %c0_i32, %c0_i32_0 : i32, i32
  }
  func.func @transform_16(%arg0: i32) -> (i32, i32) {
    %c0_i32 = arith.constant 0 : i32
    %c0_i32_0 = arith.constant 0 : i32
    %c0_i32_1 = arith.constant 0 : i32
    return %c0_i32, %c0_i32_0 : i32, i32
  }
  func.func @transform_17(%arg0: i32) -> (i32, i32) {
    %c0_i32 = arith.constant 0 : i32
    %c0_i32_0 = arith.constant 0 : i32
    %c0_i32_1 = arith.constant 0 : i32
    return %c0_i32, %c0_i32_0 : i32, i32
  }
  func.func @transform_18(%arg0: i32) -> (i32, i32) {
    %c0_i32 = arith.constant 0 : i32
    %c0_i32_0 = arith.constant 0 : i32
    %c0_i32_1 = arith.constant 0 : i32
    return %c0_i32, %c0_i32_0 : i32, i32
  }
  func.func @transform_19(%arg0: i32) -> (i32, i32) {
    %c0_i32 = arith.constant 0 : i32
    %c0_i32_0 = arith.constant 0 : i32
    %c0_i32_1 = arith.constant 0 : i32
    return %c0_i32, %c0_i32_0 : i32, i32
  }
  func.func @transform_20(%arg0: i32) -> (i32, i32) {
    %c0_i32 = arith.constant 0 : i32
    %c0_i32_0 = arith.constant 0 : i32
    %c0_i32_1 = arith.constant 0 : i32
    return %c0_i32, %c0_i32_0 : i32, i32
  }
  func.func @transform_21(%arg0: i32) -> (i32, i32, i32) {
    %c0_i32 = arith.constant 0 : i32
    %c0_i32_0 = arith.constant 0 : i32
    %c0_i32_1 = arith.constant 0 : i32
    %c0_i32_2 = arith.constant 0 : i32
    return %c0_i32, %c0_i32_0, %c0_i32_1 : i32, i32, i32
  }
  func.func @transform_22(%arg0: i32) -> (i32, i32) {
    %c0_i32 = arith.constant 0 : i32
    %c0_i32_0 = arith.constant 0 : i32
    %c0_i32_1 = arith.constant 0 : i32
    return %c0_i32, %c0_i32_0 : i32, i32
  }
  func.func @transform_23(%arg0: i32) -> (i32, i32, i32) {
    %c0_i32 = arith.constant 0 : i32
    %c0_i32_0 = arith.constant 0 : i32
    %c0_i32_1 = arith.constant 0 : i32
    %c0_i32_2 = arith.constant 0 : i32
    return %c0_i32, %c0_i32_0, %c0_i32_1 : i32, i32, i32
  }
  func.func @transform_24(%arg0: i32) -> (i32, i32, i32) {
    %c0_i32 = arith.constant 0 : i32
    %c0_i32_0 = arith.constant 0 : i32
    %c0_i32_1 = arith.constant 0 : i32
    %c0_i32_2 = arith.constant 0 : i32
    return %c0_i32, %c0_i32_0, %c0_i32_1 : i32, i32, i32
  }
  func.func @transform_25(%arg0: i32) -> (i32, i32) {
    %c0_i32 = arith.constant 0 : i32
    %c0_i32_0 = arith.constant 0 : i32
    %c0_i32_1 = arith.constant 0 : i32
    return %c0_i32, %c0_i32_0 : i32, i32
  }
  func.func @transform_26(%arg0: i32) -> (i32, i32) {
    %c0_i32 = arith.constant 0 : i32
    %c0_i32_0 = arith.constant 0 : i32
    %c0_i32_1 = arith.constant 0 : i32
    return %c0_i32, %c0_i32_0 : i32, i32
  }
  func.func @transform_27(%arg0: i32) -> (i32, i32) {
    %c0_i32 = arith.constant 0 : i32
    %c0_i32_0 = arith.constant 0 : i32
    %c0_i32_1 = arith.constant 0 : i32
    return %c0_i32, %c0_i32_0 : i32, i32
  }
  func.func @transform_28(%arg0: i32) -> (i32, i32, i32) {
    %c0_i32 = arith.constant 0 : i32
    %c0_i32_0 = arith.constant 0 : i32
    %c0_i32_1 = arith.constant 0 : i32
    %c0_i32_2 = arith.constant 0 : i32
    return %c0_i32, %c0_i32_0, %c0_i32_1 : i32, i32, i32
  }
  func.func @transform_29(%arg0: i32) -> (i32, i32, i32) {
    %c0_i32 = arith.constant 0 : i32
    %c0_i32_0 = arith.constant 0 : i32
    %c0_i32_1 = arith.constant 0 : i32
    %c0_i32_2 = arith.constant 0 : i32
    return %c0_i32, %c0_i32_0, %c0_i32_1 : i32, i32, i32
  }
  func.func @transform_30(%arg0: i32) -> (i32, i32, i32) {
    %c0_i32 = arith.constant 0 : i32
    %c0_i32_0 = arith.constant 0 : i32
    %c0_i32_1 = arith.constant 0 : i32
    %c0_i32_2 = arith.constant 0 : i32
    return %c0_i32, %c0_i32_0, %c0_i32_1 : i32, i32, i32
  }
}

</mosaic_0001>

<bundles_post_ra>
// kernel: ucitr_forward.1
= control target key start
LH: loop header
LB: loop body
LE: loop exit
PB: predicated region body
PF: predicated region fallthrough
CT: control target
= control target key end

     0   :  { %s5785_s6 = smov 1   ;;  %s5786_s10 = smov 2   ;;  %s6957_s0 = inlined_call_operand.smem [shape: u32[31], index: -1, kind: input, shape index: {}] }
   0x1   :  { %s5841_s5 = sld [smem:[%s6957_s0]]   ;;  %s5787_s14 = smov 3  }
   0x2   :  { %s5846_s9 = sld [smem:[%s6957_s0 + %s5785_s6]]   ;;  %s5788_s18 = smov 4  }
   0x3   :  { %s5851_s13 = sld [smem:[%s6957_s0 + %s5786_s10]]   ;;  %s5789_s22 = smov 5  }
   0x4   :  { %s5856_s17 = sld [smem:[%s6957_s0 + %s5787_s14]]   ;;  %s5790_s26 = smov 6  }
   0x5   :  { %s5861_s21 = sld [smem:[%s6957_s0 + %s5788_s18]]   ;;  %s5791_s30 = smov 7  }
   0x6   :  { %s5866_s25 = sld [smem:[%s6957_s0 + %s5789_s22]]   ;;  %s5792_s4 = smov 8  }
   0x7   :  { %s5871_s29 = sld [smem:[%s6957_s0 + %s5790_s26]]   ;;  %s5793_s10 = smov 9  }
   0x8   :  { %s5876_s3 = sld [smem:[%s6957_s0 + %s5791_s30]]   ;;  %s5794_s15 = smov 10  }
   0x9   :  { %s5881_s8 = sld [smem:[%s6957_s0 + %s5792_s4]]   ;;  %s5795_s20 = smov 11  }
   0xa   :  { %s5886_s14 = sld [smem:[%s6957_s0 + %s5793_s10]]   ;;  %s5796_s26 = smov 12  }
   0xb   :  { %s5891_s19 = sld [smem:[%s6957_s0 + %s5794_s15]]   ;;  %s5797_s1 = smov 13  }
   0xc   :  { %s5896_s24 = sld [smem:[%s6957_s0 + %s5795_s20]]   ;;  %s5798_s7 = smov 14  }
   0xd   :  { %s5901_s30 = sld [smem:[%s6957_s0 + %s5796_s26]]   ;;  %s5799_s15 = smov 15  }
   0xe   :  { %s5906_s6 = sld [smem:[%s6957_s0 + %s5797_s1]]   ;;  %s5800_s22 = smov 16  }
   0xf   :  { %s5911_s12 = sld [smem:[%s6957_s0 + %s5798_s7]]   ;;  %s5801_s28 = smov 17  }
  0x10   :  { %s5916_s20 = sld [smem:[%s6957_s0 + %s5799_s15]]   ;;  %s5802_s7 = smov 18  }
  0x11   :  { %s5921_s27 = sld [smem:[%s6957_s0 + %s5800_s22]]   ;;  %s5803_s15 = smov 19  }
  0x12   :  { %s5926_s4 = sld [smem:[%s6957_s0 + %s5801_s28]]   ;;  %s5804_s22 = smov 20  }
  0x13   :  { %s5805_s28 = smov 21  }
  0x14   :  { %6966 = sst [smem:[#allocation14_spill]] %s5906_s6 }
  0x15   :  { %6967 = sst [smem:[#allocation15_spill]] %s5911_s12 }
  0x16   :  { %s5931_s12 = sld [smem:[%s6957_s0 + %s5802_s7]]   ;;  %s5806_s7 = smov 22  }
  0x17   :  { %6968 = sst [smem:[#allocation16_spill]] %s5921_s27 }
  0x18   :  { %6969 = sst [smem:[#allocation17_spill]] %s5926_s4 }
  0x19   :  { %s5936_s6 = sld [smem:[%s6957_s0 + %s5803_s15]]   ;;  %s5807_s15 = smov 23  }
  0x1a   :  { %s5941_s27 = sld [smem:[%s6957_s0 + %s5804_s22]]   ;;  %s5808_s22 = smov 24  }
  0x1b   :  { %s5946_s4 = sld [smem:[%s6957_s0 + %s5805_s28]]   ;;  %s5809_s28 = smov 25  }
  0x1c   :  { %6970 = sst [smem:[#allocation18_spill]] %s5931_s12 }
  0x1d   :  { %s5951_s12 = sld [smem:[%s6957_s0 + %s5806_s7]]   ;;  %s5810_s7 = smov 26  }
  0x1f   :  { %6971 = sst [smem:[#allocation19_spill]] %s5936_s6 }
  0x20   :  { %6972 = sst [smem:[#allocation20_spill]] %s5941_s27 }
  0x21   :  { %6973 = sst [smem:[#allocation21_spill]] %s5946_s4 }
  0x22   :  { %s5956_s6 = sld [smem:[%s6957_s0 + %s5807_s15]]   ;;  %s5811_s15 = smov 27  }
  0x23   :  { %6974 = sst [smem:[#allocation22_spill]] %s5951_s12 }
  0x24   :  { %s5961_s27 = sld [smem:[%s6957_s0 + %s5808_s22]]   ;;  %s5812_s22 = smov 28  }
  0x25   :  { %s5966_s4 = sld [smem:[%s6957_s0 + %s5809_s28]]   ;;  %s5813_s28 = smov 29  }
  0x26   :  { %s5971_s12 = sld [smem:[%s6957_s0 + %s5810_s7]]   ;;  %s5814_s7 = smov 30  }
  0x28   :  { %6975 = sst [smem:[#allocation23_spill]] %s5956_s6 }
  0x29   :  { %s5976_s6 = sld [smem:[%s6957_s0 + %s5811_s15]]  }
  0x2a   :  { %6976 = sst [smem:[#allocation24_spill]] %s5961_s27 }
  0x2b   :  { %6977 = sst [smem:[#allocation25_spill]] %s5966_s4 }
  0x2c   :  { %6978 = sst [smem:[#allocation26_spill]] %s5971_s12 }
  0x2d   :  { %s5981_s27 = sld [smem:[%s6957_s0 + %s5812_s22]]  }
  0x2e   :  { %s5986_s4 = sld [smem:[%s6957_s0 + %s5813_s28]]  }
  0x2f   :  { %s5991_s12 = sld [smem:[%s6957_s0 + %s5814_s7]]  }
  0x30   :  { %67 = vsyncpa [#allocation5], 0 }
  0x31   :  { %68 = vsyncpa [#allocation7], 0  ;;  %v133_v0 = vld [vmem:[%s5861_s21] sm:$0xff]  ;;  %vm134_vm0 = vcmask 64512   ;;  %v5999_v5 = vld [vmem:[%s5841_s5 + $0x8] sm:$0xff] }
  0x32   :  { %v132_v1 = vld [vmem:[%s5856_s17] sm:$0xff]  ;;  %4948 = vmatprep.subr.mxu1 %v133_v0  ;;  %v127_v7 = vld [vmem:[%s5851_s13 + $0x8] sm:$0xff] }
  0x33   :  { %v124_v2 = vld [vmem:[%s5841_s5] sm:$0xff]  ;;  %4953 = vmatprep.subr.mxu0 %v132_v1  ;;  %4949 = vmatpush3.msra.mxu1 %v133_v0  ;;  %v6004_v8 = vld [vmem:[%s5846_s9 + $0x8] sm:$0xff] }
  0x34   :  { %v126_v3 = vld [vmem:[%s5851_s13] sm:$0xff]  ;;  %4954 = vmatpush3.msra.mxu0 %v132_v1 }
  0x35   :  { %v130_v4 = vld [vmem:[%s5846_s9] sm:$0xff]  ;;  %v128_v6 = vmul.f32 %v126_v3, %v124_v2  ;;  %4950 = vmatprep.mubr.msk.f32.mxu1 %vm134_vm0, %v126_v3 }
  0x36   :  { %v315_v9 = vld [vmem:[%s5876_s3] sm:$0xff]  ;;  %4955 = vmatprep.mubr.msk.f32.mxu0 %vm134_vm0, %v130_v4 }
  0x37   :  { %69 = vsyncpa [#allocation10], 0  ;;  %v129_v10 = vmul.f32 %v127_v7, %v5999_v5  ;;  %4951 = vmatmul.mubr.msk.f32.vlgmr.msra.gmra.mrb[0].mxu1 %vm134_vm0, %v127_v7  ;;  %4956 = vmatmul.mubr.msk.f32.vlgmr.msra.gmra.mrb[0].mxu0 %vm134_vm0, %v6004_v8  ;;  %v314_v11 = vld [vmem:[%s5871_s29] sm:$0xff]  ;;  %s5815_s0 = smov 16   ;;  %s5816_s5 = smov 96   ;;  %v655_v60 = vld [vmem:[%s5886_s14 + $0x8] sm:$0xff] }
  0x38   :  { %4958 = vmatprep.subr.mxu1 %v315_v9  ;;  %4960 = vmatprep.mubr.msk.f32.mxu1 %vm134_vm0, %v128_v6  ;;  %v4415_v14 = vld [vmem:[%s5866_s25] ss:$0 sm:$0xff]  ;;  %v5817_v62 = vmov 0.0|0.0   ;;  %vm5818_vm1 = vmmov 0   ;;  %v5819_v63 = vmov 0.0   ;;  %s5820_s9 = smov 32  }
  0x39   :  { %4959 = vmatpush3.msra.mxu1 %v315_v9  ;;  %4970 = vmatprep.mubr.msk.f32.mxu0 %vm134_vm0, %v130_v4  ;;  %v4420_v27 = vld [vmem:[%s5881_s8] ss:$0 sm:$0xff]  ;;  %vm726_vm2 = vcmask 1041409   ;;  %s5821_s13 = smov 80   ;;  %vm730_vm3 = vcmask 130048   ;;  %s6979_s17 = sld [smem:[#allocation19_spill]] }
  0x3a   :  { %4963 = vmatprep.subr.mxu1 %v314_v11  ;;  %v487_v58 = vld [vmem:[%s5891_s19] sm:$0xff]  ;;  %s6980_s21 = sld [smem:[#allocation17_spill]]  ;;  %s6981_s25 = sld [smem:[#allocation21_spill]]  ;;  %vm722_vm4 = vcmask 122880   ;;  %vm883_vm5 = vcmask 123905   ;;  %vm1033_vm6 = vcmask 124930  }
  0x3b   :  { %4961 = vmatmul.mubr.msk.f32.vlgmr.msra.gmra.mrb[2].mxu1 %vm134_vm0, %v129_v10  ;;  %v654_v59 = vld [vmem:[%s5886_s14] sm:$0xff]  ;;  %4968 = vmatprep.subr.mxu0 %v487_v58  ;;  %vm1184_vm7 = vcmask 125955   ;;  %vm1335_vm8 = vcmask 126980   ;;  %s5822_s29 = smov 112   ;;  %vm1486_vm9 = vcmask 128005   ;;  %vm1637_vm10 = vcmask 129030  }
  0x3c   :  { %4964 = vmatpush3.msra.mxu1 %v314_v11  ;;  %4965 = vmatprep.mubr.msk.f32.mxu1 %vm134_vm0, %v124_v2  ;;  %v6051_v61 = vpack.c.bf16 %v655_v60, %v654_v59  ;;  %vm1788_vm11 = vcmask 130055   ;;  %s6982_s3 = sld [smem:[#allocation20_spill]]  ;;  %s6983_s8 = sld [smem:[#allocation18_spill]]  ;;  %vm2790_vm12 = vcmask 261120   ;;  %vm2768_vm13 = vcmask 254976  }
  0x3d   :  { %4969 = vmatpush3.msra.mxu0 %v487_v58  ;;  %s6984_s14 = sld [smem:[#allocation23_spill]]  ;;  %s6985_s19 = sld [smem:[#allocation22_spill]]  ;;  %vm3178_vm15 = vcmask 253952  }
  0x3e   :  { %4971 = vmatmul.mubr.msk.f32.vlgmr.msra.gmra.mrb[2].mxu0 %vm134_vm0, %v6004_v8  ;;  %5140 = vmatprep.subr.bf16.mxu0 %v5817_v62  ;;  %s6989_s15 = sld [smem:[#allocation15_spill]]  ;;  %s5825_s16 = smov 64  }
  0x3f   :  { %5142 = vmatpush3.bf16.msra.mxu0 %v6051_v61  ;;  %4982 = vmatprep.mubr.msk.f32.mxu0 %vm5818_vm1, %v5819_v63  ;;  %s6991_s18 = sld [smem:[#allocation25_spill]]  ;;  %s5826_s22 = smov [#allocation4]  }
  0x40   :  { %5146 = vmatprep.subr.bf16.mxu0 %v5817_v62  ;;  %s4326_s23 = sshll.u32 %s5826_s22, 4  ;;  %s4327_s23 = int_to_ptr.vmem [resolvable:$true] %s4326_s23 }
  0x41   :  { %s5691_s26 = scalar_lea.vmem %s4327_s23, 32  ;;  %p5696_p1 = scmp.lt.s32.totalorder %s4327_s23, %s4327_s23 }
  0x42   :  { %p5692_p0 = scmp.ne.s32.totalorder %s4327_s23, %s5691_s26  ;;  %p5697_p2 = scmp.lt.s32.totalorder %s5691_s26, %s5691_s26 }
  0x43   :  { %4966 = vmatmul.mubr.msk.f32.vlgmr.msra.gmra.mrb[2].mxu1 %vm134_vm0, %v5999_v5 }
  0x44   :  { %4975 = vmatprep.mubr.msk.f32.mxu1 %vm134_vm0, %v124_v2  ;;  %p5698_p3 = por %p5697_p2, %p5696_p1 }
  0x46   :  { %p5699_p4 = pnand %p5698_p3, %p5692_p0 }
 0x10a   :  { %v4952_v12 = vpop.f32.mrb[0].mxu1  ;;  %v4957_v13 = vpop.f32.mrb[0].mxu0 }
 0x10b   :  { %v294_v15 = vadd.f32 %v4957_v13, %v4952_v12  ;;  %v207_v16 = vpop.f32.mrb[1].mxu1  ;;  %v288_v17 = vpop.f32.mrb[1].mxu0  ;;  %v4421_v12 = vld [vmem:[%s5896_s24] ss:$0 sm:$0xff]  ;;  %s6986_s24 = sld [smem:[#allocation16_spill]] }
 0x10c   :  { %v289_v18 = vadd.f32 %v288_v17, %v207_v16 }
 0x10d   :  { %v305_v19 = vadd.f32 %v4415_v14, %v294_v15 }
 0x10e   :  { %v304_v20 = vadd.f32 %v4415_v14, %v289_v18 }
 0x10f   :  { %v307_v21 = vmax.f32 %v305_v19, 0.0 }
 0x110   :  { %v306_v22 = vmax.f32 %v304_v20, 0.0 }
 0x111   :  { %v309_v23 = vsub.f32 0.0, %v307_v21  ;;  %v4972_v9 = vpop.f32.mrb[2].mxu0 }
 0x112   :  { %v308_v24 = vsub.f32 0.0, %v306_v22  ;;  %v561_v10 = vpop.f32.mrb[3].mxu0  ;;  %v567_v13 = vadd.f32 %v4972_v9, %v4421_v12 }
 0x113   :  { %v312_v25 = vmul.f32 1.442695, %v309_v23  ;;  %v562_v14 = vadd.f32 %v4421_v12, %v561_v10 }
 0x114   :  { %v310_v26 = vmul.f32 1.442695, %v308_v24  ;;  %v571_v15 = vmax.f32 %v567_v13, 0.0 }
 0x115   :  { %5487 = vpow2.f32 %v312_v25  ;;  %v570_v16 = vmax.f32 %v562_v14, 0.0 }
 0x116   :  { %v4967_v28 = vpop.f32.mrb[2].mxu1  ;;  %5489 = vpow2.f32 %v310_v26  ;;  %v573_v17 = vsub.f32 0.0, %v571_v15 }
 0x117   :  { %v6022_v29 = vadd.f32 %v4967_v28, %v4420_v27  ;;  %v469_v30 = vpop.f32.mrb[3].mxu1  ;;  %v572_v18 = vsub.f32 0.0, %v570_v16 }
 0x118   :  { %v6024_v31 = vadd.f32 %v4420_v27, %v469_v30  ;;  %v576_v19 = vmul.f32 1.442695, %v573_v17 }
 0x119   :  { %5491 = vtanh.f32 %v6022_v29  ;;  %v4427_v38 = vmul.f32 -1.442695, %v6022_v29  ;;  %v574_v20 = vmul.f32 1.442695, %v572_v18 }
 0x11a   :  { %5493 = vtanh.f32 %v6024_v31  ;;  %v4426_v39 = vmul.f32 -1.442695, %v6024_v31 }
 0x11b   :  { %5495 = vpow2.f32 %v4427_v38 }
 0x11c   :  { %5497 = vpow2.f32 %v4426_v39 }
 0x11f   :  { %v6028_v32 = vpop.eup %5487 }
 0x120   :  { %v671_v33 = vmul.f32 0.0, %v6028_v32  ;;  %v6031_v34 = vpop.eup %5489  ;;  %v826_v58 = vrot.slane %v6028_v32, 1 }
 0x121   :  { %v670_v36 = vmul.f32 0.0, %v6031_v34  ;;  %v825_v59 = vrot.slane %v6031_v34, 1 }
 0x122   :  { %676 = vrot.lane.b32.xlu1 %v671_v33, %s5815_s0 }
 0x123   :  { %v5492_v35 = vpop.eup %5491 }
 0x124   :  { %686 = vrot.lane.b32.xlu0 %v5492_v35, %s5816_s5  ;;  %v5494_v37 = vpop.eup %5493 }
 0x125   :  { %v5496_v40 = vpop.eup %5495 }
 0x126   :  { %674 = vrot.lane.b32.xlu1 %v670_v36, %s5815_s0  ;;  %v663_v41 = vadd.f32 1.0, %v5496_v40  ;;  %v5498_v42 = vpop.eup %5497 }
 0x127   :  { %v662_v43 = vadd.f32 1.0, %v5498_v42 }
 0x128   :  { %684 = vrot.lane.b32.xlu0 %v5494_v37, %s5816_s5  ;;  %5499 = vrcp.f32 %v663_v41 }
 0x129   :  { %5501 = vrcp.f32 %v662_v43 }
 0x132   :  { %v5500_v44 = vpop.eup %5499 }
 0x133   :  { %v5502_v47 = vpop.eup %5501 }
 0x194   :  { %v677_v50 = vpop.permute.xlu1 %676 }
 0x195   :  { %v681_v51 = vmul.f32 %v5500_v44, %v677_v50 }
 0x196   :  { %v687_v45 = vpop.permute.xlu0 %686 }
 0x197   :  { %v691_v46 = vmul.f32 %v5500_v44, %v687_v45 }
 0x198   :  { %v675_v52 = vpop.permute.xlu1 %674 }
 0x199   :  { %696 = vrot.lane.b32.xlu0 %v691_v46, %s5815_s0  ;;  %v680_v55 = vmul.f32 %v5502_v47, %v675_v52 }
 0x19a   :  { %v685_v48 = vpop.permute.xlu0 %684 }
 0x19b   :  { %v690_v49 = vmul.f32 %v5502_v47, %v685_v48 }
 0x19d   :  { %694 = vrot.lane.b32.xlu1 %v690_v49, %s5815_s0 }
 0x20b   :  { %v697_v53 = vpop.permute.xlu0 %696 }
 0x20c   :  { %v6042_v54 = vadd.f32 %v697_v53, %v681_v51 }
 0x20e   :  { %5503 = vtanh.f32 %v6042_v54 }
 0x20f   :  { %v695_v56 = vpop.permute.xlu1 %694 }
 0x210   :  { %v6045_v57 = vadd.f32 %v695_v56, %v680_v55 }
 0x212   :  { %5505 = vtanh.f32 %v6045_v57 }
 0x213   :  { %5507 = vpow2.f32 %v576_v19 }
 0x214   :  { %5509 = vpow2.f32 %v574_v20 }
 0x218   :  { %v5504_v0 = vpop.eup %5503 }
 0x219   :  { %708 = vrot.lane.b32.xlu0 %v5504_v0, %s5820_s9 }
 0x21c   :  { %v5506_v1 = vpop.eup %5505 }
 0x21d   :  { %706 = vrot.lane.b32.xlu1 %v5506_v1, %s5820_s9  ;;  %v5508_v21 = vpop.eup %5507 }
 0x21e   :  { %v5510_v22 = vpop.eup %5509  ;;  %v3116_v23 = vrot.slane %v5508_v21, 7  ;;  %v3418_v28 = vrot.slane %v5508_v21, 1  ;;  %v3567_v33 = vrot.slane %v5508_v21, 2  ;;  %v3716_v36 = vrot.slane %v5508_v21, 3 }
 0x21f   :  { %v3269_v25 = vrot.slane %v5510_v22, 1  ;;  %v3417_v27 = vrot.slane %v5510_v22, 2  ;;  %v3566_v30 = vrot.slane %v5510_v22, 3  ;;  %v3715_v35 = vrot.slane %v5510_v22, 4 }
 0x220   :  { %v6077_v24 = vsel %vm726_vm2, %v3116_v23, %v5510_v22  ;;  %v3864_v37 = vrot.slane %v5510_v22, 5  ;;  %v3865_v39 = vrot.slane %v5508_v21, 4  ;;  %v4013_v40 = vrot.slane %v5510_v22, 6 }
 0x221   :  { %v6080_v26 = vsel %vm726_vm2, %v5508_v21, %v3269_v25  ;;  %v6083_v38 = vsel %vm726_vm2, %v3418_v28, %v3417_v27  ;;  %v4014_v41 = vrot.slane %v5508_v21, 5  ;;  %v6086_v42 = vsel %vm726_vm2, %v3567_v33, %v3566_v30  ;;  %v578_v25 = vld [vmem:[%s5901_s30] sm:$0xff]  ;;  %s6987_s30 = sld [smem:[#allocation14_spill]] }
 0x222   :  { %v6089_v43 = vsel %vm726_vm2, %v3716_v36, %v3715_v35  ;;  %v4162_v45 = vrot.slane %v5508_v21, 6  ;;  %v6092_v46 = vsel %vm726_vm2, %v3865_v39, %v3864_v37  ;;  %4973 = vmatprep.subr.mxu1 %v578_v25 }
 0x223   :  { %4974 = vmatpush3.msra.mxu1 %v578_v25 }
 0x224   :  { %4976 = vmatmul.mubr.msk.f32.vlgmr.msra.gmra.mrb[4].mxu1 %vm134_vm0, %v5999_v5  ;;  %5143 = vmatprep.subr.bf16.mxu1 %v5817_v62 }
 0x225   :  { %5145 = vmatpush3.bf16.msra.mxu1 %v6051_v61  ;;  %4989 = vmatprep.mubr.msk.f32.mxu1 %vm5818_vm1, %v5819_v63 }
 0x226   :  { %5149 = vmatprep.subr.bf16.mxu1 %v5817_v62 }
 0x28b   :  { %v709_v2 = vpop.permute.xlu0 %708 }
 0x28c   :  { %v6062_v3 = vmul.f32 %v5500_v44, %v709_v2  ;;  %v4161_v44 = vrot.slane %v5510_v22, 7 }
 0x28e   :  { %v725_v6 = vrot.slane %v6062_v3, 7  ;;  %v6098_v48 = vsel %vm726_vm2, %v4162_v45, %v4161_v44 }
 0x28f   :  { %v707_v4 = vpop.permute.xlu1 %706 }
 0x290   :  { %v6065_v7 = vmul.f32 %v5502_v47, %v707_v4  ;;  %v6095_v47 = vsel %vm726_vm2, %v4014_v41, %v4013_v40 }
 0x292   :  { %v727_v8 = vsel %vm726_vm2, %v725_v6, %v6065_v7 }
 0x293   :  { %728 = vrot.lane.b32.xlu0 %v727_v8, %s5821_s13 }
 0x2f7   :  { %v4977_v36 = vpop.f32.mrb[4].mxu1 }
 0x2f8   :  { %v645_v37 = vpop.f32.mrb[5].mxu1  ;;  %v3258_v44 = vrot.slane %v4977_v36, 6 }
 0x2f9   :  { %v4150_v40 = vrot.slane %v645_v37, 1  ;;  %v3257_v41 = vrot.slane %v645_v37, 7  ;;  %v3405_v45 = vrot.slane %v645_v37, 6 }
 0x305   :  { %v729_v11 = vpop.permute.xlu0 %728 }
 0x306   :  { %4983 = vmatmul.mubr.msk.f32.vlgmr.msra.gmra.mrb[4].mxu0 %vm730_vm3, %v729_v11 }
 0x307   :  { %5148 = vmatpush3.bf16.msra.mxu0 %v6051_v61  ;;  %4996 = vmatprep.mubr.msk.f32.mxu0 %vm5818_vm1, %v5819_v63 }
 0x308   :  { %5152 = vmatprep.subr.bf16.mxu0 %v5817_v62 }
 0x3d9   :  { %v799_v49 = vpop.f32.mrb[4].mxu0 }
 0x3da   :  { %v804_v50 = vrot.slane %v799_v49, 7  ;;  %v808_v51 = vadd.f32 %v799_v49, %v6022_v29  ;;  %v4984_v52 = vpop.f32.mrb[5].mxu0  ;;  %v3406_v49 = vrot.slane %v4977_v36, 5 }
 0x3db   :  { %v3703_v52 = vrot.slane %v645_v37, 4 }
 0x3dc   :  { %v807_v53 = vadd.f32 %v804_v50, %v6024_v31  ;;  %5511 = vtanh.f32 %v808_v51  ;;  %v4430_v60 = vmul.f32 -1.442695, %v808_v51  ;;  %v3554_v50 = vrot.slane %v645_v37, 5 }
 0x3dd   :  { %v3555_v51 = vrot.slane %v4977_v36, 4 }
 0x3de   :  { %5513 = vtanh.f32 %v807_v53  ;;  %v4429_v0 = vmul.f32 -1.442695, %v807_v53  ;;  %v3704_v53 = vrot.slane %v4977_v36, 3 }
 0x3df   :  { %5515 = vpow2.f32 %v4430_v60  ;;  %v6154_v60 = vsel %vm726_vm2, %v3555_v51, %v3554_v50 }
 0x3e0   :  { %5517 = vpow2.f32 %v4429_v0  ;;  %v6157_v0 = vsel %vm726_vm2, %v3704_v53, %v3703_v52 }
 0x3e6   :  { %v5512_v55 = vpop.eup %5511 }
 0x3e7   :  { %847 = vrot.lane.b32.xlu0 %v5512_v55, %s5816_s5  ;;  %v6148_v55 = vsel %vm726_vm2, %v3258_v44, %v3257_v41 }
 0x3e8   :  { %v5514_v56 = vpop.eup %5513 }
 0x3e9   :  { %845 = vrot.lane.b32.xlu1 %v5514_v56, %s5816_s5  ;;  %v5516_v1 = vpop.eup %5515  ;;  %v6151_v56 = vsel %vm726_vm2, %v3406_v49, %v3405_v45 }
 0x3ea   :  { %v5518_v2 = vpop.eup %5517  ;;  %v816_v4 = vadd.f32 1.0, %v5516_v1  ;;  %v4001_v1 = vrot.slane %v645_v37, 2 }
 0x3eb   :  { %829 = vrot.lane.b32.xlu0 %v826_v58, %s5815_s0  ;;  %v815_v6 = vadd.f32 1.0, %v5518_v2  ;;  %v3852_v58 = vrot.slane %v645_v37, 3  ;;  %v4002_v2 = vrot.slane %v4977_v36, 1 }
 0x3ec   :  { %5519 = vrcp.f32 %v816_v4 }
 0x3ed   :  { %827 = vrot.lane.b32.xlu1 %v825_v59, %s5815_s0  ;;  %5521 = vrcp.f32 %v815_v6  ;;  %v3853_v59 = vrot.slane %v4977_v36, 2  ;;  %v6163_v6 = vsel %vm726_vm2, %v4977_v36, %v4150_v40 }
 0x3ef   :  { %v6160_v4 = vsel %vm726_vm2, %v3853_v59, %v3852_v58 }
 0x3f6   :  { %v5520_v8 = vpop.eup %5519 }
 0x3f7   :  { %v5522_v10 = vpop.eup %5521 }
 0x459   :  { %v848_v32 = vpop.permute.xlu0 %847 }
 0x45a   :  { %v852_v9 = vmul.f32 %v5520_v8, %v848_v32 }
 0x45b   :  { %v846_v11 = vpop.permute.xlu1 %845 }
 0x45c   :  { %857 = vrot.lane.b32.xlu0 %v852_v9, %s5815_s0  ;;  %v851_v34 = vmul.f32 %v5522_v10, %v846_v11 }
 0x45d   :  { %v6110_v12 = vpop.permute.xlu0 %829 }
 0x45e   :  { %855 = vrot.lane.b32.xlu1 %v851_v34, %s5815_s0  ;;  %v834_v14 = vmul.f32 %v6110_v12, %v6042_v54 }
 0x45f   :  { %v6112_v13 = vpop.permute.xlu1 %827 }
 0x460   :  { %v833_v15 = vmul.f32 %v6112_v13, %v6045_v57  ;;  %v838_v16 = vrot.slane %v834_v14, 7 }
 0x462   :  { %v837_v17 = vrot.slane %v833_v15, 7  ;;  %v842_v18 = vmul.f32 %v5520_v8, %v838_v16 }
 0x464   :  { %v841_v21 = vmul.f32 %v5522_v10, %v837_v17 }
 0x4ce   :  { %v858_v19 = vpop.permute.xlu0 %857 }
 0x4cf   :  { %v6118_v20 = vadd.f32 %v858_v19, %v842_v18 }
 0x4d0   :  { %v856_v22 = vpop.permute.xlu1 %855 }
 0x4d1   :  { %5523 = vtanh.f32 %v6118_v20  ;;  %v6121_v23 = vadd.f32 %v856_v22, %v841_v21  ;;  %v984_v37 = vmul.f32 %v6118_v20, %v6110_v12 }
 0x4d3   :  { %5525 = vtanh.f32 %v6121_v23  ;;  %v983_v36 = vmul.f32 %v6121_v23, %v6112_v13  ;;  %v988_v40 = vrot.slane %v984_v37, 7 }
 0x4db   :  { %v5524_v54 = vpop.eup %5523 }
 0x4dc   :  { %869 = vrot.lane.b32.xlu0 %v5524_v54, %s5820_s9 }
 0x4dd   :  { %v5526_v57 = vpop.eup %5525 }
 0x4de   :  { %867 = vrot.lane.b32.xlu1 %v5526_v57, %s5820_s9 }
 0x54e   :  { %v870_v27 = vpop.permute.xlu0 %869 }
 0x54f   :  { %v6136_v5 = vmul.f32 %v5520_v8, %v870_v27  ;;  %v6166_v8 = vsel %vm726_vm2, %v4002_v2, %v4001_v1 }
 0x550   :  { %v868_v28 = vpop.permute.xlu1 %867 }
 0x551   :  { %v6134_v30 = vmul.f32 %v5522_v10, %v868_v28 }
 0x553   :  { %v886_v33 = vrot.slane %v6134_v30, 1 }
 0x555   :  { %v887_v35 = vsel %vm726_vm2, %v6136_v5, %v886_v33 }
 0x556   :  { %888 = vrot.lane.b32.xlu1 %v887_v35, %s5821_s13 }
 0x5c8   :  { %v889_v39 = vpop.permute.xlu1 %888 }
 0x5c9   :  { %4990 = vmatmul.mubr.msk.f32.vlgmr.msra.gmra.mrb[6].mxu1 %vm730_vm3, %v889_v39  ;;  %v987_v39 = vrot.slane %v983_v36, 7 }
 0x5ca   :  { %5151 = vmatpush3.bf16.msra.mxu1 %v6051_v61  ;;  %5003 = vmatprep.mubr.msk.f32.mxu1 %vm5818_vm1, %v5819_v63 }
 0x5cb   :  { %5155 = vmatprep.subr.bf16.mxu1 %v5817_v62 }
 0x69c   :  { %v958_v32 = vpop.f32.mrb[6].mxu1 }
 0x69d   :  { %v963_v9 = vrot.slane %v958_v32, 6  ;;  %v964_v10 = vrot.slane %v958_v32, 7  ;;  %v4991_v11 = vpop.f32.mrb[7].mxu1 }
 0x69f   :  { %v967_v34 = vadd.f32 %v963_v9, %v6024_v31  ;;  %v968_v14 = vadd.f32 %v964_v10, %v6022_v29 }
 0x6a1   :  { %5527 = vtanh.f32 %v967_v34  ;;  %v4432_v17 = vmul.f32 -1.442695, %v967_v34  ;;  %v4433_v18 = vmul.f32 -1.442695, %v968_v14 }
 0x6a2   :  { %5529 = vtanh.f32 %v968_v14 }
 0x6a3   :  { %5531 = vpow2.f32 %v4432_v17 }
 0x6a4   :  { %5533 = vpow2.f32 %v4433_v18 }
 0x6ab   :  { %v5528_v15 = vpop.eup %5527 }
 0x6ac   :  { %v5530_v16 = vpop.eup %5529  ;;  %995 = vrot.lane.b32.xlu0 %v5528_v15, %s5816_s5 }
 0x6ad   :  { %997 = vrot.lane.b32.xlu1 %v5530_v16, %s5816_s5  ;;  %v5532_v19 = vpop.eup %5531 }
 0x6ae   :  { %v5534_v21 = vpop.eup %5533  ;;  %v975_v22 = vadd.f32 1.0, %v5532_v19 }
 0x6af   :  { %v976_v25 = vadd.f32 1.0, %v5534_v21 }
 0x6b0   :  { %5535 = vrcp.f32 %v975_v22 }
 0x6b1   :  { %5537 = vrcp.f32 %v976_v25 }
 0x6ba   :  { %v5536_v54 = vpop.eup %5535 }
 0x6bb   :  { %v5538_v27 = vpop.eup %5537  ;;  %v991_v41 = vmul.f32 %v5536_v54, %v987_v39 }
 0x6bc   :  { %v992_v44 = vmul.f32 %v5538_v27, %v988_v40 }
 0x71e   :  { %v996_v57 = vpop.permute.xlu0 %995 }
 0x71f   :  { %v998_v28 = vpop.permute.xlu1 %997  ;;  %v1001_v33 = vmul.f32 %v5536_v54, %v996_v57 }
 0x720   :  { %v1002_v35 = vmul.f32 %v5538_v27, %v998_v28 }
 0x721   :  { %1005 = vrot.lane.b32.xlu0 %v1001_v33, %s5815_s0 }
 0x722   :  { %1007 = vrot.lane.b32.xlu1 %v1002_v35, %s5815_s0 }
 0x793   :  { %v1006_v45 = vpop.permute.xlu0 %1005 }
 0x794   :  { %v1008_v49 = vpop.permute.xlu1 %1007  ;;  %v1011_v50 = vadd.f32 %v1006_v45, %v991_v41 }
 0x795   :  { %v1012_v51 = vadd.f32 %v1008_v49, %v992_v44 }
 0x796   :  { %5539 = vtanh.f32 %v1011_v50  ;;  %v1134_v39 = vmul.f32 %v1011_v50, %v6112_v13 }
 0x797   :  { %5541 = vtanh.f32 %v1012_v51  ;;  %v1135_v40 = vmul.f32 %v1012_v51, %v6110_v12 }
 0x798   :  { %v1138_v41 = vrot.slane %v1134_v39, 7 }
 0x799   :  { %v1139_v44 = vrot.slane %v1135_v40, 7 }
 0x7a0   :  { %v5540_v52 = vpop.eup %5539 }
 0x7a1   :  { %v5542_v53 = vpop.eup %5541  ;;  %1017 = vrot.lane.b32.xlu0 %v5540_v52, %s5820_s9 }
 0x7a2   :  { %1019 = vrot.lane.b32.xlu1 %v5542_v53, %s5820_s9 }
 0x813   :  { %v1018_v23 = vpop.permute.xlu0 %1017 }
 0x814   :  { %v1020_v58 = vpop.permute.xlu1 %1019  ;;  %v6180_v59 = vmul.f32 %v5536_v54, %v1018_v23 }
 0x815   :  { %v6182_v20 = vmul.f32 %v5538_v27, %v1020_v58 }
 0x816   :  { %v1036_v1 = vrot.slane %v6180_v59, 2 }
 0x817   :  { %v1037_v2 = vrot.slane %v6182_v20, 1 }
 0x819   :  { %v1038_v32 = vsel %vm726_vm2, %v1037_v2, %v1036_v1 }
 0x81a   :  { %1039 = vrot.lane.b32.xlu0 %v1038_v32, %s5821_s13 }
 0x88c   :  { %v1040_v9 = vpop.permute.xlu0 %1039 }
 0x88d   :  { %4997 = vmatmul.mubr.msk.f32.vlgmr.msra.gmra.mrb[6].mxu0 %vm730_vm3, %v1040_v9 }
 0x88e   :  { %5154 = vmatpush3.bf16.msra.mxu0 %v6051_v61  ;;  %5010 = vmatprep.mubr.msk.f32.mxu0 %vm5818_vm1, %v5819_v63 }
 0x88f   :  { %5158 = vmatprep.subr.bf16.mxu0 %v5817_v62 }
 0x960   :  { %v1109_v10 = vpop.f32.mrb[6].mxu0 }
 0x961   :  { %v1114_v11 = vrot.slane %v1109_v10, 5  ;;  %v1115_v34 = vrot.slane %v1109_v10, 6  ;;  %v4998_v14 = vpop.f32.mrb[7].mxu0 }
 0x963   :  { %v1118_v15 = vadd.f32 %v1114_v11, %v6024_v31  ;;  %v1119_v16 = vadd.f32 %v1115_v34, %v6022_v29 }
 0x965   :  { %5543 = vtanh.f32 %v1118_v15  ;;  %v4435_v19 = vmul.f32 -1.442695, %v1118_v15  ;;  %v4436_v21 = vmul.f32 -1.442695, %v1119_v16 }
 0x966   :  { %5545 = vtanh.f32 %v1119_v16 }
 0x967   :  { %5547 = vpow2.f32 %v4435_v19 }
 0x968   :  { %5549 = vpow2.f32 %v4436_v21 }
 0x96f   :  { %v5544_v17 = vpop.eup %5543 }
 0x970   :  { %v5546_v18 = vpop.eup %5545  ;;  %1146 = vrot.lane.b32.xlu1 %v5544_v17, %s5816_s5 }
 0x971   :  { %1148 = vrot.lane.b32.xlu0 %v5546_v18, %s5816_s5  ;;  %v5548_v22 = vpop.eup %5547 }
 0x972   :  { %v5550_v25 = vpop.eup %5549  ;;  %v1126_v54 = vadd.f32 1.0, %v5548_v22 }
 0x973   :  { %v1127_v57 = vadd.f32 1.0, %v5550_v25 }
 0x974   :  { %5551 = vrcp.f32 %v1126_v54 }
 0x975   :  { %5553 = vrcp.f32 %v1127_v57 }
 0x97e   :  { %v5552_v27 = vpop.eup %5551 }
 0x97f   :  { %v5554_v33 = vpop.eup %5553  ;;  %v1142_v45 = vmul.f32 %v5552_v27, %v1138_v41 }
 0x980   :  { %v1143_v49 = vmul.f32 %v5554_v33, %v1139_v44 }
 0x9e2   :  { %v1147_v28 = vpop.permute.xlu1 %1146 }
 0x9e3   :  { %v1149_v35 = vpop.permute.xlu0 %1148  ;;  %v1152_v36 = vmul.f32 %v5552_v27, %v1147_v28 }
 0x9e4   :  { %v1153_v37 = vmul.f32 %v5554_v33, %v1149_v35 }
 0x9e5   :  { %1156 = vrot.lane.b32.xlu1 %v1152_v36, %s5815_s0 }
 0x9e6   :  { %1158 = vrot.lane.b32.xlu0 %v1153_v37, %s5815_s0 }
 0xa57   :  { %v1157_v52 = vpop.permute.xlu1 %1156 }
 0xa58   :  { %v1159_v53 = vpop.permute.xlu0 %1158  ;;  %v1162_v23 = vadd.f32 %v1157_v52, %v1142_v45 }
 0xa59   :  { %v1163_v58 = vadd.f32 %v1159_v53, %v1143_v49 }
 0xa5a   :  { %5555 = vtanh.f32 %v1162_v23  ;;  %v1285_v45 = vmul.f32 %v1162_v23, %v6112_v13 }
 0xa5b   :  { %5557 = vtanh.f32 %v1163_v58  ;;  %v1286_v49 = vmul.f32 %v1163_v58, %v6110_v12 }
 0xa5c   :  { %v1289_v52 = vrot.slane %v1285_v45, 7 }
 0xa5d   :  { %v1290_v53 = vrot.slane %v1286_v49, 7 }
 0xa64   :  { %v5556_v1 = vpop.eup %5555 }
 0xa65   :  { %v5558_v2 = vpop.eup %5557  ;;  %1168 = vrot.lane.b32.xlu1 %v5556_v1, %s5820_s9 }
 0xa66   :  { %1170 = vrot.lane.b32.xlu0 %v5558_v2, %s5820_s9 }
 0xad7   :  { %v1169_v32 = vpop.permute.xlu1 %1168 }
 0xad8   :  { %v1171_v50 = vpop.permute.xlu0 %1170  ;;  %v6203_v9 = vmul.f32 %v5552_v27, %v1169_v32 }
 0xad9   :  { %v6205_v51 = vmul.f32 %v5554_v33, %v1171_v50 }
 0xada   :  { %v1187_v10 = vrot.slane %v6203_v9, 3 }
 0xadb   :  { %v1188_v11 = vrot.slane %v6205_v51, 2 }
 0xadd   :  { %v1189_v34 = vsel %vm726_vm2, %v1188_v11, %v1187_v10 }
 0xade   :  { %1190 = vrot.lane.b32.xlu1 %v1189_v34, %s5821_s13 }
 0xb50   :  { %v1191_v14 = vpop.permute.xlu1 %1190 }
 0xb51   :  { %5004 = vmatmul.mubr.msk.f32.vlgmr.msra.gmra.mrb[8].mxu1 %vm730_vm3, %v1191_v14 }
 0xb52   :  { %5157 = vmatpush3.bf16.msra.mxu1 %v6051_v61  ;;  %5017 = vmatprep.mubr.msk.f32.mxu1 %vm5818_vm1, %v5819_v63 }
 0xb53   :  { %5161 = vmatprep.subr.bf16.mxu1 %v5817_v62 }
 0xc24   :  { %v1260_v15 = vpop.f32.mrb[8].mxu1 }
 0xc25   :  { %v1265_v16 = vrot.slane %v1260_v15, 4  ;;  %v1266_v17 = vrot.slane %v1260_v15, 5  ;;  %v5005_v18 = vpop.f32.mrb[9].mxu1 }
 0xc27   :  { %v1269_v19 = vadd.f32 %v1265_v16, %v6024_v31  ;;  %v1270_v21 = vadd.f32 %v1266_v17, %v6022_v29 }
 0xc29   :  { %5559 = vtanh.f32 %v1269_v19  ;;  %v4438_v54 = vmul.f32 -1.442695, %v1269_v19  ;;  %v4439_v57 = vmul.f32 -1.442695, %v1270_v21 }
 0xc2a   :  { %5561 = vtanh.f32 %v1270_v21 }
 0xc2b   :  { %5563 = vpow2.f32 %v4438_v54 }
 0xc2c   :  { %5565 = vpow2.f32 %v4439_v57 }
 0xc33   :  { %v5560_v22 = vpop.eup %5559 }
 0xc34   :  { %v5562_v25 = vpop.eup %5561  ;;  %1297 = vrot.lane.b32.xlu0 %v5560_v22, %s5816_s5 }
 0xc35   :  { %1299 = vrot.lane.b32.xlu1 %v5562_v25, %s5816_s5  ;;  %v5564_v27 = vpop.eup %5563 }
 0xc36   :  { %v5566_v28 = vpop.eup %5565  ;;  %v1277_v33 = vadd.f32 1.0, %v5564_v27 }
 0xc37   :  { %v1278_v35 = vadd.f32 1.0, %v5566_v28 }
 0xc38   :  { %5567 = vrcp.f32 %v1277_v33 }
 0xc39   :  { %5569 = vrcp.f32 %v1278_v35 }
 0xc42   :  { %v5568_v36 = vpop.eup %5567 }
 0xc43   :  { %v5570_v39 = vpop.eup %5569  ;;  %v1293_v1 = vmul.f32 %v5568_v36, %v1289_v52 }
 0xc44   :  { %v1294_v2 = vmul.f32 %v5570_v39, %v1290_v53 }
 0xca6   :  { %v1298_v37 = vpop.permute.xlu0 %1297 }
 0xca7   :  { %v1300_v40 = vpop.permute.xlu1 %1299  ;;  %v1303_v41 = vmul.f32 %v5568_v36, %v1298_v37 }
 0xca8   :  { %v1304_v44 = vmul.f32 %v5570_v39, %v1300_v40 }
 0xca9   :  { %1307 = vrot.lane.b32.xlu0 %v1303_v41, %s5815_s0 }
 0xcaa   :  { %1309 = vrot.lane.b32.xlu1 %v1304_v44, %s5815_s0 }
 0xd1b   :  { %v1308_v32 = vpop.permute.xlu0 %1307 }
 0xd1c   :  { %v1310_v50 = vpop.permute.xlu1 %1309  ;;  %v1313_v10 = vadd.f32 %v1308_v32, %v1293_v1 }
 0xd1d   :  { %v1314_v11 = vadd.f32 %v1310_v50, %v1294_v2 }
 0xd1e   :  { %5571 = vtanh.f32 %v1313_v10  ;;  %v1436_v2 = vmul.f32 %v1313_v10, %v6112_v13 }
 0xd1f   :  { %5573 = vtanh.f32 %v1314_v11  ;;  %v1437_v32 = vmul.f32 %v1314_v11, %v6110_v12 }
 0xd20   :  { %v1440_v50 = vrot.slane %v1436_v2, 7 }
 0xd28   :  { %v5572_v34 = vpop.eup %5571 }
 0xd29   :  { %v5574_v14 = vpop.eup %5573  ;;  %1319 = vrot.lane.b32.xlu0 %v5572_v34, %s5820_s9  ;;  %v1441_v34 = vrot.slane %v1437_v32, 7 }
 0xd2a   :  { %1321 = vrot.lane.b32.xlu1 %v5574_v14, %s5820_s9 }
 0xd9b   :  { %v1320_v15 = vpop.permute.xlu0 %1319 }
 0xd9c   :  { %v1322_v23 = vpop.permute.xlu1 %1321  ;;  %v6226_v16 = vmul.f32 %v5568_v36, %v1320_v15 }
 0xd9d   :  { %v6228_v58 = vmul.f32 %v5570_v39, %v1322_v23 }
 0xd9e   :  { %v1338_v17 = vrot.slane %v6226_v16, 4 }
 0xd9f   :  { %v1339_v18 = vrot.slane %v6228_v58, 3 }
 0xda1   :  { %v1340_v19 = vsel %vm726_vm2, %v1339_v18, %v1338_v17 }
 0xda2   :  { %1341 = vrot.lane.b32.xlu0 %v1340_v19, %s5821_s13 }
 0xe14   :  { %v1342_v21 = vpop.permute.xlu0 %1341 }
 0xe15   :  { %5011 = vmatmul.mubr.msk.f32.vlgmr.msra.gmra.mrb[8].mxu0 %vm730_vm3, %v1342_v21 }
 0xe16   :  { %5160 = vmatpush3.bf16.msra.mxu0 %v6051_v61  ;;  %5024 = vmatprep.mubr.msk.f32.mxu0 %vm5818_vm1, %v5819_v63 }
 0xe17   :  { %5164 = vmatprep.subr.bf16.mxu0 %v5817_v62 }
 0xee8   :  { %v1411_v22 = vpop.f32.mrb[8].mxu0 }
 0xee9   :  { %v1416_v25 = vrot.slane %v1411_v22, 3  ;;  %v1417_v54 = vrot.slane %v1411_v22, 4  ;;  %v5012_v57 = vpop.f32.mrb[9].mxu0 }
 0xeeb   :  { %v1420_v27 = vadd.f32 %v1416_v25, %v6024_v31  ;;  %v1421_v28 = vadd.f32 %v1417_v54, %v6022_v29 }
 0xeed   :  { %5575 = vtanh.f32 %v1420_v27  ;;  %v4441_v61 = vmul.f32 -1.442695, %v1420_v27  ;;  %v4442_v36 = vmul.f32 -1.442695, %v1421_v28 }
 0xeee   :  { %5577 = vtanh.f32 %v1421_v28 }
 0xeef   :  { %5579 = vpow2.f32 %v4441_v61 }
 0xef0   :  { %5581 = vpow2.f32 %v4442_v36 }
 0xef7   :  { %v5576_v33 = vpop.eup %5575 }
 0xef8   :  { %v5578_v35 = vpop.eup %5577  ;;  %1448 = vrot.lane.b32.xlu1 %v5576_v33, %s5816_s5 }
 0xef9   :  { %1450 = vrot.lane.b32.xlu0 %v5578_v35, %s5816_s5  ;;  %v5580_v37 = vpop.eup %5579 }
 0xefa   :  { %v5582_v39 = vpop.eup %5581  ;;  %v1428_v40 = vadd.f32 1.0, %v5580_v37 }
 0xefb   :  { %v1429_v41 = vadd.f32 1.0, %v5582_v39 }
 0xefc   :  { %5583 = vrcp.f32 %v1428_v40 }
 0xefd   :  { %5585 = vrcp.f32 %v1429_v41 }
 0xf06   :  { %v5584_v44 = vpop.eup %5583 }
 0xf07   :  { %v5586_v49 = vpop.eup %5585  ;;  %v1444_v14 = vmul.f32 %v5584_v44, %v1440_v50 }
 0xf08   :  { %v1445_v15 = vmul.f32 %v5586_v49, %v1441_v34 }
 0xf6a   :  { %v1449_v45 = vpop.permute.xlu1 %1448 }
 0xf6b   :  { %v1451_v52 = vpop.permute.xlu0 %1450  ;;  %v1454_v53 = vmul.f32 %v5584_v44, %v1449_v45 }
 0xf6c   :  { %v1455_v1 = vmul.f32 %v5586_v49, %v1451_v52 }
 0xf6d   :  { %1458 = vrot.lane.b32.xlu1 %v1454_v53, %s5815_s0 }
 0xf6e   :  { %1460 = vrot.lane.b32.xlu0 %v1455_v1, %s5815_s0 }
 0xfdf   :  { %v1459_v23 = vpop.permute.xlu1 %1458 }
 0xfe0   :  { %v1461_v17 = vpop.permute.xlu0 %1460  ;;  %v1464_v18 = vadd.f32 %v1459_v23, %v1444_v14 }
 0xfe1   :  { %v1465_v19 = vadd.f32 %v1461_v17, %v1445_v15 }
 0xfe2   :  { %5587 = vtanh.f32 %v1464_v18  ;;  %v1587_v17 = vmul.f32 %v1464_v18, %v6112_v13 }
 0xfe3   :  { %5589 = vtanh.f32 %v1465_v19 }
 0xfec   :  { %v5588_v21 = vpop.eup %5587 }
 0xfed   :  { %v5590_v22 = vpop.eup %5589  ;;  %1470 = vrot.lane.b32.xlu1 %v5588_v21, %s5820_s9  ;;  %v1588_v21 = vmul.f32 %v1465_v19, %v6110_v12 }
 0xfee   :  { %1472 = vrot.lane.b32.xlu0 %v5590_v22, %s5820_s9  ;;  %v1591_v22 = vrot.slane %v1587_v17, 7 }
0x105f   :  { %v1471_v25 = vpop.permute.xlu1 %1470 }
0x1060   :  { %v1473_v10 = vpop.permute.xlu0 %1472  ;;  %v6249_v54 = vmul.f32 %v5584_v44, %v1471_v25  ;;  %v1592_v25 = vrot.slane %v1588_v21, 7 }
0x1061   :  { %v6251_v11 = vmul.f32 %v5586_v49, %v1473_v10 }
0x1062   :  { %v1489_v57 = vrot.slane %v6249_v54, 5 }
0x1063   :  { %v1490_v27 = vrot.slane %v6251_v11, 4 }
0x1065   :  { %v1491_v28 = vsel %vm726_vm2, %v1490_v27, %v1489_v57 }
0x1066   :  { %1492 = vrot.lane.b32.xlu1 %v1491_v28, %s5821_s13 }
0x10d8   :  { %v1493_v33 = vpop.permute.xlu1 %1492 }
0x10d9   :  { %5018 = vmatmul.mubr.msk.f32.vlgmr.msra.gmra.mrb[10].mxu1 %vm730_vm3, %v1493_v33 }
0x10da   :  { %5031 = vmatprep.mubr.msk.f32.mxu1 %vm5818_vm1, %v5819_v63 }
0x11ac   :  { %v1562_v35 = vpop.f32.mrb[10].mxu1 }
0x11ad   :  { %v1567_v61 = vrot.slane %v1562_v35, 2  ;;  %v1568_v36 = vrot.slane %v1562_v35, 3  ;;  %v5019_v37 = vpop.f32.mrb[11].mxu1 }
0x11af   :  { %v1571_v39 = vadd.f32 %v1567_v61, %v6024_v31  ;;  %v1572_v40 = vadd.f32 %v1568_v36, %v6022_v29 }
0x11b1   :  { %5591 = vtanh.f32 %v1571_v39  ;;  %v4444_v45 = vmul.f32 -1.442695, %v1571_v39  ;;  %v4445_v49 = vmul.f32 -1.442695, %v1572_v40 }
0x11b2   :  { %5593 = vtanh.f32 %v1572_v40 }
0x11b3   :  { %5595 = vpow2.f32 %v4444_v45 }
0x11b4   :  { %5597 = vpow2.f32 %v4445_v49 }
0x11bb   :  { %v5592_v41 = vpop.eup %5591 }
0x11bc   :  { %v5594_v44 = vpop.eup %5593  ;;  %1599 = vrot.lane.b32.xlu0 %v5592_v41, %s5816_s5 }
0x11bd   :  { %1601 = vrot.lane.b32.xlu1 %v5594_v44, %s5816_s5  ;;  %v5596_v52 = vpop.eup %5595 }
0x11be   :  { %v5598_v53 = vpop.eup %5597  ;;  %v1579_v1 = vadd.f32 1.0, %v5596_v52 }
0x11bf   :  { %v1580_v2 = vadd.f32 1.0, %v5598_v53 }
0x11c0   :  { %5599 = vrcp.f32 %v1579_v1 }
0x11c1   :  { %5601 = vrcp.f32 %v1580_v2 }
0x11ca   :  { %v5600_v32 = vpop.eup %5599 }
0x11cb   :  { %v5602_v34 = vpop.eup %5601  ;;  %v1595_v10 = vmul.f32 %v5600_v32, %v1591_v22 }
0x11cc   :  { %v1596_v57 = vmul.f32 %v5602_v34, %v1592_v25 }
0x122e   :  { %v1600_v50 = vpop.permute.xlu0 %1599 }
0x122f   :  { %v1602_v14 = vpop.permute.xlu1 %1601  ;;  %v1605_v15 = vmul.f32 %v5600_v32, %v1600_v50 }
0x1230   :  { %v1606_v23 = vmul.f32 %v5602_v34, %v1602_v14 }
0x1231   :  { %1609 = vrot.lane.b32.xlu0 %v1605_v15, %s5815_s0 }
0x1232   :  { %1611 = vrot.lane.b32.xlu1 %v1606_v23, %s5815_s0 }
0x12a3   :  { %v1610_v27 = vpop.permute.xlu0 %1609 }
0x12a4   :  { %v1612_v28 = vpop.permute.xlu1 %1611  ;;  %v1615_v33 = vadd.f32 %v1610_v27, %v1595_v10 }
0x12a5   :  { %v1616_v35 = vadd.f32 %v1612_v28, %v1596_v57 }
0x12a6   :  { %5603 = vtanh.f32 %v1615_v33  ;;  %v1738_v28 = vmul.f32 %v1615_v33, %v6112_v13  ;;  %v2111_v33 = vld [vmem:[%s6981_s25 + $0x80] sm:$0xff] }
0x12a7   :  { %5605 = vtanh.f32 %v1616_v35 }
0x12b0   :  { %v5604_v61 = vpop.eup %5603 }
0x12b1   :  { %v5606_v36 = vpop.eup %5605  ;;  %1621 = vrot.lane.b32.xlu0 %v5604_v61, %s5820_s9  ;;  %v1739_v61 = vmul.f32 %v1616_v35, %v6110_v12  ;;  %v1792_v12 = vld [vmem:[%s5916_s20 + $0x8] sm:$0xff] }
0x12b2   :  { %1623 = vrot.lane.b32.xlu1 %v5606_v36, %s5820_s9  ;;  %v1742_v36 = vrot.slane %v1738_v28, 7  ;;  %v2112_v35 = vld [vmem:[%s6981_s25 + $0x88] sm:$0xff] }
0x1323   :  { %v1622_v37 = vpop.permute.xlu0 %1621 }
0x1324   :  { %v1624_v18 = vpop.permute.xlu1 %1623  ;;  %v6270_v39 = vmul.f32 %v5600_v32, %v1622_v37  ;;  %v1743_v37 = vrot.slane %v1739_v61, 7  ;;  %v1969_v61 = vld [vmem:[%s6979_s17] sm:$0xff] }
0x1325   :  { %v6272_v19 = vmul.f32 %v5602_v34, %v1624_v18 }
0x1326   :  { %v1640_v40 = vrot.slane %v6270_v39, 6 }
0x1327   :  { %v1641_v41 = vrot.slane %v6272_v19, 5 }
0x1329   :  { %v1642_v44 = vsel %vm726_vm2, %v1641_v41, %v1640_v40 }
0x132a   :  { %1643 = vrot.lane.b32.xlu0 %v1642_v44, %s5821_s13 }
0x139c   :  { %v1644_v45 = vpop.permute.xlu0 %1643 }
0x139d   :  { %5025 = vmatmul.mubr.msk.f32.vlgmr.msra.gmra.mrb[10].mxu0 %vm730_vm3, %v1644_v45 }
0x139e   :  { %5038 = vmatprep.mubr.msk.f32.mxu0 %vm5818_vm1, %v5819_v63 }
0x1470   :  { %v1713_v49 = vpop.f32.mrb[10].mxu0 }
0x1471   :  { %v1718_v52 = vrot.slane %v1713_v49, 1  ;;  %v1719_v53 = vrot.slane %v1713_v49, 2  ;;  %v5026_v1 = vpop.f32.mrb[11].mxu0 }
0x1473   :  { %v1722_v2 = vadd.f32 %v1718_v52, %v6024_v31  ;;  %v1723_v32 = vadd.f32 %v1719_v53, %v6022_v29 }
0x1475   :  { %5607 = vtanh.f32 %v1722_v2  ;;  %v4447_v14 = vmul.f32 -1.442695, %v1722_v2  ;;  %v4448_v15 = vmul.f32 -1.442695, %v1723_v32 }
0x1476   :  { %5609 = vtanh.f32 %v1723_v32 }
0x1477   :  { %5611 = vpow2.f32 %v4447_v14 }
0x1478   :  { %5613 = vpow2.f32 %v4448_v15 }
0x147f   :  { %v5608_v50 = vpop.eup %5607 }
0x1480   :  { %v5610_v34 = vpop.eup %5609  ;;  %1750 = vrot.lane.b32.xlu1 %v5608_v50, %s5816_s5  ;;  %v5171_v50 = vpack.c.bf16 %v2112_v35, %v2111_v33  ;;  %v4477_v33 = vld [vmem:[%s6981_s25 + $0x1a8] sm:$0xff]  ;;  %v2115_v35 = vld [vmem:[%s6981_s25 + $0xa0] sm:$0xff] }
0x1481   :  { %1752 = vrot.lane.b32.xlu0 %v5610_v34, %s5816_s5  ;;  %v5612_v23 = vpop.eup %5611 }
0x1482   :  { %v5614_v17 = vpop.eup %5613  ;;  %v1730_v21 = vadd.f32 1.0, %v5612_v23 }
0x1483   :  { %v1731_v22 = vadd.f32 1.0, %v5614_v17 }
0x1484   :  { %5615 = vrcp.f32 %v1730_v21 }
0x1485   :  { %5617 = vrcp.f32 %v1731_v22 }
0x148e   :  { %v5616_v31 = vpop.eup %5615 }
0x148f   :  { %v5618_v25 = vpop.eup %5617  ;;  %v1746_v18 = vmul.f32 %v5616_v31, %v1742_v36  ;;  %v1971_v36 = vld [vmem:[%s6979_s17 + $0x10] sm:$0xff] }
0x1490   :  { %v1747_v40 = vmul.f32 %v5618_v25, %v1743_v37 }
0x14f2   :  { %v1751_v29 = vpop.permute.xlu1 %1750 }
0x14f3   :  { %v1753_v10 = vpop.permute.xlu0 %1752  ;;  %v1756_v57 = vmul.f32 %v5616_v31, %v1751_v29 }
0x14f4   :  { %v1757_v27 = vmul.f32 %v5618_v25, %v1753_v10 }
0x14f5   :  { %1760 = vrot.lane.b32.xlu1 %v1756_v57, %s5815_s0 }
0x14f6   :  { %1762 = vrot.lane.b32.xlu0 %v1757_v27, %s5815_s0 }
0x1567   :  { %v1761_v41 = vpop.permute.xlu1 %1760 }
0x1568   :  { %v1763_v44 = vpop.permute.xlu0 %1762  ;;  %v1766_v45 = vadd.f32 %v1761_v41, %v1746_v18  ;;  %v4472_v18 = vld [vmem:[%s6981_s25 + $0x180] sm:$0xff]  ;;  %v5169_v41 = vpack.c.bf16 %v1971_v36, %v1969_v61  ;;  %v4462_v61 = vld [vmem:[%s6981_s25 + $0x130] sm:$0xff]  ;;  %v4463_v36 = vld [vmem:[%s6981_s25 + $0x138] sm:$0xff] }
0x1569   :  { %v1767_v49 = vadd.f32 %v1763_v44, %v1747_v40  ;;  %v4473_v40 = vld [vmem:[%s6981_s25 + $0x188] sm:$0xff] }
0x156a   :  { %5619 = vtanh.f32 %v1766_v45  ;;  %v1889_v52 = vrot.slane %v1766_v45, 7  ;;  %v5203_v44 = vpack.c.bf16 %v4473_v40, %v4472_v18  ;;  %v4456_v45 = vld [vmem:[%s6981_s25 + $0x100] sm:$0xff]  ;;  %v2102_v40 = vld [vmem:[%s6981_s25 + $0x38] sm:$0xff] }
0x156b   :  { %5621 = vtanh.f32 %v1767_v49  ;;  %v1890_v53 = vrot.slane %v1767_v49, 6  ;;  %v4457_v49 = vld [vmem:[%s6981_s25 + $0x108] sm:$0xff] }
0x156d   :  { %v1891_v1 = vsel %vm726_vm2, %v1890_v53, %v1889_v52  ;;  %v2095_v52 = vld [vmem:[%s6981_s25] sm:$0xff] }
0x1574   :  { %v5620_v2 = vpop.eup %5619 }
0x1575   :  { %v5622_v32 = vpop.eup %5621  ;;  %1772 = vrot.lane.b32.xlu1 %v5620_v2, %s5820_s9  ;;  %v2096_v2 = vld [vmem:[%s6981_s25 + $0x8] sm:$0xff] }
0x1576   :  { %1774 = vrot.lane.b32.xlu0 %v5622_v32, %s5820_s9  ;;  %v4474_v32 = vld [vmem:[%s6981_s25 + $0x190] sm:$0xff] }
0x1579   :  { %716 = vrot.lane.b32.xlu1 %v6065_v7, %s5821_s13  ;;  %v1791_v7 = vld [vmem:[%s5916_s20] sm:$0xff]  ;;  %s6988_s20 = sld [smem:[#allocation24_spill]] }
0x157a   :  { %877 = vrot.lane.b32.xlu0 %v6134_v30, %s5821_s13  ;;  %v5162_v13 = vpack.c.bf16 %v1792_v12, %v1791_v7  ;;  %v1972_v30 = vld [vmem:[%s6979_s17 + $0x18] sm:$0xff]  ;;  %v2113_v12 = vld [vmem:[%s6981_s25 + $0x90] sm:$0xff] }
0x157b   :  { %v4475_v7 = vld [vmem:[%s6981_s25 + $0x198] sm:$0xff] }
0x157c   :  { %5163 = vmatpush3.bf16.msra.mxu1 %v5162_v13  ;;  %v2114_v13 = vld [vmem:[%s6981_s25 + $0x98] sm:$0xff] }
0x157d   :  { %1027 = vrot.lane.b32.xlu1 %v6180_v59, %s5821_s13  ;;  %v1878_v59 = vld [vmem:[%s6980_s21] sm:$0xff] }
0x157e   :  { %1178 = vrot.lane.b32.xlu0 %v6203_v9, %s5821_s13 }
0x1581   :  { %1329 = vrot.lane.b32.xlu1 %v6226_v16, %s5821_s13 }
0x1582   :  { %1480 = vrot.lane.b32.xlu0 %v6249_v54, %s5821_s13 }
0x1585   :  { %1631 = vrot.lane.b32.xlu1 %v6270_v39, %s5821_s13 }
0x1586   :  { %879 = vrot.lane.b32.xlu0 %v6136_v5, %s5821_s13 }
0x1589   :  { %718 = vrot.lane.b32.xlu1 %v6062_v3, %s5821_s13  ;;  %v1970_v3 = vld [vmem:[%s6979_s17 + $0x8] sm:$0xff] }
0x158a   :  { %1180 = vrot.lane.b32.xlu0 %v6205_v51, %s5821_s13  ;;  %v5167_v5 = vpack.c.bf16 %v1972_v30, %v1970_v3  ;;  %v5205_v3 = vpack.c.bf16 %v4457_v49, %v4456_v45  ;;  %v4458_v30 = vld [vmem:[%s6981_s25 + $0x110] sm:$0xff]  ;;  %v5217_v45 = vpack.c.bf16 %v4463_v36, %v4462_v61  ;;  %v4471_v61 = vld [vmem:[%s6981_s25 + $0x178] sm:$0xff] }
0x158c   :  { %5168 = vmatprep.subr.bf16.mxu1 %v5167_v5  ;;  %v5173_v5 = vpack.c.bf16 %v2096_v2, %v2095_v52 }
0x158d   :  { %1029 = vrot.lane.b32.xlu1 %v6182_v20, %s5821_s13  ;;  %v1879_v20 = vld [vmem:[%s6980_s21 + $0x8] sm:$0xff] }
0x158e   :  { %1482 = vrot.lane.b32.xlu0 %v6251_v11, %s5821_s13  ;;  %v5165_v9 = vpack.c.bf16 %v1879_v20, %v1878_v59  ;;  %v5207_v59 = vpack.c.bf16 %v4475_v7, %v4474_v32  ;;  %v4459_v20 = vld [vmem:[%s6981_s25 + $0x118] sm:$0xff]  ;;  %v2119_v32 = vld [vmem:[%s6981_s25 + $0xc0] sm:$0xff]  ;;  %v2120_v7 = vld [vmem:[%s6981_s25 + $0xc8] sm:$0xff] }
0x1590   :  { %5166 = vmatpush3.bf16.msra.mxu0 %v5165_v9  ;;  %v2097_v9 = vld [vmem:[%s6981_s25 + $0x10] sm:$0xff] }
0x1591   :  { %1331 = vrot.lane.b32.xlu1 %v6228_v58, %s5821_s13  ;;  %5172 = vmatprep.subr.bf16.mxu0 %v5171_v50  ;;  %v4460_v50 = vld [vmem:[%s6981_s25 + $0x120] sm:$0xff] }
0x1595   :  { %1633 = vrot.lane.b32.xlu1 %v6272_v19, %s5821_s13 }
0x15e7   :  { %v1773_v51 = vpop.permute.xlu1 %1772 }
0x15e8   :  { %v1775_v16 = vpop.permute.xlu0 %1774  ;;  %v1778_v58 = vmul.f32 %v5616_v31, %v1773_v51  ;;  %v2098_v51 = vld [vmem:[%s6981_s25 + $0x18] sm:$0xff] }
0x15e9   :  { %v1779_v54 = vmul.f32 %v5618_v25, %v1775_v16 }
0x15ea   :  { %v1800_v11 = vrot.slane %v1778_v58, 7  ;;  %1782 = vrot.lane.b32.xlu0 %v1778_v58, %s5821_s13 }
0x15eb   :  { %v1801_v39 = vrot.slane %v1779_v54, 6  ;;  %v717_v19 = vpop.permute.xlu1 %716 }
0x15ec   :  { %v878_v34 = vpop.permute.xlu0 %877  ;;  %723 = vst.msk [vmem:[#allocation2] sm:$0x1] %vm722_vm4, %v717_v19  ;;  %v5209_v19 = vpack.c.bf16 %v4459_v20, %v4458_v30 }
0x15ed   :  { %884 = vst.msk [vmem:[#allocation2] sm:$0x2] %vm883_vm5, %v878_v34  ;;  %v1802_v14 = vsel %vm726_vm2, %v1801_v39, %v1800_v11  ;;  %v4476_v11 = vld [vmem:[%s6981_s25 + $0x1a0] sm:$0xff]  ;;  %v2116_v39 = vld [vmem:[%s6981_s25 + $0xa8] sm:$0xff]  ;;  %v5177_v34 = vpack.c.bf16 %v2098_v51, %v2097_v9  ;;  %v4466_v9 = vld [vmem:[%s6981_s25 + $0x150] sm:$0xff] }
0x15ee   :  { %1803 = vrot.lane.b32.xlu1 %v1802_v14, %s5821_s13  ;;  %1784 = vrot.lane.b32.xlu0 %v1779_v54, %s5821_s13  ;;  %v5175_v54 = vpack.c.bf16 %v2114_v13, %v2113_v12  ;;  %v5211_v14 = vpack.c.bf16 %v4477_v33, %v4476_v11  ;;  %v5187_v12 = vpack.c.bf16 %v2120_v7, %v2119_v32  ;;  %v2103_v13 = vld [vmem:[%s6981_s25 + $0x40] sm:$0xff]  ;;  %v4467_v51 = vld [vmem:[%s6981_s25 + $0x158] sm:$0xff]  ;;  %v6965_v7 = vlaneseq }
0x15ef   :  { %v1028_v15 = vpop.permute.xlu1 %1027  ;;  %v2105_v33 = vld [vmem:[%s6981_s25 + $0x50] sm:$0xff] }
0x15f0   :  { %v1179_v23 = vpop.permute.xlu0 %1178  ;;  %1034 = vst.msk [vmem:[#allocation2] sm:$0x4] %vm1033_vm6, %v1028_v15  ;;  %v4461_v15 = vld [vmem:[%s6981_s25 + $0x128] sm:$0xff] }
0x15f1   :  { %1185 = vst.msk [vmem:[#allocation2] sm:$0x8] %vm1184_vm7, %v1179_v23  ;;  %v2099_v23 = vld [vmem:[%s6981_s25 + $0x20] sm:$0xff] }
0x15f2   :  { %1892 = vrot.lane.b32.xlu0 %v1891_v1, %s5822_s29 }
0x15f3   :  { %v1330_v17 = vpop.permute.xlu1 %1329 }
0x15f4   :  { %v1481_v21 = vpop.permute.xlu0 %1480  ;;  %1336 = vst.msk [vmem:[#allocation2] sm:$0x10] %vm1335_vm8, %v1330_v17  ;;  %v2100_v17 = vld [vmem:[%s6981_s25 + $0x28] sm:$0xff] }
0x15f5   :  { %1487 = vst.msk [vmem:[#allocation2] sm:$0x20] %vm1486_vm9, %v1481_v21 }
0x15f7   :  { %v1632_v22 = vpop.permute.xlu1 %1631 }
0x15f8   :  { %v880_v31 = vpop.permute.xlu0 %879  ;;  %1638 = vst.msk [vmem:[#allocation2] sm:$0x40] %vm1637_vm10, %v1632_v22  ;;  %v5179_v22 = vpack.c.bf16 %v2116_v39, %v2115_v35  ;;  %v2106_v35 = vld [vmem:[%s6981_s25 + $0x58] sm:$0xff] }
0x15f9   :  { %885 = vst.msk [vmem:[#allocation2 + $0x8] sm:$0x2] %vm883_vm5, %v880_v31  ;;  %v4478_v31 = vld [vmem:[%s6981_s25 + $0x1b0] sm:$0xff]  ;;  %v5193_v39 = vpack.c.bf16 %v2106_v35, %v2105_v33 }
0x15fb   :  { %v719_v29 = vpop.permute.xlu1 %718 }
0x15fc   :  { %v1181_v25 = vpop.permute.xlu0 %1180  ;;  %724 = vst.msk [vmem:[#allocation2 + $0x8] sm:$0x1] %vm722_vm4, %v719_v29  ;;  %v4479_v29 = vld [vmem:[%s6981_s25 + $0x1b8] sm:$0xff] }
0x15fd   :  { %1186 = vst.msk [vmem:[#allocation2 + $0x8] sm:$0x8] %vm1184_vm7, %v1181_v25  ;;  %v2117_v25 = vld [vmem:[%s6981_s25 + $0xb0] sm:$0xff] }
0x15ff   :  { %v1030_v10 = vpop.permute.xlu1 %1029 }
0x1600   :  { %v1483_v57 = vpop.permute.xlu0 %1482  ;;  %1035 = vst.msk [vmem:[#allocation2 + $0x8] sm:$0x4] %vm1033_vm6, %v1030_v10  ;;  %v2118_v10 = vld [vmem:[%s6981_s25 + $0xb8] sm:$0xff] }
0x1601   :  { %1488 = vst.msk [vmem:[#allocation2 + $0x8] sm:$0x20] %vm1486_vm9, %v1483_v57  ;;  %v5213_v57 = vpack.c.bf16 %v4461_v15, %v4460_v50  ;;  %v5183_v18 = vpack.c.bf16 %v2118_v10, %v2117_v25  ;;  %v4485_v50 = vld [vmem:[%s6981_s25 + $0x1e8] sm:$0xff]  ;;  %v4486_v10 = vld [vmem:[%s6981_s25 + $0x1f0] sm:$0xff] }
0x1603   :  { %v1332_v27 = vpop.permute.xlu1 %1331 }
0x1604   :  { %1337 = vst.msk [vmem:[#allocation2 + $0x8] sm:$0x10] %vm1335_vm8, %v1332_v27  ;;  %v5181_v27 = vpack.c.bf16 %v2100_v17, %v2099_v23  ;;  %v2123_v17 = vld [vmem:[%s6981_s25 + $0xe0] sm:$0xff] }
0x1607   :  { %v1634_v28 = vpop.permute.xlu1 %1633 }
0x1608   :  { %1639 = vst.msk [vmem:[#allocation2 + $0x8] sm:$0x40] %vm1637_vm10, %v1634_v28  ;;  %v5215_v28 = vpack.c.bf16 %v4479_v29, %v4478_v31  ;;  %v2107_v31 = vld [vmem:[%s6981_s25 + $0x60] sm:$0xff]  ;;  %v2108_v29 = vld [vmem:[%s6981_s25 + $0x68] sm:$0xff] }
0x1609   :  { %v5197_v25 = vpack.c.bf16 %v2108_v29, %v2107_v31  ;;  %v6471_v31 = vld [vmem:[%s6981_s25 + $0x218] sm:$0xff] }
0x165c   :  { %v1783_v37 = vpop.permute.xlu0 %1782 }
0x165d   :  { %1789 = vst.msk [vmem:[#allocation2] sm:$0x80] %vm1788_vm11, %v1783_v37  ;;  %v2101_v37 = vld [vmem:[%s6981_s25 + $0x30] sm:$0xff] }
0x165e   :  { %v5185_v49 = vpack.c.bf16 %v2102_v40, %v2101_v37  ;;  %v2125_v37 = vld [vmem:[%s6981_s25 + $0xf0] sm:$0xff] }
0x1660   :  { %v1804_v53 = vpop.permute.xlu1 %1803  ;;  %v1785_v1 = vpop.permute.xlu0 %1784 }
0x1661   :  { %1790 = vst.msk [vmem:[#allocation2 + $0x8] sm:$0x80] %vm1788_vm11, %v1785_v1  ;;  %5032 = vmatmul.mubr.msk.f32.vlgmr.msra.gmra.mrb[12].mxu1 %vm730_vm3, %v1804_v53  ;;  %v4464_v53 = vld [vmem:[%s6981_s25 + $0x140] sm:$0xff]  ;;  %v4465_v1 = vld [vmem:[%s6981_s25 + $0x148] sm:$0xff] }
0x1662   :  { %5170 = vmatpush1.bf16.msra.mxu1 %v5169_v41  ;;  %2055 = vmatprep.mubr.f32.mxu1 %v5819_v63  ;;  %v4480_v41 = vld [vmem:[%s6981_s25 + $0x1c0] sm:$0xff]  ;;  %v5221_v2 = vpack.c.bf16 %v4465_v1, %v4464_v53 }
0x1663   :  { %5204 = vmatprep.subr.bf16.mxu1 %v5203_v44  ;;  %v4481_v44 = vld [vmem:[%s6981_s25 + $0x1c8] sm:$0xff]  ;;  %v4504_v1 = vld [vmem:[%s6981_s25 + $0x280] sm:$0xff] }
0x1664   :  { %v1893_v16 = vpop.permute.xlu0 %1892  ;;  %v1967_v58 = vld [vmem:[#allocation2] sm:$0xff]  ;;  %v5219_v52 = vpack.c.bf16 %v4481_v44, %v4480_v41  ;;  %v2109_v41 = vld [vmem:[%s6981_s25 + $0x70] sm:$0xff]  ;;  %v2110_v44 = vld [vmem:[%s6981_s25 + $0x78] sm:$0xff] }
0x1665   :  { %5039 = vmatmul.mubr.msk.f32.vlgmr.msra.gmra.mrb[12].mxu0 %vm730_vm3, %v1893_v16  ;;  %4453 = vmatmul.mubr.msk.f32.vlgmr.msra.gmra.mrb[14].mxu1 %vm730_vm3, %v1967_v58  ;;  %v5225_v16 = vpack.c.bf16 %v4467_v51, %v4466_v9  ;;  %v2121_v58 = vld [vmem:[%s6981_s25 + $0xd0] sm:$0xff]  ;;  %v4451_v9 = vld [vmem:[%s6983_s8] ss:$0 sm:$0xff] }
0x1666   :  { %2061 = vmatprep.mubr.f32.mxu1 %v5819_v63  ;;  %5206 = vmatpush3.bf16.msra.mxu1 %v5205_v3  ;;  %v2104_v3 = vld [vmem:[%s6981_s25 + $0x48] sm:$0xff] }
0x1667   :  { %5174 = vmatpush3.bf16.msra.mxu0 %v5173_v5  ;;  %5208 = vmatprep.subr.bf16.mxu1 %v5207_v59  ;;  %v5189_v30 = vpack.c.bf16 %v2104_v3, %v2103_v13  ;;  %v4482_v5 = vld [vmem:[%s6981_s25 + $0x1d0] sm:$0xff]  ;;  %v4483_v59 = vld [vmem:[%s6981_s25 + $0x1d8] sm:$0xff]  ;;  %v5823_v3 = vmov 1983009808  }
0x1668   :  { %v1968_v21 = vld [vmem:[#allocation2 + $0x8] sm:$0xff]  ;;  %5176 = vmatprep.subr.bf16.mxu0 %v5175_v54  ;;  %v5223_v20 = vpack.c.bf16 %v4483_v59, %v4482_v5  ;;  %v2122_v54 = vld [vmem:[%s6981_s25 + $0xd8] sm:$0xff]  ;;  %v1973_v5 = vld [vmem:[%s6982_s3] sm:$0x3] }
0x1669   :  { %4454 = vmatmul.mubr.msk.f32.gmra.mrb[16].mxu1 %vm730_vm3, %v1968_v21  ;;  %v5191_v11 = vpack.c.bf16 %v2122_v54, %v2121_v58  ;;  %v2124_v21 = vld [vmem:[%s6981_s25 + $0xe8] sm:$0xff]  ;;  %v6437_v58 = vld [vmem:[%s6981_s25 + $0x300] sm:$0xff] }
0x166a   :  { %5210 = vmatpush3.bf16.msra.mxu1 %v5209_v19  ;;  %v4484_v19 = vld [vmem:[%s6981_s25 + $0x1e0] sm:$0xff]  ;;  %v6440_v54 = vld [vmem:[%s6981_s25 + $0x308] sm:$0xff] }
0x166b   :  { %5178 = vmatpush3.bf16.msra.mxu0 %v5177_v34  ;;  %5212 = vmatprep.subr.bf16.mxu1 %v5211_v14  ;;  %v4468_v34 = vld [vmem:[%s6981_s25 + $0x160] sm:$0xff]  ;;  %v4469_v14 = vld [vmem:[%s6981_s25 + $0x168] sm:$0xff]  ;;  %v5227_v15 = vpack.c.bf16 %v4485_v50, %v4484_v19  ;;  %v6450_v19 = vld [vmem:[%s6981_s25 + $0x390] sm:$0xff] }
0x166c   :  { %5180 = vmatprep.subr.bf16.mxu0 %v5179_v22  ;;  %v5229_v23 = vpack.c.bf16 %v4469_v14, %v4468_v34  ;;  %v5195_v22 = vpack.c.bf16 %v2124_v21, %v2123_v17  ;;  %v6453_v50 = vld [vmem:[%s6981_s25 + $0x398] sm:$0xff]  ;;  %v6456_v34 = vld [vmem:[%s6981_s25 + $0x310] sm:$0xff] }
0x166d   :  { %v6459_v14 = vld [vmem:[%s6981_s25 + $0x318] sm:$0xff] }
0x166e   :  { %5214 = vmatpush3.bf16.msra.mxu1 %v5213_v57  ;;  %v4487_v57 = vld [vmem:[%s6981_s25 + $0x1f8] sm:$0xff] }
0x166f   :  { %5182 = vmatpush3.bf16.msra.mxu0 %v5181_v27  ;;  %5216 = vmatprep.subr.bf16.mxu1 %v5215_v28  ;;  %v5231_v27 = vpack.c.bf16 %v4487_v57, %v4486_v10  ;;  %v4470_v28 = vld [vmem:[%s6981_s25 + $0x170] sm:$0xff]  ;;  %v6465_v21 = vld [vmem:[%s6981_s25 + $0x298] sm:$0xff] }
0x1670   :  { %5184 = vmatprep.subr.bf16.mxu0 %v5183_v18  ;;  %v5233_v36 = vpack.c.bf16 %v4471_v61, %v4470_v28  ;;  %v2126_v18 = vld [vmem:[%s6981_s25 + $0xf8] sm:$0xff] }
0x1671   :  { %v5199_v40 = vpack.c.bf16 %v2126_v18, %v2125_v37  ;;  %v5271_v37 = vpack.c.bf16 %v6453_v50, %v6450_v19  ;;  %v5273_v18 = vpack.c.bf16 %v6459_v14, %v6456_v34  ;;  %v4510_v19 = vld [vmem:[%s6981_s25 + $0x2b0] sm:$0xff]  ;;  %v4511_v50 = vld [vmem:[%s6981_s25 + $0x2b8] sm:$0xff]  ;;  %v4544_v14 = vld [vmem:[%s6981_s25 + $0x3c0] sm:$0xff] }
0x1672   :  { %5218 = vmatpush3.bf16.msra.mxu1 %v5217_v45  ;;  %v5201_v45 = vpack.c.bf16 %v2110_v44, %v2109_v41 }
0x1673   :  { %5186 = vmatpush3.bf16.msra.mxu0 %v5185_v49  ;;  %5220 = vmatprep.subr.bf16.mxu1 %v5219_v52  ;;  %v4536_v49 = vld [vmem:[%s6981_s25 + $0x380] sm:$0xff]  ;;  %v4537_v52 = vld [vmem:[%s6981_s25 + $0x388] sm:$0xff] }
0x1674   :  { %5188 = vmatprep.subr.bf16.mxu0 %v5187_v12  ;;  %v5267_v53 = vpack.c.bf16 %v4537_v52, %v4536_v49  ;;  %v6423_v12 = vshrl.u32 %v6965_v7, 7 }
0x1676   :  { %5222 = vmatpush3.bf16.msra.mxu1 %v5221_v2  ;;  %v4505_v2 = vld [vmem:[%s6981_s25 + $0x288] sm:$0xff]  ;;  %v6426_v13 = vsub.s32 0, %v6423_v12  ;;  %v6430_v59 = vsub.s32 1, %v6423_v12 }
0x1677   :  { %5190 = vmatpush3.bf16.msra.mxu0 %v5189_v30  ;;  %5224 = vmatprep.subr.bf16.mxu1 %v5223_v20  ;;  %v5235_v32 = vpack.c.bf16 %v4505_v2, %v4504_v1  ;;  %v2074_v30 = vunpack.c.l.s4 %v5823_v3 }
0x1678   :  { %5192 = vmatprep.subr.bf16.mxu0 %v5191_v11  ;;  %v6443_v11 = vld [vmem:[%s6981_s25 + $0x200] sm:$0xff]  ;;  %v1982_v35 = vrot.slane %v1973_v5, %v6430_v59 }
0x1679   :  { %v2075_v33 = vunpack.c.0.s8 %v2074_v30 }
0x167a   :  { %5226 = vmatpush3.bf16.msra.mxu1 %v5225_v16  ;;  %v1978_v16 = vrot.slane %v1973_v5, %v6426_v13 }
0x167b   :  { %5194 = vmatpush3.bf16.msra.mxu0 %v5193_v39  ;;  %5228 = vmatprep.subr.bf16.mxu1 %v5227_v15  ;;  %v6447_v39 = vld [vmem:[%s6981_s25 + $0x208] sm:$0xff]  ;;  %v6462_v15 = vld [vmem:[%s6981_s25 + $0x290] sm:$0xff]  ;;  %v6478_v28 = vsub.s32 %v2075_v33, %v6423_v12 }
0x167c   :  { %5196 = vmatprep.subr.bf16.mxu0 %v5195_v22  ;;  %v6468_v22 = vld [vmem:[%s6981_s25 + $0x210] sm:$0xff]  ;;  %v5239_v41 = vpack.c.bf16 %v6465_v21, %v6462_v15 }
0x167d   :  { %v5241_v44 = vpack.c.bf16 %v6471_v31, %v6468_v22  ;;  %v4513_v22 = vld [vmem:[%s6981_s25 + $0x2c8] sm:$0xff] }
0x167e   :  { %5230 = vmatpush3.bf16.msra.mxu1 %v5229_v23 }
0x167f   :  { %5198 = vmatpush3.bf16.msra.mxu0 %v5197_v25  ;;  %5232 = vmatprep.subr.bf16.mxu1 %v5231_v27  ;;  %v5269_v27 = vpack.c.bf16 %v6440_v54, %v6437_v58 }
0x1680   :  { %5200 = vmatprep.subr.bf16.mxu0 %v5199_v40 }
0x1682   :  { %5234 = vmatpush3.bf16.msra.mxu1 %v5233_v36  ;;  %v5237_v36 = vpack.c.bf16 %v6447_v39, %v6443_v11 }
0x1683   :  { %5202 = vmatpush3.bf16.msra.mxu0 %v5201_v45  ;;  %5268 = vmatprep.subr.bf16.mxu1 %v5267_v53 }
0x1684   :  { %5236 = vmatprep.subr.bf16.mxu0 %v5235_v32 }
0x1734   :  { %v6432_v20 = vpop.f32.mrb[12].mxu1 }
0x1735   :  { %v5033_v51 = vpop.f32.mrb[13].mxu1 }
0x1738   :  { %v1962_v23 = vpop.f32.mrb[12].mxu0  ;;  %v2057_v17 = vpop.f32.mrb[14].mxu1 }
0x1739   :  { %v1963_v29 = vadd.f32 %v4451_v9, %v1962_v23  ;;  %v6473_v25 = vadd.f32 %v2057_v17, %v1978_v16  ;;  %v5040_v10 = vpop.f32.mrb[13].mxu0  ;;  %v2059_v57 = vpop.f32.mrb[15].mxu1 }
0x173a   :  { %v2060_v61 = vadd.f32 %v2059_v57, %v1982_v35  ;;  %v4541_v10 = vld [vmem:[%s6981_s25 + $0x3a8] sm:$0xff] }
0x173b   :  { %5623 = vtanh.f32 %v1963_v29  ;;  %v2243_v40 = vrot.slane %v6473_v25, 1  ;;  %v2465_v53 = vrot.slane %v6473_v25, 3  ;;  %v2353_v1 = vrot.slane %v6473_v25, 2  ;;  %v4540_v29 = vld [vmem:[%s6981_s25 + $0x3a0] sm:$0xff] }
0x173c   :  { %v2063_v45 = vpop.f32.mrb[16].mxu1  ;;  %v2245_v49 = vrot.slane %v2060_v61, 1  ;;  %v2468_v52 = vrot.slane %v2060_v61, 3  ;;  %v2356_v3 = vrot.slane %v2060_v61, 2  ;;  %v2692_v30 = vrot.slane %v2060_v61, 5 }
0x173d   :  { %v2064_v2 = vadd.f32 %v2063_v45, %v1978_v16  ;;  %v2065_v32 = vpop.f32.mrb[17].mxu1  ;;  %v2580_v5 = vrot.slane %v2060_v61, 4  ;;  %v2689_v51 = vrot.slane %v6473_v25, 5  ;;  %v2577_v58 = vrot.slane %v6473_v25, 4 }
0x173e   :  { %v2066_v9 = vadd.f32 %v2065_v32, %v1982_v35  ;;  %v2072_v54 = vcombine.high %v6473_v25, %v2060_v61 }
0x173f   :  { %v2244_v11 = vsel %vm726_vm2, %v2064_v2, %v2243_v40  ;;  %v2127_v33 = vrot.slane %v2064_v2, 7  ;;  %v2466_v39 = vrot.slane %v2064_v2, 2  ;;  %v2354_v15 = vrot.slane %v2064_v2, 1 }
0x1740   :  { %v2246_v16 = vsel %vm726_vm2, %v2066_v9, %v2245_v49  ;;  %v2129_v23 = vrot.slane %v2066_v9, 7  ;;  %v2469_v17 = vrot.slane %v2066_v9, 2  ;;  %v2357_v21 = vrot.slane %v2066_v9, 1 }
0x1741   :  { %2313 = vmatprep.mubr.f32.mxu1 %v2246_v16  ;;  %v2128_v35 = vsel %vm726_vm2, %v2127_v33, %v6473_v25  ;;  %v6503_v57 = vsel %vm726_vm2, %v2466_v39, %v2465_v53  ;;  %v2693_v40 = vrot.slane %v2066_v9, 4  ;;  %v6506_v45 = vsel %vm726_vm2, %v2354_v15, %v2353_v1  ;;  %v4508_v25 = vld [vmem:[%s6981_s25 + $0x2a0] sm:$0xff]  ;;  %v4509_v53 = vld [vmem:[%s6981_s25 + $0x2a8] sm:$0xff] }
0x1742   :  { %2314 = vmatmul.mubr.f32.vlgmr.msra.gmra.mrb[18].mxu1 %v2244_v11  ;;  %v2130_v49 = vsel %vm726_vm2, %v2129_v23, %v2060_v61  ;;  %v2470_v32 = vsel %vm726_vm2, %v2469_v17, %v2468_v52  ;;  %v2358_v16 = vsel %vm726_vm2, %v2357_v21, %v2356_v3  ;;  %v2581_v7 = vrot.slane %v2066_v9, 3  ;;  %v4524_v52 = vld [vmem:[%s6981_s25 + $0x320] sm:$0xff]  ;;  %v4525_v3 = vld [vmem:[%s6981_s25 + $0x328] sm:$0xff]  ;;  %v4543_v17 = vld [vmem:[%s6981_s25 + $0x3b8] sm:$0xff] }
0x1743   :  { %5270 = vmatpush3.bf16.msra.mxu1 %v5269_v27  ;;  %2197 = vmatprep.mubr.f32.mxu0 %v2130_v49  ;;  %v6514_v33 = vsel %vm726_vm2, %v2693_v40, %v2692_v30  ;;  %v2690_v1 = vrot.slane %v2064_v2, 4  ;;  %v2578_v11 = vrot.slane %v2064_v2, 3  ;;  %v2079_v39 = vrot.slane %v2072_v54, %v6478_v28  ;;  %v4542_v30 = vld [vmem:[%s6981_s25 + $0x3b0] sm:$0xff]  ;;  %v4512_v49 = vld [vmem:[%s6981_s25 + $0x2c0] sm:$0xff] }
0x1744   :  { %2537 = vmatprep.mubr.f32.mxu1 %v2470_v32  ;;  %2198 = vmatmul.mubr.f32.vlgmr.msra.gmra.mrb[14].mxu0 %v2128_v35  ;;  %v5275_v61 = vpack.c.bf16 %v4541_v10, %v4540_v29  ;;  %v6520_v27 = vsel %vm726_vm2, %v2581_v7, %v2580_v5  ;;  %v2081_v15 = vcombine.high %v2064_v2, %v2066_v9  ;;  %v4492_v2 = vld [vmem:[%s6981_s25 + $0x220] sm:$0xff]  ;;  %v4493_v5 = vld [vmem:[%s6981_s25 + $0x228] sm:$0xff]  ;;  %v4494_v29 = vld [vmem:[%s6981_s25 + $0x230] sm:$0xff] }
0x1745   :  { %v5624_v23 = vpop.eup %5623  ;;  %5238 = vmatpush3.bf16.msra.mxu0 %v5237_v36  ;;  %2425 = vmatprep.mubr.f32.mxu0 %v2358_v16  ;;  %v6525_v54 = vsel %vm726_vm2, %v2690_v1, %v2689_v51  ;;  %v6528_v21 = vsel %vm726_vm2, %v2578_v11, %v2577_v58  ;;  %v2080_v35 = vcombine.high %v2079_v39, %v2079_v39  ;;  %v4495_v10 = vld [vmem:[%s6981_s25 + $0x238] sm:$0xff]  ;;  %v4529_v32 = vld [vmem:[%s6981_s25 + $0x348] sm:$0xff]  ;;  %v4496_v11 = vld [vmem:[%s6981_s25 + $0x240] sm:$0xff] }
0x1746   :  { %5272 = vmatprep.subr.bf16.mxu1 %v5271_v37  ;;  %5240 = vmatprep.subr.bf16.mxu0 %v5239_v41  ;;  %v3119_v7 = vmul.f32 %v5624_v23, %v6077_v24  ;;  %v5243_v36 = vpack.c.bf16 %v4509_v53, %v4508_v25  ;;  %v2088_v9 = vrot.slane %v2081_v15, %v6478_v28  ;;  %v4526_v37 = vld [vmem:[%s6981_s25 + $0x330] sm:$0xff]  ;;  %v4527_v41 = vld [vmem:[%s6981_s25 + $0x338] sm:$0xff]  ;;  %v4545_v28 = vld [vmem:[%s6981_s25 + $0x3c8] sm:$0xff] }
0x1747   :  { %5274 = vmatpush3.bf16.msra.mxu1 %v5273_v18  ;;  %v5277_v51 = vpack.c.bf16 %v4525_v3, %v4524_v52  ;;  %2092 = vst [vmem:[#allocation9] sm:$0xf] %v2080_v35  ;;  %v5279_v24 = vpack.c.bf16 %v4543_v17, %v4542_v30  ;;  %v5245_v34 = vpack.c.bf16 %v4493_v5, %v4492_v2  ;;  %v4546_v25 = vld [vmem:[%s6981_s25 + $0x3d0] sm:$0xff]  ;;  %v4547_v53 = vld [vmem:[%s6981_s25 + $0x3d8] sm:$0xff]  ;;  %v4497_v39 = vld [vmem:[%s6981_s25 + $0x248] sm:$0xff] }
0x1748   :  { %3121 = vrot.lane.b32.xlu0 %v3119_v7, %s5820_s9  ;;  %5276 = vmatprep.subr.bf16.mxu1 %v5275_v61  ;;  %v2089_v58 = vcombine.high %v2088_v9, %v2088_v9  ;;  %v5247_v18 = vpack.c.bf16 %v4511_v50, %v4510_v19  ;;  %v5281_v40 = vpack.c.bf16 %v4527_v41, %v4526_v37  ;;  %v4514_v52 = vld [vmem:[%s6981_s25 + $0x2d0] sm:$0xff]  ;;  %v4515_v3 = vld [vmem:[%s6981_s25 + $0x2d8] sm:$0xff]  ;;  %v4548_v35 = vld [vmem:[%s6981_s25 + $0x3e0] sm:$0xff] }
0x1749   :  { %5242 = vmatpush3.bf16.msra.mxu0 %v5241_v44  ;;  %v5283_v31 = vpack.c.bf16 %v4545_v28, %v4544_v14  ;;  %v4528_v44 = vld [vmem:[%s6981_s25 + $0x340] sm:$0xff]  ;;  %v5249_v16 = vpack.c.bf16 %v4495_v10, %v4494_v29  ;;  %v5251_v1 = vpack.c.bf16 %v4513_v22, %v4512_v49  ;;  %v5287_v15 = vpack.c.bf16 %v4547_v53, %v4546_v25  ;;  %v4530_v23 = vld [vmem:[%s6981_s25 + $0x350] sm:$0xff]  ;;  %v4531_v30 = vld [vmem:[%s6981_s25 + $0x358] sm:$0xff] }
0x174a   :  { %5244 = vmatprep.subr.bf16.mxu0 %v5243_v36  ;;  %2093 = vst [vmem:[#allocation9 + $0x4] sm:$0xf] %v2089_v58  ;;  %v5285_v61 = vpack.c.bf16 %v4529_v32, %v4528_v44  ;;  %v5253_v17 = vpack.c.bf16 %v4497_v39, %v4496_v11  ;;  %v4549_v7 = vld [vmem:[%s6981_s25 + $0x3e8] sm:$0xff]  ;;  %v5255_v36 = vpack.c.bf16 %v4515_v3, %v4514_v52  ;;  %v4498_v2 = vld [vmem:[%s6981_s25 + $0x250] sm:$0xff]  ;;  %v4499_v5 = vld [vmem:[%s6981_s25 + $0x258] sm:$0xff] }
0x174b   :  { %5278 = vmatpush3.bf16.msra.mxu1 %v5277_v51  ;;  %v5289_v9 = vpack.c.bf16 %v4531_v30, %v4530_v23  ;;  %v4516_v51 = vld [vmem:[%s6981_s25 + $0x2e0] sm:$0xff]  ;;  %v4517_v19 = vld [vmem:[%s6981_s25 + $0x2e8] sm:$0xff]  ;;  %v5291_v50 = vpack.c.bf16 %v4549_v7, %v4548_v35  ;;  %v5257_v41 = vpack.c.bf16 %v4499_v5, %v4498_v2  ;;  %v4550_v58 = vld [vmem:[%s6981_s25 + $0x3f0] sm:$0xff] }
0x174c   :  { %5280 = vmatprep.subr.bf16.mxu1 %v5279_v24  ;;  %v4532_v24 = vld [vmem:[%s6981_s25 + $0x360] sm:$0xff]  ;;  %v4533_v37 = vld [vmem:[%s6981_s25 + $0x368] sm:$0xff]  ;;  %v5259_v14 = vpack.c.bf16 %v4517_v19, %v4516_v51  ;;  %v4518_v10 = vld [vmem:[%s6981_s25 + $0x2f0] sm:$0xff] }
0x174d   :  { %5246 = vmatpush3.bf16.msra.mxu0 %v5245_v34  ;;  %v4551_v34 = vld [vmem:[%s6981_s25 + $0x3f8] sm:$0xff]  ;;  %v4500_v28 = vld [vmem:[%s6981_s25 + $0x260] sm:$0xff]  ;;  %v5293_v29 = vpack.c.bf16 %v4533_v37, %v4532_v24  ;;  %v4534_v22 = vld [vmem:[%s6981_s25 + $0x370] sm:$0xff] }
0x174e   :  { %5248 = vmatprep.subr.bf16.mxu0 %v5247_v18  ;;  %v4501_v18 = vld [vmem:[%s6981_s25 + $0x268] sm:$0xff]  ;;  %v5295_v49 = vpack.c.bf16 %v4551_v34, %v4550_v58  ;;  %v4600_v32 = vld [vmem:[%s6981_s25 + $0x580] sm:$0xff]  ;;  %v4502_v53 = vld [vmem:[%s6981_s25 + $0x270] sm:$0xff] }
0x174f   :  { %5282 = vmatpush3.bf16.msra.mxu1 %v5281_v40  ;;  %v4519_v40 = vld [vmem:[%s6981_s25 + $0x2f8] sm:$0xff]  ;;  %v5261_v44 = vpack.c.bf16 %v4501_v18, %v4500_v28  ;;  %v4568_v39 = vld [vmem:[%s6981_s25 + $0x480] sm:$0xff]  ;;  %v4602_v30 = vld [vmem:[%s6981_s25 + $0x590] sm:$0xff] }
0x1750   :  { %5284 = vmatprep.subr.bf16.mxu1 %v5283_v31  ;;  %v4535_v31 = vld [vmem:[%s6981_s25 + $0x378] sm:$0xff]  ;;  %v5263_v25 = vpack.c.bf16 %v4519_v40, %v4518_v10  ;;  %v4584_v3 = vld [vmem:[%s6981_s25 + $0x500] sm:$0xff]  ;;  %v4570_v5 = vld [vmem:[%s6981_s25 + $0x490] sm:$0xff] }
0x1751   :  { %5250 = vmatpush3.bf16.msra.mxu0 %v5249_v16  ;;  %v4601_v16 = vld [vmem:[%s6981_s25 + $0x588] sm:$0xff]  ;;  %v5297_v11 = vpack.c.bf16 %v4535_v31, %v4534_v22  ;;  %v4552_v7 = vld [vmem:[%s6981_s25 + $0x400] sm:$0xff]  ;;  %v4586_v19 = vld [vmem:[%s6981_s25 + $0x510] sm:$0xff] }
0x1752   :  { %5252 = vmatprep.subr.bf16.mxu0 %v5251_v1  ;;  %v4503_v1 = vld [vmem:[%s6981_s25 + $0x278] sm:$0xff]  ;;  %v5331_v52 = vpack.c.bf16 %v4601_v16, %v4600_v32  ;;  %v4604_v37 = vld [vmem:[%s6981_s25 + $0x5a0] sm:$0xff]  ;;  %v4554_v34 = vld [vmem:[%s6981_s25 + $0x410] sm:$0xff] }
0x1753   :  { %5286 = vmatpush3.bf16.msra.mxu1 %v5285_v61  ;;  %v4569_v61 = vld [vmem:[%s6981_s25 + $0x488] sm:$0xff]  ;;  %v5265_v23 = vpack.c.bf16 %v4503_v1, %v4502_v53  ;;  %v4572_v18 = vld [vmem:[%s6981_s25 + $0x4a0] sm:$0xff]  ;;  %v4607_v22 = vld [vmem:[%s6981_s25 + $0x5b8] sm:$0xff] }
0x1754   :  { %5288 = vmatprep.subr.bf16.mxu1 %v5287_v15  ;;  %v4585_v15 = vld [vmem:[%s6981_s25 + $0x508] sm:$0xff]  ;;  %v5299_v35 = vpack.c.bf16 %v4569_v61, %v4568_v39  ;;  %v4588_v10 = vld [vmem:[%s6981_s25 + $0x520] sm:$0xff]  ;;  %v4574_v16 = vld [vmem:[%s6981_s25 + $0x4b0] sm:$0xff] }
0x1755   :  { %5254 = vmatpush3.bf16.msra.mxu0 %v5253_v17  ;;  %v4603_v17 = vld [vmem:[%s6981_s25 + $0x598] sm:$0xff]  ;;  %v5333_v2 = vpack.c.bf16 %v4585_v15, %v4584_v3  ;;  %v4589_v40 = vld [vmem:[%s6981_s25 + $0x528] sm:$0xff]  ;;  %v4608_v39 = vld [vmem:[%s6981_s25 + $0x5c0] sm:$0xff] }
0x1756   :  { %5256 = vmatprep.subr.bf16.mxu0 %v5255_v36  ;;  %v4553_v36 = vld [vmem:[%s6981_s25 + $0x408] sm:$0xff]  ;;  %v5335_v51 = vpack.c.bf16 %v4603_v17, %v4602_v30  ;;  %v5341_v32 = vpack.c.bf16 %v4589_v40, %v4588_v10  ;;  %v4591_v1 = vld [vmem:[%s6981_s25 + $0x538] sm:$0xff]  ;;  %v4558_v3 = vld [vmem:[%s6981_s25 + $0x430] sm:$0xff] }
0x1757   :  { %5290 = vmatpush3.bf16.msra.mxu1 %v5289_v9  ;;  %v4571_v9 = vld [vmem:[%s6981_s25 + $0x498] sm:$0xff]  ;;  %v5301_v24 = vpack.c.bf16 %v4553_v36, %v4552_v7  ;;  %v4609_v61 = vld [vmem:[%s6981_s25 + $0x5c8] sm:$0xff]  ;;  %v4576_v30 = vld [vmem:[%s6981_s25 + $0x4c0] sm:$0xff] }
0x1758   :  { %5292 = vmatprep.subr.bf16.mxu1 %v5291_v50  ;;  %v4587_v50 = vld [vmem:[%s6981_s25 + $0x518] sm:$0xff]  ;;  %v5303_v58 = vpack.c.bf16 %v4571_v9, %v4570_v5  ;;  %v4577_v17 = vld [vmem:[%s6981_s25 + $0x4c8] sm:$0xff]  ;;  %v4592_v7 = vld [vmem:[%s6981_s25 + $0x540] sm:$0xff] }
0x1759   :  { %5258 = vmatpush3.bf16.msra.mxu0 %v5257_v41  ;;  %v4605_v41 = vld [vmem:[%s6981_s25 + $0x5a8] sm:$0xff]  ;;  %v5337_v28 = vpack.c.bf16 %v4587_v50, %v4586_v19  ;;  %v4559_v15 = vld [vmem:[%s6981_s25 + $0x438] sm:$0xff]  ;;  %v4610_v5 = vld [vmem:[%s6981_s25 + $0x5d0] sm:$0xff] }
0x175a   :  { %5260 = vmatprep.subr.bf16.mxu0 %v5259_v14  ;;  %v4555_v14 = vld [vmem:[%s6981_s25 + $0x418] sm:$0xff]  ;;  %v4593_v36 = vld [vmem:[%s6981_s25 + $0x548] sm:$0xff]  ;;  %v4560_v19 = vld [vmem:[%s6981_s25 + $0x440] sm:$0xff] }
0x175b   :  { %5294 = vmatpush3.bf16.msra.mxu1 %v5293_v29  ;;  %v4573_v29 = vld [vmem:[%s6981_s25 + $0x4a8] sm:$0xff]  ;;  %v4611_v9 = vld [vmem:[%s6981_s25 + $0x5d8] sm:$0xff]  ;;  %v4562_v10 = vld [vmem:[%s6981_s25 + $0x450] sm:$0xff] }
0x175c   :  { %5296 = vmatprep.subr.bf16.mxu1 %v5295_v49  ;;  %v5305_v49 = vpack.c.bf16 %v4555_v14, %v4554_v34  ;;  %v5307_v31 = vpack.c.bf16 %v4573_v29, %v4572_v18  ;;  %v4561_v50 = vld [vmem:[%s6981_s25 + $0x448] sm:$0xff]  ;;  %v4594_v34 = vld [vmem:[%s6981_s25 + $0x550] sm:$0xff]  ;;  %v4595_v14 = vld [vmem:[%s6981_s25 + $0x558] sm:$0xff] }
0x175d   :  { %5262 = vmatpush3.bf16.msra.mxu0 %v5261_v44  ;;  %v4556_v44 = vld [vmem:[%s6981_s25 + $0x420] sm:$0xff]  ;;  %v4613_v29 = vld [vmem:[%s6981_s25 + $0x5e8] sm:$0xff]  ;;  %v4563_v40 = vld [vmem:[%s6981_s25 + $0x458] sm:$0xff] }
0x175e   :  { %5264 = vmatprep.subr.bf16.mxu0 %v5263_v25  ;;  %v4575_v25 = vld [vmem:[%s6981_s25 + $0x4b8] sm:$0xff]  ;;  %v4612_v18 = vld [vmem:[%s6981_s25 + $0x5e0] sm:$0xff] }
0x175f   :  { %5298 = vmatpush3.bf16.msra.mxu1 %v5297_v11 }
0x1760   :  { %5332 = vmatprep.subr.bf16.mxu1 %v5331_v52  ;;  %v5311_v52 = vpack.c.bf16 %v4575_v25, %v4574_v16  ;;  %v4614_v16 = vld [vmem:[%s6981_s25 + $0x5f0] sm:$0xff]  ;;  %v4615_v25 = vld [vmem:[%s6981_s25 + $0x5f8] sm:$0xff] }
0x1761   :  { %5266 = vmatpush3.bf16.msra.mxu0 %v5265_v23 }
0x1762   :  { %2538 = vmatmul.mubr.f32.vlgmr.msra.gmra.mrb[20].mxu1 %v6503_v57  ;;  %5300 = vmatprep.subr.bf16.mxu0 %v5299_v35  ;;  %v5339_v57 = vpack.c.bf16 %v4605_v41, %v4604_v37  ;;  %v5347_v35 = vpack.c.bf16 %v4609_v61, %v4608_v39  ;;  %v4578_v37 = vld [vmem:[%s6981_s25 + $0x4d0] sm:$0xff]  ;;  %v4579_v41 = vld [vmem:[%s6981_s25 + $0x4d8] sm:$0xff] }
0x1763   :  { %5334 = vmatpush3.bf16.msra.mxu1 %v5333_v2  ;;  %2761 = vmatprep.mubr.f32.mxu1 %v6514_v33  ;;  %v4606_v33 = vld [vmem:[%s6981_s25 + $0x5b0] sm:$0xff]  ;;  %v5313_v2 = vpack.c.bf16 %v4559_v15, %v4558_v3  ;;  %v4583_v61 = vld [vmem:[%s6981_s25 + $0x4f8] sm:$0xff] }
0x1764   :  { %2426 = vmatmul.mubr.f32.vlgmr.msra.gmra.mrb[16].mxu0 %v6506_v45  ;;  %5336 = vmatprep.subr.bf16.mxu1 %v5335_v51  ;;  %v4557_v45 = vld [vmem:[%s6981_s25 + $0x428] sm:$0xff]  ;;  %v5343_v53 = vpack.c.bf16 %v4607_v22, %v4606_v33  ;;  %v5315_v51 = vpack.c.bf16 %v4577_v17, %v4576_v30  ;;  %v4580_v33 = vld [vmem:[%s6981_s25 + $0x4e0] sm:$0xff]  ;;  %v4582_v39 = vld [vmem:[%s6981_s25 + $0x4f0] sm:$0xff] }
0x1765   :  { %5302 = vmatpush3.bf16.msra.mxu0 %v5301_v24  ;;  %2649 = vmatprep.mubr.f32.mxu0 %v6520_v27  ;;  %v4590_v27 = vld [vmem:[%s6981_s25 + $0x530] sm:$0xff]  ;;  %v5309_v11 = vpack.c.bf16 %v4557_v45, %v4556_v44  ;;  %v5349_v24 = vpack.c.bf16 %v4593_v36, %v4592_v7  ;;  %v4581_v22 = vld [vmem:[%s6981_s25 + $0x4e8] sm:$0xff]  ;;  %v4596_v44 = vld [vmem:[%s6981_s25 + $0x560] sm:$0xff]  ;;  %v5327_v30 = vpack.c.bf16 %v4583_v61, %v4582_v39 }
0x1766   :  { %5304 = vmatprep.subr.bf16.mxu0 %v5303_v58  ;;  %v5345_v23 = vpack.c.bf16 %v4591_v1, %v4590_v27  ;;  %v5351_v58 = vpack.c.bf16 %v4611_v9, %v4610_v5  ;;  %v4597_v45 = vld [vmem:[%s6981_s25 + $0x568] sm:$0xff]  ;;  %v4564_v27 = vld [vmem:[%s6981_s25 + $0x460] sm:$0xff]  ;;  %v4598_v3 = vld [vmem:[%s6981_s25 + $0x570] sm:$0xff] }
0x1767   :  { %5338 = vmatpush3.bf16.msra.mxu1 %v5337_v28  ;;  %v5317_v28 = vpack.c.bf16 %v4561_v50, %v4560_v19  ;;  %v4565_v1 = vld [vmem:[%s6981_s25 + $0x468] sm:$0xff]  ;;  %v4599_v15 = vld [vmem:[%s6981_s25 + $0x578] sm:$0xff]  ;;  %v4566_v17 = vld [vmem:[%s6981_s25 + $0x470] sm:$0xff] }
0x1768   :  { %5340 = vmatprep.subr.bf16.mxu1 %v5339_v57  ;;  %v5319_v57 = vpack.c.bf16 %v4579_v41, %v4578_v37  ;;  %v5361_v7 = vpack.c.bf16 %v4599_v15, %v4598_v3  ;;  %v2773_v5 = vld [vmem:[%s6984_s14 + $0x18] sm:$0xff]  ;;  %v2772_v19 = vld [vmem:[%s6984_s14 + $0x10] sm:$0xff]  ;;  %v4618_v50 = vld [vmem:[%s6984_s14 + $0x48] sm:$0xff] }
0x1769   :  { %5306 = vmatpush3.bf16.msra.mxu0 %v5305_v49  ;;  %v5353_v49 = vpack.c.bf16 %v4595_v14, %v4594_v34  ;;  %v4620_v37 = vld [vmem:[%s6984_s14 + $0x58] sm:$0xff]  ;;  %v4619_v41 = vld [vmem:[%s6984_s14 + $0x50] sm:$0xff]  ;;  %v2775_v34 = vld [vmem:[%s6984_s14 + $0x28] sm:$0xff] }
0x176a   :  { %5308 = vmatprep.subr.bf16.mxu0 %v5307_v31  ;;  %v5355_v31 = vpack.c.bf16 %v4613_v29, %v4612_v18  ;;  %v2777_v14 = vld [vmem:[%s6984_s14 + $0x38] sm:$0xff]  ;;  %v2774_v18 = vld [vmem:[%s6984_s14 + $0x20] sm:$0xff]  ;;  %v2776_v29 = vld [vmem:[%s6984_s14 + $0x30] sm:$0xff] }
0x176b   :  { %5342 = vmatpush3.bf16.msra.mxu1 %v5341_v32  ;;  %v5321_v32 = vpack.c.bf16 %v4563_v40, %v4562_v10  ;;  %v5369_v10 = vpack.c.bf16 %v2776_v29, %v2774_v18  ;;  %v4624_v40 = vld [vmem:[%s6984_s14 + $0x78] sm:$0xff]  ;;  %v2778_v18 = vld [vmem:[%s6988_s20] sm:$0x3]  ;;  %v4625_v29 = vld [vmem:[%s6988_s20 + $0x2] sm:$0x3] }
0x176c   :  { %5344 = vmatprep.subr.bf16.mxu1 %v5343_v53  ;;  %v5323_v53 = vpack.c.bf16 %v4581_v22, %v4580_v33  ;;  %v4623_v33 = vld [vmem:[%s6984_s14 + $0x70] sm:$0xff] }
0x176d   :  { %5310 = vmatpush3.bf16.msra.mxu0 %v5309_v11  ;;  %v5357_v11 = vpack.c.bf16 %v4597_v45, %v4596_v44 }
0x176e   :  { %5312 = vmatprep.subr.bf16.mxu0 %v5311_v52  ;;  %v5359_v52 = vpack.c.bf16 %v4615_v25, %v4614_v16  ;;  %v4455_v25 = vld [vmem:[%s6985_s19] ss:$0 sm:$0xff] }
0x176f   :  { %5346 = vmatpush3.bf16.msra.mxu1 %v5345_v23  ;;  %v5325_v23 = vpack.c.bf16 %v4565_v1, %v4564_v27 }
0x1770   :  { %5348 = vmatprep.subr.bf16.mxu1 %v5347_v35  ;;  %v4567_v35 = vld [vmem:[%s6981_s25 + $0x478] sm:$0xff] }
0x1771   :  { %5314 = vmatpush3.bf16.msra.mxu0 %v5313_v2  ;;  %v5329_v36 = vpack.c.bf16 %v4567_v35, %v4566_v17  ;;  %v2771_v2 = vld [vmem:[%s6984_s14 + $0x8] sm:$0xff]  ;;  %v4449_v35 = vld [vmem:[%s6986_s24] ss:$0 sm:$0xff] }
0x1772   :  { %5316 = vmatprep.subr.bf16.mxu0 %v5315_v51  ;;  %v5363_v9 = vpack.c.bf16 %v2773_v5, %v2771_v2  ;;  %v2770_v51 = vld [vmem:[%s6984_s14] sm:$0xff] }
0x1773   :  { %5350 = vmatpush3.bf16.msra.mxu1 %v5349_v24  ;;  %v5365_v24 = vpack.c.bf16 %v2772_v19, %v2770_v51 }
0x1774   :  { %5352 = vmatprep.subr.bf16.mxu1 %v5351_v58 }
0x1775   :  { %5318 = vmatpush3.bf16.msra.mxu0 %v5317_v28  ;;  %v5367_v28 = vpack.c.bf16 %v2777_v14, %v2775_v34  ;;  %v5824_v14 = vmov 1966171168  }
0x1776   :  { %5320 = vmatprep.subr.bf16.mxu0 %v5319_v57  ;;  %v4622_v57 = vld [vmem:[%s6984_s14 + $0x68] sm:$0xff] }
0x1777   :  { %5354 = vmatpush3.bf16.msra.mxu1 %v5353_v49  ;;  %v4621_v49 = vld [vmem:[%s6984_s14 + $0x60] sm:$0xff]  ;;  %v5375_v22 = vpack.c.bf16 %v4624_v40, %v4622_v57  ;;  %v2783_v57 = vrot.slane %v2778_v18, %v6426_v13 }
0x1778   :  { %5356 = vmatprep.subr.bf16.mxu1 %v5355_v31  ;;  %v5377_v31 = vpack.c.bf16 %v4623_v33, %v4621_v49  ;;  %v2787_v49 = vrot.slane %v2778_v18, %v6430_v59  ;;  %v2918_v33 = vrot.slane %v4625_v29, %v6430_v59  ;;  %v6990_v59 = vlaneseq }
0x1779   :  { %5322 = vmatpush3.bf16.msra.mxu0 %v5321_v32 }
0x177a   :  { %5324 = vmatprep.subr.bf16.mxu0 %v5323_v53  ;;  %vm2894_vm14 = vcmp.lt.s32.totalorder %v6990_v59, 256 }
0x177b   :  { %5358 = vmatpush3.bf16.msra.mxu1 %v5357_v11 }
0x177c   :  { %5360 = vmatprep.subr.bf16.mxu1 %v5359_v52 }
0x177d   :  { %5326 = vmatpush3.bf16.msra.mxu0 %v5325_v23 }
0x177e   :  { %5328 = vmatprep.subr.bf16.mxu0 %v5327_v30 }
0x177f   :  { %5362 = vmatpush3.bf16.msra.mxu1 %v5361_v7 }
0x1781   :  { %5330 = vmatpush3.bf16.msra.mxu0 %v5329_v36 }
0x1782   :  { %2762 = vmatmul.mubr.f32.vlgmr.msra.gmra.mrb[22].mxu1 %v6525_v54  ;;  %v4617_v54 = vld [vmem:[%s6984_s14 + $0x40] sm:$0xff]  ;;  %5364 = vmatprep.subr.bf16.mxu0 %v5363_v9  ;;  %v1874_v9 = vadd.f32 %v4449_v35, %v6432_v20 }
0x1783   :  { %2985 = vmatprep.mubr.f32.mxu1 %v5819_v63  ;;  %v5373_v58 = vpack.c.bf16 %v4619_v41, %v4617_v54 }
0x1784   :  { %2650 = vmatmul.mubr.f32.vlgmr.msra.gmra.mrb[18].mxu0 %v6528_v21  ;;  %v5371_v21 = vpack.c.bf16 %v4620_v37, %v4618_v50  ;;  %v3023_v50 = vld [vmem:[%s6987_s30] sm:$0xff]  ;;  %5625 = vtanh.f32 %v1874_v9 }
0x1785   :  { %2858 = vmatprep.mubr.f32.mxu0 %v5819_v63  ;;  %5366 = vmatpush1.bf16.msra.mxu0 %v5365_v24  ;;  %v3024_v24 = vld [vmem:[%s6987_s30 + $0x8] sm:$0xff] }
0x1786   :  { %5372 = vmatprep.subr.bf16.mxu1 %v5371_v21  ;;  %5368 = vmatprep.subr.bf16.mxu0 %v5367_v28  ;;  %v6677_v54 = vpack.c.bf16 %v3024_v24, %v3023_v50  ;;  %v3025_v21 = vld [vmem:[%s6987_s30 + $0x10] sm:$0xff]  ;;  %v2869_v28 = vunpack.c.l.s4 %v5824_v14 }
0x1787   :  { %5374 = vmatpush1.bf16.msra.mxu1 %v5373_v58  ;;  %v3026_v58 = vld [vmem:[%s6987_s30 + $0x18] sm:$0xff] }
0x1788   :  { %5376 = vmatprep.subr.bf16.mxu1 %v5375_v22  ;;  %v6684_v20 = vpack.c.bf16 %v3026_v58, %v3025_v21  ;;  %v2870_v40 = vunpack.c.0.s8 %v2869_v28 }
0x1789   :  { %5370 = vmatpush1.bf16.msra.mxu0 %v5369_v10  ;;  %v2914_v10 = vrot.slane %v4625_v29, %v6426_v13 }
0x178a   :  { %5379 = vmatprep.subr.bf16.mxu0 %v5817_v62 }
0x178b   :  { %5378 = vmatpush1.bf16.msra.mxu1 %v5377_v31 }
0x178c   :  { %5385 = vmatprep.subr.bf16.mxu1 %v5817_v62 }
0x178e   :  { %v5626_v34 = vpop.eup %5625 }
0x1815   :  { %v4759_v44 = vpop.f32.mrb[18].mxu1 }
0x1816   :  { %v4760_v45 = vpop.f32.mrb[19].mxu1 }
0x1817   :  { %v4761_v32 = vadd.f32 %v4760_v45, %v4759_v44  ;;  %v4724_v16 = vpop.f32.mrb[14].mxu0 }
0x1818   :  { %v4725_v53 = vpop.f32.mrb[15].mxu0 }
0x1819   :  { %v4726_v27 = vadd.f32 %v4725_v53, %v4724_v16 }
0x181b   :  { %v2209_v1 = vadd.f32 %v4726_v27, %v4455_v25  ;;  %v6711_v25 = vsub.s32 %v2870_v40, %v6423_v12 }
0x181d   :  { %v2319_v11 = vadd.f32 %v4761_v32, %v2209_v1 }
0x1835   :  { %v4829_v39 = vpop.f32.mrb[20].mxu1 }
0x1836   :  { %v4830_v61 = vpop.f32.mrb[21].mxu1 }
0x1837   :  { %v4831_v52 = vadd.f32 %v4830_v61, %v4829_v39  ;;  %v4794_v3 = vpop.f32.mrb[16].mxu0 }
0x1838   :  { %v4795_v15 = vpop.f32.mrb[17].mxu0 }
0x1839   :  { %v4796_v23 = vadd.f32 %v4795_v15, %v4794_v3 }
0x183b   :  { %v2431_v30 = vadd.f32 %v4796_v23, %v2319_v11 }
0x183d   :  { %v2543_v17 = vadd.f32 %v4831_v52, %v2431_v30  ;;  %v6716_v52 = vld [vmem:[%s6989_s15] ss:$0 sm:$0xff] }
0x1855   :  { %v4899_v7 = vpop.f32.mrb[22].mxu1 }
0x1856   :  { %v4900_v36 = vpop.f32.mrb[23].mxu1 }
0x1857   :  { %v4901_v2 = vadd.f32 %v4900_v36, %v4899_v7  ;;  %v4864_v5 = vpop.f32.mrb[18].mxu0 }
0x1858   :  { %v4865_v51 = vpop.f32.mrb[19].mxu0 }
0x1859   :  { %v4866_v19 = vadd.f32 %v4865_v51, %v4864_v5 }
0x185b   :  { %v2655_v37 = vadd.f32 %v4866_v19, %v2543_v17 }
0x185d   :  { %v2767_v41 = vadd.f32 %v4901_v2, %v2655_v37  ;;  %v3122_v37 = vpop.permute.xlu0 %3121 }
0x185f   :  { %4616 = vmatmul.mubr.msk.f32.vlgmr.msra.gmra.mrb[20].mxu0 %vm2790_vm12, %v2767_v41  ;;  %4626 = vmatmul.mubr.msk.f32.vlgmr.msra.gmra.mrb[24].mxu1 %vm2790_vm12, %v2767_v41  ;;  %2769 = vst.msk [vmem:[#allocation4] sm:$0x3] %vm2768_vm13, %v2767_v41 }
0x1860   :  { %5381 = vmatpush3.bf16.msra.mxu0 %v6677_v54  ;;  %5049 = vmatprep.mubr.msk.f32.mxu0 %vm5818_vm1, %v5819_v63 }
0x1861   :  { %5382 = vmatprep.subr.bf16.mxu0 %v5817_v62  ;;  %5387 = vmatpush3.bf16.msra.mxu1 %v6677_v54 }
0x1862   :  { %5388 = vmatprep.subr.bf16.mxu1 %v5817_v62  ;;  %5060 = vmatprep.mubr.msk.f32.mxu1 %vm5818_vm1, %v5819_v63 }
0x1864   :  { %5384 = vmatpush3.bf16.msra.mxu0 %v6684_v20 }
0x1865   :  { %5390 = vmatpush3.bf16.msra.mxu1 %v6684_v20  ;;  %5391 = vmatprep.subr.bf16.mxu0 %v5817_v62 }
0x1866   :  { %5397 = vmatprep.subr.bf16.mxu1 %v5817_v62 }
0x1867   :  { %5050 = vmatmul.mubr.msk.f32.vlgmr.msra.gmra.mrb[22].mxu0 %vm2790_vm12, %v5626_v34 }
0x1868   :  { %5393 = vmatpush3.bf16.msra.mxu0 %v6677_v54  ;;  %5071 = vmatprep.mubr.msk.f32.mxu0 %vm5818_vm1, %v5819_v63 }
0x1869   :  { %5394 = vmatprep.subr.bf16.mxu0 %v5817_v62 }
0x186c   :  { %5396 = vmatpush3.bf16.msra.mxu0 %v6684_v20 }
0x186d   :  { %5403 = vmatprep.subr.bf16.mxu0 %v5817_v62 }
0x1932   :  { %v2860_v22 = vpop.f32.mrb[20].mxu0  ;;  %v2987_v31 = vpop.f32.mrb[24].mxu1 }
0x1933   :  { %v2861_v44 = vadd.f32 %v2860_v22, %v2783_v57  ;;  %v2988_v45 = vadd.f32 %v2987_v31, %v2914_v10  ;;  %v2862_v32 = vpop.f32.mrb[21].mxu0  ;;  %v2989_v16 = vpop.f32.mrb[25].mxu1 }
0x1934   :  { %v2863_v53 = vadd.f32 %v2862_v32, %v2787_v49  ;;  %v2990_v27 = vadd.f32 %v2989_v16, %v2918_v33 }
0x1936   :  { %v2867_v1 = vcombine.low %v2861_v44, %v2863_v53  ;;  %v2994_v11 = vcombine.low %v2988_v45, %v2990_v27 }
0x1938   :  { %v2874_v39 = vrot.slane %v2867_v1, %v6711_v25  ;;  %v3001_v61 = vrot.slane %v2994_v11, %v6711_v25 }
0x193a   :  { %v2875_v3 = vcombine.high %v2874_v39, %v2874_v39  ;;  %v2882_v15 = vrot.slane %v2874_v39, %v6711_v25  ;;  %v3002_v23 = vcombine.high %v3001_v61, %v3001_v61  ;;  %v3009_v30 = vrot.slane %v3001_v61, %v6711_v25  ;;  %v3103_v12 = vpop.f32.mrb[22].mxu0 }
0x193b   :  { %v3104_v17 = vadd.f32 %v6716_v52, %v3103_v12  ;;  %v5051_v35 = vpop.f32.mrb[23].mxu0 }
0x193c   :  { %v2889_v7 = vrot.slane %v2875_v3, %v6711_v25  ;;  %2896 = vst.msk [vmem:[#allocation8] ss:$2 sm:$0x3] %vm2894_vm14, %v2882_v15  ;;  %v3016_v36 = vrot.slane %v3002_v23, %v6711_v25  ;;  %3020 = vst.msk [vmem:[#allocation8 + $0x1] ss:$2 sm:$0x3] %vm2894_vm14, %v3009_v30 }
0x193d   :  { %5627 = vtanh.f32 %v3104_v17  ;;  %v4629_v5 = vmul.f32 -1.442695, %v3104_v17 }
0x193e   :  { %2898 = vst.msk [vmem:[#allocation8 + $0x4] ss:$2 sm:$0x3] %vm2894_vm14, %v2889_v7  ;;  %3022 = vst.msk [vmem:[#allocation8 + $0x5] ss:$2 sm:$0x3] %vm2894_vm14, %v3016_v36 }
0x193f   :  { %5629 = vpow2.f32 %v4629_v5 }
0x1947   :  { %v5628_v2 = vpop.eup %5627 }
0x1948   :  { %3126 = vrot.lane.b32.xlu1 %v5628_v2, %s5825_s16 }
0x1949   :  { %v5630_v9 = vpop.eup %5629 }
0x194a   :  { %v3110_v51 = vadd.f32 1.0, %v5630_v9 }
0x194c   :  { %5631 = vrcp.f32 %v3110_v51 }
0x1956   :  { %v5632_v19 = vpop.eup %5631 }
0x1957   :  { %v3124_v41 = vmul.f32 %v5632_v19, %v3122_v37 }
0x19ba   :  { %v3127_v50 = vpop.permute.xlu1 %3126 }
0x19bb   :  { %v3129_v24 = vmul.f32 %v5632_v19, %v3127_v50 }
0x19bd   :  { %3131 = vrot.lane.b32.xlu1 %v3129_v24, %s5820_s9 }
0x1a2f   :  { %v3132_v21 = vpop.permute.xlu1 %3131 }
0x1a30   :  { %v3134_v58 = vadd.f32 %v3132_v21, %v3124_v41 }
0x1a32   :  { %5633 = vtanh.f32 %v3134_v58 }
0x1a3c   :  { %v5634_v34 = vpop.eup %5633 }
0x1a3d   :  { %3137 = vrot.lane.b32.xlu0 %v5634_v34, %s5825_s16 }
0x1aaf   :  { %v3138_v14 = vpop.permute.xlu0 %3137 }
0x1ab0   :  { %v6727_v28 = vmul.f32 %v5632_v19, %v3138_v14 }
0x1ab2   :  { %3181 = vrot.lane.b32.xlu1 %v6727_v28, %s5820_s9 }
0x1ab6   :  { %3271 = vrot.lane.b32.xlu1 %v6080_v26, %s5820_s9 }
0x1b24   :  { %v3182_v18 = vpop.permute.xlu1 %3181 }
0x1b25   :  { %5061 = vmatmul.mubr.msk.f32.vlgmr.msra.gmra.mrb[26].mxu1 %vm2790_vm12, %v3182_v18 }
0x1b26   :  { %5399 = vmatpush3.bf16.msra.mxu1 %v6677_v54  ;;  %5082 = vmatprep.mubr.msk.f32.mxu1 %vm5818_vm1, %v5819_v63 }
0x1b27   :  { %5400 = vmatprep.subr.bf16.mxu1 %v5817_v62 }
0x1b28   :  { %v3272_v32 = vpop.permute.xlu1 %3271 }
0x1b29   :  { %v3274_v16 = vmul.f32 %v3272_v32, %v3134_v58 }
0x1b2a   :  { %5402 = vmatpush3.bf16.msra.mxu1 %v6684_v20 }
0x1b2b   :  { %5409 = vmatprep.subr.bf16.mxu1 %v5817_v62 }
0x1bf8   :  { %v3251_v29 = vpop.f32.mrb[26].mxu1 }
0x1bf9   :  { %v3252_v57 = vadd.f32 %v6716_v52, %v3251_v29  ;;  %v5062_v10 = vpop.f32.mrb[27].mxu1 }
0x1bfb   :  { %v3261_v26 = vadd.f32 %v6148_v55, %v3252_v57 }
0x1bfd   :  { %5635 = vtanh.f32 %v3261_v26  ;;  %v4631_v49 = vmul.f32 -1.442695, %v3261_v26 }
0x1bff   :  { %5637 = vpow2.f32 %v4631_v49 }
0x1c07   :  { %v5636_v40 = vpop.eup %5635 }
0x1c08   :  { %3277 = vrot.lane.b32.xlu0 %v5636_v40, %s5825_s16 }
0x1c09   :  { %v5638_v33 = vpop.eup %5637 }
0x1c0a   :  { %v3265_v22 = vadd.f32 1.0, %v5638_v33 }
0x1c0c   :  { %5639 = vrcp.f32 %v3265_v22 }
0x1c16   :  { %v5640_v31 = vpop.eup %5639 }
0x1c17   :  { %v3275_v53 = vmul.f32 %v5640_v31, %v3274_v16 }
0x1c7a   :  { %v3278_v44 = vpop.permute.xlu0 %3277 }
0x1c7b   :  { %v3280_v45 = vmul.f32 %v5640_v31, %v3278_v44 }
0x1c7d   :  { %3282 = vrot.lane.b32.xlu0 %v3280_v45, %s5820_s9 }
0x1cef   :  { %v3283_v27 = vpop.permute.xlu0 %3282 }
0x1cf0   :  { %v3285_v1 = vadd.f32 %v3283_v27, %v3275_v53 }
0x1cf2   :  { %5641 = vtanh.f32 %v3285_v1 }
0x1cfc   :  { %v5642_v55 = vpop.eup %5641 }
0x1cfd   :  { %3288 = vrot.lane.b32.xlu1 %v5642_v55, %s5825_s16 }
0x1d6f   :  { %v3289_v11 = vpop.permute.xlu1 %3288 }
0x1d70   :  { %v6745_v39 = vmul.f32 %v5640_v31, %v3289_v11 }
0x1d72   :  { %3331 = vrot.lane.b32.xlu0 %v6745_v39, %s5820_s9 }
0x1d76   :  { %3420 = vrot.lane.b32.xlu0 %v6083_v38, %s5820_s9 }
0x1de4   :  { %v3332_v61 = vpop.permute.xlu0 %3331 }
0x1de5   :  { %5072 = vmatmul.mubr.msk.f32.vlgmr.msra.gmra.mrb[24].mxu0 %vm2790_vm12, %v3332_v61 }
0x1de6   :  { %5405 = vmatpush3.bf16.msra.mxu0 %v6677_v54  ;;  %5093 = vmatprep.mubr.msk.f32.mxu0 %vm5818_vm1, %v5819_v63 }
0x1de7   :  { %5406 = vmatprep.subr.bf16.mxu0 %v5817_v62 }
0x1de8   :  { %v3421_v2 = vpop.permute.xlu0 %3420 }
0x1de9   :  { %v3423_v5 = vmul.f32 %v3421_v2, %v3285_v1 }
0x1dea   :  { %5408 = vmatpush3.bf16.msra.mxu0 %v6684_v20 }
0x1deb   :  { %5415 = vmatprep.subr.bf16.mxu0 %v5817_v62 }
0x1eb8   :  { %v3401_v59 = vpop.f32.mrb[24].mxu0 }
0x1eb9   :  { %v3402_v3 = vadd.f32 %v6716_v52, %v3401_v59  ;;  %v5073_v15 = vpop.f32.mrb[25].mxu0 }
0x1ebb   :  { %v3409_v38 = vadd.f32 %v6151_v56, %v3402_v3 }
0x1ebd   :  { %5643 = vtanh.f32 %v3409_v38  ;;  %v4633_v30 = vmul.f32 -1.442695, %v3409_v38 }
0x1ebf   :  { %5645 = vpow2.f32 %v4633_v30 }
0x1ec7   :  { %v5644_v23 = vpop.eup %5643 }
0x1ec8   :  { %3426 = vrot.lane.b32.xlu1 %v5644_v23, %s5825_s16 }
0x1ec9   :  { %v5646_v12 = vpop.eup %5645 }
0x1eca   :  { %v3413_v17 = vadd.f32 1.0, %v5646_v12 }
0x1ecc   :  { %5647 = vrcp.f32 %v3413_v17 }
0x1ed6   :  { %v5648_v35 = vpop.eup %5647 }
0x1ed7   :  { %v3424_v9 = vmul.f32 %v5648_v35, %v3423_v5 }
0x1f3a   :  { %v3427_v7 = vpop.permute.xlu1 %3426 }
0x1f3b   :  { %v3429_v36 = vmul.f32 %v5648_v35, %v3427_v7 }
0x1f3d   :  { %3431 = vrot.lane.b32.xlu1 %v3429_v36, %s5820_s9 }
0x1faf   :  { %v3432_v51 = vpop.permute.xlu1 %3431 }
0x1fb0   :  { %v3434_v19 = vadd.f32 %v3432_v51, %v3424_v9 }
0x1fb2   :  { %5649 = vtanh.f32 %v3434_v19 }
0x1fbc   :  { %v5650_v56 = vpop.eup %5649 }
0x1fbd   :  { %3437 = vrot.lane.b32.xlu0 %v5650_v56, %s5825_s16 }
0x202f   :  { %v3438_v50 = vpop.permute.xlu0 %3437 }
0x2030   :  { %v6763_v24 = vmul.f32 %v5648_v35, %v3438_v50 }
0x2032   :  { %3480 = vrot.lane.b32.xlu1 %v6763_v24, %s5820_s9 }
0x2036   :  { %3569 = vrot.lane.b32.xlu1 %v6086_v42, %s5820_s9 }
0x20a4   :  { %v3481_v37 = vpop.permute.xlu1 %3480 }
0x20a5   :  { %5083 = vmatmul.mubr.msk.f32.vlgmr.msra.gmra.mrb[28].mxu1 %vm2790_vm12, %v3481_v37 }
0x20a6   :  { %5411 = vmatpush3.bf16.msra.mxu1 %v6677_v54  ;;  %5104 = vmatprep.mubr.msk.f32.mxu1 %vm5818_vm1, %v5819_v63 }
0x20a7   :  { %5412 = vmatprep.subr.bf16.mxu1 %v5817_v62 }
0x20a8   :  { %v3570_v40 = vpop.permute.xlu1 %3569 }
0x20a9   :  { %v3572_v49 = vmul.f32 %v3570_v40, %v3434_v19 }
0x20aa   :  { %5414 = vmatpush3.bf16.msra.mxu1 %v6684_v20 }
0x20ab   :  { %5421 = vmatprep.subr.bf16.mxu1 %v5817_v62 }
0x2178   :  { %v3550_v41 = vpop.f32.mrb[28].mxu1 }
0x2179   :  { %v3551_v21 = vadd.f32 %v6716_v52, %v3550_v41  ;;  %v5084_v58 = vpop.f32.mrb[29].mxu1 }
0x217b   :  { %v3558_v42 = vadd.f32 %v6154_v60, %v3551_v21 }
0x217d   :  { %5651 = vtanh.f32 %v3558_v42  ;;  %v4635_v14 = vmul.f32 -1.442695, %v3558_v42 }
0x217f   :  { %5653 = vpow2.f32 %v4635_v14 }
0x2187   :  { %v5652_v34 = vpop.eup %5651 }
0x2188   :  { %3575 = vrot.lane.b32.xlu0 %v5652_v34, %s5825_s16 }
0x2189   :  { %v5654_v18 = vpop.eup %5653 }
0x218a   :  { %v3562_v29 = vadd.f32 1.0, %v5654_v18 }
0x218c   :  { %5655 = vrcp.f32 %v3562_v29 }
0x2196   :  { %v5656_v57 = vpop.eup %5655 }
0x2197   :  { %v3573_v33 = vmul.f32 %v5656_v57, %v3572_v49 }
0x21fa   :  { %v3576_v10 = vpop.permute.xlu0 %3575 }
0x21fb   :  { %v3578_v26 = vmul.f32 %v5656_v57, %v3576_v10 }
0x21fd   :  { %3580 = vrot.lane.b32.xlu0 %v3578_v26, %s5820_s9 }
0x226f   :  { %v3581_v22 = vpop.permute.xlu0 %3580 }
0x2270   :  { %v3583_v31 = vadd.f32 %v3581_v22, %v3573_v33 }
0x2272   :  { %5657 = vtanh.f32 %v3583_v31 }
0x227c   :  { %v5658_v60 = vpop.eup %5657 }
0x227d   :  { %3586 = vrot.lane.b32.xlu1 %v5658_v60, %s5825_s16 }
0x22ef   :  { %v3587_v44 = vpop.permute.xlu1 %3586 }
0x22f0   :  { %v6781_v45 = vmul.f32 %v5656_v57, %v3587_v44 }
0x22f2   :  { %3629 = vrot.lane.b32.xlu0 %v6781_v45, %s5820_s9 }
0x22f6   :  { %3718 = vrot.lane.b32.xlu0 %v6089_v43, %s5820_s9 }
0x2364   :  { %v3630_v32 = vpop.permute.xlu0 %3629 }
0x2365   :  { %5094 = vmatmul.mubr.msk.f32.vlgmr.msra.gmra.mrb[26].mxu0 %vm2790_vm12, %v3630_v32 }
0x2366   :  { %5417 = vmatpush3.bf16.msra.mxu0 %v6677_v54  ;;  %5115 = vmatprep.mubr.msk.f32.mxu0 %vm5818_vm1, %v5819_v63 }
0x2367   :  { %5418 = vmatprep.subr.bf16.mxu0 %v5817_v62 }
0x2368   :  { %v3719_v38 = vpop.permute.xlu0 %3718 }
0x2369   :  { %v3721_v23 = vmul.f32 %v3719_v38, %v3583_v31 }
0x236a   :  { %5420 = vmatpush3.bf16.msra.mxu0 %v6684_v20 }
0x2438   :  { %v3699_v16 = vpop.f32.mrb[26].mxu0 }
0x2439   :  { %v3700_v53 = vadd.f32 %v6716_v52, %v3699_v16  ;;  %v5095_v27 = vpop.f32.mrb[27].mxu0 }
0x243b   :  { %v3707_v1 = vadd.f32 %v6157_v0, %v3700_v53 }
0x243d   :  { %5659 = vtanh.f32 %v3707_v1  ;;  %v4637_v55 = vmul.f32 -1.442695, %v3707_v1 }
0x243f   :  { %5661 = vpow2.f32 %v4637_v55 }
0x2447   :  { %v5660_v43 = vpop.eup %5659 }
0x2448   :  { %3724 = vrot.lane.b32.xlu1 %v5660_v43, %s5825_s16 }
0x2449   :  { %v5662_v11 = vpop.eup %5661 }
0x244a   :  { %v3711_v61 = vadd.f32 1.0, %v5662_v11 }
0x244c   :  { %5663 = vrcp.f32 %v3711_v61 }
0x2456   :  { %v5664_v59 = vpop.eup %5663 }
0x2457   :  { %v3722_v30 = vmul.f32 %v5664_v59, %v3721_v23 }
0x24ba   :  { %v3725_v3 = vpop.permute.xlu1 %3724 }
0x24bb   :  { %v3727_v15 = vmul.f32 %v5664_v59, %v3725_v3 }
0x24bd   :  { %3729 = vrot.lane.b32.xlu1 %v3727_v15, %s5820_s9 }
0x252f   :  { %v3730_v12 = vpop.permute.xlu1 %3729 }
0x2530   :  { %v3732_v17 = vadd.f32 %v3730_v12, %v3722_v30 }
0x2532   :  { %5665 = vtanh.f32 %v3732_v17 }
0x253c   :  { %v5666_v0 = vpop.eup %5665 }
0x253d   :  { %3735 = vrot.lane.b32.xlu0 %v5666_v0, %s5825_s16 }
0x25af   :  { %v3736_v35 = vpop.permute.xlu0 %3735 }
0x25b0   :  { %v6798_v7 = vmul.f32 %v5664_v59, %v3736_v35 }
0x25b2   :  { %3778 = vrot.lane.b32.xlu1 %v6798_v7, %s5820_s9 }
0x25b6   :  { %3867 = vrot.lane.b32.xlu1 %v6092_v46, %s5820_s9 }
0x2624   :  { %v3779_v36 = vpop.permute.xlu1 %3778 }
0x2625   :  { %5105 = vmatmul.mubr.msk.f32.vlgmr.msra.gmra.mrb[30].mxu1 %vm2790_vm12, %v3779_v36  ;;  %v3746_v36 = vrot.slane %v6798_v7, %v6711_v25 }
0x2626   :  { %5423 = vmatpush3.bf16.msra.mxu1 %v6677_v54  ;;  %5126 = vmatprep.mubr.msk.f32.mxu1 %vm5818_vm1, %v5819_v63 }
0x2627   :  { %5424 = vmatprep.subr.bf16.mxu1 %v5817_v62 }
0x262a   :  { %5426 = vmatpush3.bf16.msra.mxu1 %v6684_v20  ;;  %v3868_v20 = vpop.permute.xlu1 %3867 }
0x262b   :  { %v3870_v37 = vmul.f32 %v3868_v20, %v3732_v17 }
0x26f8   :  { %v3848_v2 = vpop.f32.mrb[30].mxu1 }
0x26f9   :  { %v3849_v5 = vadd.f32 %v6716_v52, %v3848_v2  ;;  %v5106_v9 = vpop.f32.mrb[31].mxu1  ;;  %v3754_v2 = vrot.slane %v3746_v36, %v6711_v25 }
0x26fb   :  { %v3856_v51 = vadd.f32 %v6160_v4, %v3849_v5  ;;  %v3765_v9 = vrot.slane %v3754_v2, %v6426_v13 }
0x26fd   :  { %5667 = vtanh.f32 %v3856_v51  ;;  %v4639_v19 = vmul.f32 -1.442695, %v3856_v51 }
0x26ff   :  { %5669 = vpow2.f32 %v4639_v19 }
0x2707   :  { %v5668_v46 = vpop.eup %5667 }
0x2708   :  { %3873 = vrot.lane.b32.xlu0 %v5668_v46, %s5825_s16 }
0x2709   :  { %v5670_v54 = vpop.eup %5669 }
0x270a   :  { %v3860_v56 = vadd.f32 1.0, %v5670_v54 }
0x270c   :  { %5671 = vrcp.f32 %v3860_v56  ;;  %v3747_v56 = vcombine.high %v3746_v36, %v3746_v36 }
0x2716   :  { %v5672_v63 = vpop.eup %5671 }
0x2717   :  { %v3871_v41 = vmul.f32 %v5672_v63, %v3870_v37 }
0x277a   :  { %v3874_v50 = vpop.permute.xlu0 %3873 }
0x277b   :  { %v3876_v62 = vmul.f32 %v5672_v63, %v3874_v50  ;;  %v3761_v50 = vrot.slane %v3747_v56, %v6711_v25 }
0x277d   :  { %3878 = vrot.lane.b32.xlu0 %v3876_v62, %s5820_s9 }
0x27ef   :  { %v3879_v21 = vpop.permute.xlu0 %3878 }
0x27f0   :  { %v3881_v58 = vadd.f32 %v3879_v21, %v3871_v41  ;;  %v3769_v41 = vrot.slane %v3761_v50, %v6426_v13 }
0x27f2   :  { %5673 = vtanh.f32 %v3881_v58 }
0x27fc   :  { %v5674_v4 = vpop.eup %5673 }
0x27fd   :  { %3884 = vrot.lane.b32.xlu1 %v5674_v4, %s5825_s16 }
0x286f   :  { %v3885_v42 = vpop.permute.xlu1 %3884 }
0x2870   :  { %v6815_v34 = vmul.f32 %v5672_v63, %v3885_v42 }
0x2872   :  { %3927 = vrot.lane.b32.xlu0 %v6815_v34, %s5820_s9 }
0x2876   :  { %4016 = vrot.lane.b32.xlu0 %v6095_v47, %s5820_s9 }
0x28e4   :  { %v3928_v14 = vpop.permute.xlu0 %3927 }
0x28e5   :  { %5116 = vmatmul.mubr.msk.f32.vlgmr.msra.gmra.mrb[28].mxu0 %vm2790_vm12, %v3928_v14 }
0x28e8   :  { %v4017_v60 = vpop.permute.xlu0 %4016 }
0x28e9   :  { %v4019_v44 = vmul.f32 %v4017_v60, %v3881_v58 }
0x29b8   :  { %v3997_v18 = vpop.f32.mrb[28].mxu0 }
0x29b9   :  { %v3998_v29 = vadd.f32 %v6716_v52, %v3997_v18  ;;  %v5117_v57 = vpop.f32.mrb[29].mxu0 }
0x29ba   :  { %v3299_v57 = vrot.slane %v6745_v39, %v6711_v25  ;;  %v3895_v39 = vrot.slane %v6815_v34, %v6711_v25 }
0x29bb   :  { %v4005_v10 = vadd.f32 %v6166_v8, %v3998_v29 }
0x29bc   :  { %v3300_v60 = vcombine.high %v3299_v57, %v3299_v57 }
0x29bd   :  { %5675 = vtanh.f32 %v4005_v10  ;;  %v4641_v40 = vmul.f32 -1.442695, %v4005_v10 }
0x29bf   :  { %5677 = vpow2.f32 %v4641_v40  ;;  %v3597_v40 = vrot.slane %v6781_v45, %v6711_v25 }
0x29c7   :  { %v5676_v26 = vpop.eup %5675 }
0x29c8   :  { %4022 = vrot.lane.b32.xlu1 %v5676_v26, %s5825_s16  ;;  %v3307_v26 = vrot.slane %v3299_v57, %v6711_v25 }
0x29c9   :  { %v5678_v49 = vpop.eup %5677 }
0x29ca   :  { %v4009_v33 = vadd.f32 1.0, %v5678_v49 }
0x29cc   :  { %5679 = vrcp.f32 %v4009_v33 }
0x29d6   :  { %v5680_v22 = vpop.eup %5679 }
0x29d7   :  { %v4020_v32 = vmul.f32 %v5680_v22, %v4019_v44  ;;  %v3903_v44 = vrot.slane %v3895_v39, %v6711_v25 }
0x29d9   :  { %v3914_v34 = vrot.slane %v3903_v44, %v6426_v13 }
0x2a3a   :  { %v4023_v47 = vpop.permute.xlu1 %4022 }
0x2a3b   :  { %v4025_v31 = vmul.f32 %v5680_v22, %v4023_v47  ;;  %v3605_v47 = vrot.slane %v3597_v40, %v6711_v25 }
0x2a3d   :  { %4027 = vrot.lane.b32.xlu1 %v4025_v31, %s5820_s9  ;;  %v3616_v45 = vrot.slane %v3605_v47, %v6426_v13 }
0x2aaf   :  { %v4028_v16 = vpop.permute.xlu1 %4027 }
0x2ab0   :  { %v4030_v53 = vadd.f32 %v4028_v16, %v4020_v32  ;;  %v3314_v16 = vrot.slane %v3300_v60, %v6711_v25 }
0x2ab2   :  { %5681 = vtanh.f32 %v4030_v53 }
0x2abc   :  { %v5682_v8 = vpop.eup %5681 }
0x2abd   :  { %4033 = vrot.lane.b32.xlu0 %v5682_v8, %s5825_s16 }
0x2b2f   :  { %v4034_v27 = vpop.permute.xlu0 %4033 }
0x2b30   :  { %v4036_v1 = vmul.f32 %v5680_v22, %v4034_v27  ;;  %v3318_v22 = vrot.slane %v3307_v26, %v6426_v13 }
0x2b32   :  { %4076 = vrot.lane.b32.xlu1 %v4036_v1, %s5820_s9  ;;  %v4044_v5 = vrot.slane %v4036_v1, %v6711_v25  ;;  %v3896_v1 = vcombine.high %v3895_v39, %v3895_v39 }
0x2b34   :  { %v4052_v51 = vrot.slane %v4044_v5, %v6711_v25  ;;  %v4045_v62 = vcombine.high %v4044_v5, %v4044_v5 }
0x2b36   :  { %4164 = vrot.lane.b32.xlu1 %v6098_v48, %s5820_s9  ;;  %v3148_v48 = vrot.slane %v6727_v28, %v6711_v25  ;;  %v4063_v19 = vrot.slane %v4052_v51, %v6426_v13  ;;  %v4059_v37 = vrot.slane %v4045_v62, %v6711_v25 }
0x2b38   :  { %v4067_v21 = vrot.slane %v4059_v37, %v6426_v13 }
0x2ba4   :  { %v4077_v43 = vpop.permute.xlu1 %4076 }
0x2ba5   :  { %5127 = vmatmul.mubr.msk.f32.vlgmr.msra.gmra.mrb[32].mxu1 %vm2790_vm12, %v4077_v43 }
0x2ba8   :  { %v4165_v58 = vpop.permute.xlu1 %4164 }
0x2ba9   :  { %v4167_v4 = vmul.f32 %v4165_v58, %v4030_v53  ;;  %v3598_v53 = vcombine.high %v3597_v40, %v3597_v40 }
0x2bab   :  { %v3612_v27 = vrot.slane %v3598_v53, %v6711_v25 }
0x2c78   :  { %v4146_v55 = vpop.f32.mrb[32].mxu1 }
0x2c79   :  { %v4147_v11 = vadd.f32 %v6716_v52, %v4146_v55  ;;  %v5128_v61 = vpop.f32.mrb[33].mxu1  ;;  %v3156_v52 = vrot.slane %v3148_v48, %v6711_v25  ;;  %v3322_v55 = vrot.slane %v3314_v16, %v6426_v13 }
0x2c7b   :  { %v4153_v59 = vadd.f32 %v6163_v6, %v4147_v11  ;;  %v3448_v6 = vrot.slane %v6763_v24, %v6711_v25  ;;  %v3167_v0 = vrot.slane %v3156_v52, %v6426_v13  ;;  %v3149_v24 = vcombine.high %v3148_v48, %v3148_v48  ;;  %v4229_v52 = vld [vmem:[%s6991_s18 + $0x18] sm:$0xff] }
0x2c7c   :  { %v3910_v11 = vrot.slane %v3896_v1, %v6711_v25 }
0x2c7d   :  { %5683 = vtanh.f32 %v4153_v59  ;;  %v4643_v15 = vmul.f32 -1.442695, %v4153_v59  ;;  %v3456_v35 = vrot.slane %v3448_v6, %v6711_v25  ;;  %v3163_v46 = vrot.slane %v3149_v24, %v6711_v25 }
0x2c7e   :  { %v3449_v7 = vcombine.high %v3448_v6, %v3448_v6  ;;  %v3620_v59 = vrot.slane %v3612_v27, %v6426_v13 }
0x2c7f   :  { %5685 = vpow2.f32 %v4643_v15  ;;  %v3467_v28 = vrot.slane %v3456_v35, %v6426_v13  ;;  %v3171_v63 = vrot.slane %v3163_v46, %v6426_v13  ;;  %v4226_v15 = vld [vmem:[%s6991_s18] sm:$0xff] }
0x2c80   :  { %v3463_v54 = vrot.slane %v3449_v7, %v6711_v25 }
0x2c82   :  { %v3471_v20 = vrot.slane %v3463_v54, %v6426_v13 }
0x2c87   :  { %v5684_v3 = vpop.eup %5683 }
0x2c88   :  { %4170 = vrot.lane.b32.xlu0 %v5684_v3, %s5825_s16  ;;  %v3918_v3 = vrot.slane %v3910_v11, %v6426_v13 }
0x2c89   :  { %v5686_v38 = vpop.eup %5685 }
0x2c8a   :  { %v4157_v23 = vadd.f32 1.0, %v5686_v38  ;;  %v4227_v38 = vld [vmem:[%s6991_s18 + $0x8] sm:$0xff] }
0x2c8b   :  { %v5427_v48 = vpack.c.bf16 %v4227_v38, %v4226_v15 }
0x2c8c   :  { %5687 = vrcp.f32 %v4157_v23 }
0x2c8d   :  { %5428 = vmatprep.subr.bf16.mxu0 %v5427_v48 }
0x2c8e   :  { %5430 = vmatpush3.bf16.msra.mxu0 %v5427_v48 }
0x2c96   :  { %v6836_v30 = vpop.eup %5687 }
0x2c97   :  { %v4168_v42 = vmul.f32 %v6836_v30, %v4167_v4 }
0x2cfa   :  { %v4171_v12 = vpop.permute.xlu0 %4170 }
0x2cfb   :  { %v4173_v17 = vmul.f32 %v6836_v30, %v4171_v12  ;;  %v4228_v12 = vld [vmem:[%s6991_s18 + $0x10] sm:$0xff] }
0x2cfd   :  { %4175 = vrot.lane.b32.xlu0 %v4173_v17, %s5820_s9  ;;  %v5431_v17 = vpack.c.bf16 %v4229_v52, %v4228_v12 }
0x2cff   :  { %5432 = vmatprep.subr.bf16.mxu0 %v5431_v17 }
0x2d00   :  { %5434 = vmatpush3.bf16.msra.mxu0 %v5431_v17 }
0x2d01   :  { %3172 = vrot.lane.b32.xlu0 %v3167_v0, %s5820_s9 }
0x2d05   :  { %3472 = vrot.lane.b32.xlu0 %v3467_v28, %s5820_s9 }
0x2d09   :  { %3770 = vrot.lane.b32.xlu0 %v3765_v9, %s5820_s9 }
0x2d0d   :  { %4068 = vrot.lane.b32.xlu0 %v4063_v19, %s5820_s9 }
0x2d11   :  { %3174 = vrot.lane.b32.xlu0 %v3171_v63, %s5820_s9 }
0x2d15   :  { %3474 = vrot.lane.b32.xlu0 %v3471_v20, %s5820_s9 }
0x2d19   :  { %3772 = vrot.lane.b32.xlu0 %v3769_v41, %s5820_s9 }
0x2d1d   :  { %4070 = vrot.lane.b32.xlu0 %v4067_v21, %s5820_s9 }
0x2d6f   :  { %v4176_v14 = vpop.permute.xlu0 %4175 }
0x2d70   :  { %v4178_v18 = vadd.f32 %v4176_v14, %v4168_v42 }
0x2d72   :  { %5689 = vtanh.f32 %v4178_v18 }
0x2d73   :  { %v3173_v29 = vpop.permute.xlu0 %3172 }
0x2d74   :  { %3179 = vst.msk [vmem:[#allocation3 + $0x7] sm:$0x1] %vm3178_vm15, %v3173_v29 }
0x2d77   :  { %v3473_v10 = vpop.permute.xlu0 %3472 }
0x2d78   :  { %3478 = vst.msk [vmem:[#allocation3 + $0x5] sm:$0x1] %vm3178_vm15, %v3473_v10 }
0x2d7b   :  { %v3771_v49 = vpop.permute.xlu0 %3770 }
0x2d7c   :  { %v5690_v33 = vpop.eup %5689  ;;  %3776 = vst.msk [vmem:[#allocation3 + $0x3] sm:$0x1] %vm3178_vm15, %v3771_v49 }
0x2d7d   :  { %4181 = vrot.lane.b32.xlu1 %v5690_v33, %s5825_s16 }
0x2d7f   :  { %v4069_v31 = vpop.permute.xlu0 %4068 }
0x2d80   :  { %4074 = vst.msk [vmem:[#allocation3 + $0x1] sm:$0x1] %vm3178_vm15, %v4069_v31 }
0x2d81   :  { %3323 = vrot.lane.b32.xlu1 %v3318_v22, %s5820_s9 }
0x2d83   :  { %v3175_v32 = vpop.permute.xlu0 %3174 }
0x2d84   :  { %3180 = vst.msk [vmem:[#allocation3 + $0xf] sm:$0x1] %vm3178_vm15, %v3175_v32 }
0x2d85   :  { %3621 = vrot.lane.b32.xlu1 %v3616_v45, %s5820_s9 }
0x2d87   :  { %v3475_v8 = vpop.permute.xlu0 %3474 }
0x2d88   :  { %3479 = vst.msk [vmem:[#allocation3 + $0xd] sm:$0x1] %vm3178_vm15, %v3475_v8 }
0x2d89   :  { %3919 = vrot.lane.b32.xlu1 %v3914_v34, %s5820_s9 }
0x2d8b   :  { %v3773_v43 = vpop.permute.xlu0 %3772 }
0x2d8c   :  { %3777 = vst.msk [vmem:[#allocation3 + $0xb] sm:$0x1] %vm3178_vm15, %v3773_v43 }
0x2d8d   :  { %3325 = vrot.lane.b32.xlu1 %v3322_v55, %s5820_s9 }
0x2d8f   :  { %v4071_v61 = vpop.permute.xlu0 %4070 }
0x2d90   :  { %4075 = vst.msk [vmem:[#allocation3 + $0x9] sm:$0x1] %vm3178_vm15, %v4071_v61 }
0x2d91   :  { %3623 = vrot.lane.b32.xlu1 %v3620_v59, %s5820_s9 }
0x2d95   :  { %3921 = vrot.lane.b32.xlu1 %v3918_v3, %s5820_s9 }
0x2def   :  { %v4182_v23 = vpop.permute.xlu1 %4181 }
0x2df0   :  { %v4184_v6 = vmul.f32 %v6836_v30, %v4182_v23 }
0x2df2   :  { %v4192_v0 = vrot.slane %v4184_v6, %v6711_v25 }
0x2df3   :  { %v3324_v35 = vpop.permute.xlu1 %3323 }
0x2df4   :  { %v4193_v36 = vcombine.high %v4192_v0, %v4192_v0  ;;  %v4200_v28 = vrot.slane %v4192_v0, %v6711_v25  ;;  %3329 = vst.msk [vmem:[#allocation3 + $0x6] sm:$0x1] %vm3178_vm15, %v3324_v35 }
0x2df6   :  { %v4207_v2 = vrot.slane %v4193_v36, %v6711_v25  ;;  %v4211_v5 = vrot.slane %v4200_v28, %v6426_v13 }
0x2df7   :  { %v3622_v24 = vpop.permute.xlu1 %3621 }
0x2df8   :  { %3627 = vst.msk [vmem:[#allocation3 + $0x4] sm:$0x1] %vm3178_vm15, %v3622_v24  ;;  %4216 = vrot.lane.b32.xlu1 %v4211_v5, %s5820_s9  ;;  %v4215_v30 = vrot.slane %v4207_v2, %v6426_v13 }
0x2dfb   :  { %v3920_v9 = vpop.permute.xlu1 %3919 }
0x2dfc   :  { %3925 = vst.msk [vmem:[#allocation3 + $0x2] sm:$0x1] %vm3178_vm15, %v3920_v9  ;;  %4218 = vrot.lane.b32.xlu1 %v4215_v30, %s5820_s9 }
0x2dff   :  { %v3326_v51 = vpop.permute.xlu1 %3325 }
0x2e00   :  { %3330 = vst.msk [vmem:[#allocation3 + $0xe] sm:$0x1] %vm3178_vm15, %v3326_v51 }
0x2e03   :  { %v3624_v46 = vpop.permute.xlu1 %3623 }
0x2e04   :  { %3628 = vst.msk [vmem:[#allocation3 + $0xc] sm:$0x1] %vm3178_vm15, %v3624_v46 }
0x2e07   :  { %v3922_v25 = vpop.permute.xlu1 %3921 }
0x2e08   :  { %3926 = vst.msk [vmem:[#allocation3 + $0xa] sm:$0x1] %vm3178_vm15, %v3922_v25 }
0x2e6a   :  { %v4217_v7 = vpop.permute.xlu1 %4216 }
0x2e6b   :  { %4222 = vst.msk [vmem:[#allocation3] sm:$0x1] %vm3178_vm15, %v4217_v7 }
0x2e6e   :  { %v4219_v19 = vpop.permute.xlu1 %4218 }
0x2e6f   :  { %4223 = vst.msk [vmem:[#allocation3 + $0x8] sm:$0x1] %vm3178_vm15, %v4219_v19 }
0x2e72   :  { %v4224_v13 = vld [vmem:[#allocation3] sm:$0xff] }
0x2e73   :  { %5137 = vmatprep.mubr.msk.f32.mxu0 %vm2790_vm12, %v4224_v13 }
0x2e76   :  { %v4225_v54 = vld [vmem:[#allocation3 + $0x8] sm:$0xff] }
0x2e77   :  { %5138 = vmatmul.mubr.msk.f32.vlgmr.msra.gmra.mrb[30].mxu0 %vm2790_vm12, %v4225_v54 }
0x2e78   :  { %5702 = shalt.err (!%p5699_p4)
}
0x2e79   :  { %s5703_s28 = scalar_lea.hbm %s5976_s6, 32 }
0x2e7a   :  { %p5704_p5 = scmp.ne.s32.totalorder %s5976_s6, %s5703_s28  ;;  %p5707_p6 = scmp.lt.u32.totalorder %s5703_s28, %s5976_s6 }
0x2e7c   :  { %p5709_p7 = pnand %p5707_p6, %p5704_p5 }
0x2e7e   :  { %5712 = shalt.err (!%p5709_p7)
}
0x2e7f   :  { %4329 = dma.vmem_to_hbm [thread:$0]  %s4327_s23, 32, %s5976_s6, [#allocation5]  }
0x2e80   :  { %s5827_s1 = smov [#allocation9]  }
0x2e81   :  { %s4359_s2 = sshll.u32 %s5827_s1, 4  ;;  %s4360_s2 = int_to_ptr.vmem [resolvable:$true] %s4359_s2 }
0x2e82   :  { %s5713_s7 = scalar_lea.vmem %s4360_s2, 128  ;;  %p5718_p9 = scmp.lt.s32.totalorder %s4360_s2, %s4360_s2 }
0x2e83   :  { %p5714_p8 = scmp.ne.s32.totalorder %s4360_s2, %s5713_s7  ;;  %p5719_p10 = scmp.lt.s32.totalorder %s5713_s7, %s5713_s7 }
0x2e85   :  { %p5720_p11 = por %p5719_p10, %p5718_p9 }
0x2e87   :  { %p5721_p12 = pnand %p5720_p11, %p5714_p8 }
0x2e89   :  { %5724 = shalt.err (!%p5721_p12)
}
0x2e8a   :  { %s5725_s10 = scalar_lea.hbm %s5991_s12, 128 }
0x2e8b   :  { %p5726_p13 = scmp.ne.s32.totalorder %s5991_s12, %s5725_s10  ;;  %p5729_p0 = scmp.lt.u32.totalorder %s5725_s10, %s5991_s12 }
0x2e8d   :  { %p5731_p1 = pnand %p5729_p0, %p5726_p13 }
0x2e8f   :  { %5734 = shalt.err (!%p5731_p1)
}
0x2e90   :  { %s5828_s11 = smov 4   ;;  %s6992_s6 = sld [smem:[#allocation26_spill]] }
0x2e91   :  { %4365 = dma.vmem_to_hbm [thread:$0]  %s4360_s2, 128, %s5991_s12, [#allocation10], %s5825_s16, %s5825_s16, %s5828_s11  }
0x2e92   :  { %s5829_s0 = smov [#allocation6]   ;;  %s5830_s9 = smov [#allocation8]  }
0x2e93   :  { %s4335_s5 = sshll.u32 %s5829_s0, 4  ;;  %s4347_s13 = sshll.u32 %s5830_s9, 4  ;;  %s4336_s5 = int_to_ptr.vmem [resolvable:$true] %s4335_s5  ;;  %s6938_s13 = int_to_ptr.vmem [resolvable:$true] %s4347_s13 }
0x2e94   :  { %s5735_s17 = scalar_lea.vmem %s4336_s5, 256  ;;  %p5740_p3 = scmp.lt.s32.totalorder %s4336_s5, %s4336_s5 }
0x2e95   :  { %p5736_p2 = scmp.ne.s32.totalorder %s4336_s5, %s5735_s17  ;;  %p5741_p4 = scmp.lt.s32.totalorder %s5735_s17, %s5735_s17 }
0x2e96   :  { %v4644_v56 = vld [vmem:[%s6992_s6] ss:$0 sm:$0xff] }
0x2e97   :  { %p5742_p5 = por %p5741_p4, %p5740_p3 }
0x2e99   :  { %p5743_p6 = pnand %p5742_p5, %p5736_p2 }
0x2f4a   :  { %v5139_v63 = vpop.f32.mrb[30].mxu0 }
0x2f4b   :  { %v4315_v50 = vadd.f32 %v5139_v63, %v4644_v56  ;;  %v4309_v62 = vpop.f32.mrb[31].mxu0 }
0x2f4c   :  { %v4310_v20 = vadd.f32 %v4644_v56, %v4309_v62 }
0x2f4d   :  { %4319 = vst.msk [vmem:[#allocation6 + $0x8] sm:$0xff] %vm134_vm0, %v4315_v50 }
0x2f4e   :  { %4318 = vst.msk [vmem:[#allocation6] sm:$0xff] %vm134_vm0, %v4310_v20 }
0x2f4f   :  { %5746 = shalt.err (!%p5743_p6)
}
0x2f50   :  { %s5747_s12 = scalar_lea.hbm %s5981_s27, 256 }
0x2f51   :  { %p5748_p7 = scmp.ne.s32.totalorder %s5981_s27, %s5747_s12  ;;  %p5751_p8 = scmp.lt.u32.totalorder %s5747_s12, %s5981_s27 }
0x2f53   :  { %p5753_p9 = pnand %p5751_p8, %p5748_p7 }
0x2f55   :  { %5756 = shalt.err (!%p5753_p9)
}
0x2f56   :  { %s5831_s21 = smov 128   ;;  %s5832_s25 = smov 8  }
0x2f57   :  { %4341 = dma.vmem_to_hbm [thread:$0]  %s4336_s5, 256, %s5981_s27, [#allocation7], %s5831_s21, %s5831_s21, %s5832_s25  }
0x2f58   :  { %s5757_s29 = scalar_lea.vmem %s6938_s13, 128  ;;  %p5762_p11 = scmp.lt.s32.totalorder %s6938_s13, %s6938_s13 }
0x2f59   :  { %p5758_p10 = scmp.ne.s32.totalorder %s6938_s13, %s5757_s29  ;;  %p5763_p12 = scmp.lt.s32.totalorder %s5757_s29, %s5757_s29 }
0x2f5b   :  { %p5764_p13 = por %p5763_p12, %p5762_p11 }
0x2f5d   :  { %p5765_p0 = pnand %p5764_p13, %p5758_p10 }
0x2f5f   :  { %5768 = shalt.err (!%p5765_p0)
}
0x2f60   :  { %s5769_s3 = scalar_lea.hbm %s5986_s4, 128 }
0x2f61   :  { %p5770_p1 = scmp.ne.s32.totalorder %s5986_s4, %s5769_s3  ;;  %p5773_p2 = scmp.lt.u32.totalorder %s5769_s3, %s5986_s4 }
0x2f63   :  { %p5775_p3 = pnand %p5773_p2, %p5770_p1 }
0x2f65   :  { %5778 = shalt.err (!%p5775_p3)
}
0x2f66   :  { %4353 = dma.vmem_to_hbm [thread:$0]  %s6938_s13, 128, %s5986_s4, [#allocation7], %s5825_s16, %s5825_s16, %s5828_s11  }
0x2f67   :  { %5779 = dma.done.wait [#allocation5], 32  }
0x2f68   :  { %5780 = vsyncadd [#allocation5], 4294967264 }
0x2f69   :  { %5781 = dma.done.wait [#allocation7], 384  }
0x2f6a   :  { %5782 = vsyncadd [#allocation7], 4294966912 }
0x2f6b   :  { %5783 = dma.done.wait [#allocation10], 128  }
0x2f6c   :  { %5784 = vsyncadd [#allocation10], 4294967168 }
0x2f6d   :  { %4378 = vsyncpa [#allocation5], 1 }
0x2f6e   :  { %4379 = vsyncpa [#allocation7], 1 }
0x2f6f   :  { %4380 = vsyncpa [#allocation10], 1 }

</bundles_post_ra>
